<compile_context>
chip_gen: v7x
topology: tpu7x:2x2x1
jax: 0.10.0
libtpu: 0.0.40
codegen_flags: <defaults>
</compile_context>

<pallas_src>
import functools
import math

import jax
import jax.numpy as jnp
from jax.experimental import pallas as pl
from jax.experimental.pallas import tpu as pltpu


def _round_up(v, m):
    return (v + m - 1) // m * m


def _vmem_budget_bytes():
    """Per-generation VMEM budget with headroom (v7x: only 64 MiB physical)."""
    cap = None
    try:
        info = pltpu.get_tpu_info()
        for name in ("vmem_capacity_bytes", "vmem_size_bytes", "vmem_bytes"):
            cap = getattr(info, name, None)
            if cap:
                break
    except Exception:
        cap = None
    if not cap:
        cap = 64 * 1024 * 1024                 # conservative (v7x-sized)
    if cap >= 128 * 1024 * 1024:               # v5e / v6e: 128 MiB physical
        return 100 * 1024 * 1024
    return 48 * 1024 * 1024                    # v7x: leave ~16 MiB headroom


# ---------------------------------------------------------------------------
# Fused Pallas kernel
# ---------------------------------------------------------------------------
def _chebnet_fused_kernel(l_ref, x_ref, w01_ref, w11_ref, b1_ref,
                          w02_ref, w12_ref, b2_ref, o_ref, h_ref,
                          *, tm, l_resident):
    """grid = (phase, row_tile).

    phase 0: h[rows]   = relu(x_rows @ W0_1 + (L_rows @ x) @ W1_1 + b1)
    phase 1: out[rows] = log_softmax(h_rows @ W0_2 + (L_rows @ h) @ W1_2 + b2)
    """
    phase = pl.program_id(0)
    row0 = pl.multiple_of(pl.program_id(1) * tm, tm)

    def l_rows():
        # Row tile of L_hat for the current node-row block.
        if l_resident:
            return l_ref[pl.ds(row0, tm), :]
        return l_ref[...]

    @pl.when(phase == 0)
    def _():
        # Big O(N^2) matmul in compute_dtype (bf16 by default), f32 accumulate.
        lx = jnp.dot(l_rows(), x_ref[...], preferred_element_type=jnp.float32)
        x_tile = x_ref[pl.ds(row0, tm), :].astype(jnp.float32)       # [TM, F1p]
        h = (jnp.dot(x_tile, w01_ref[...], preferred_element_type=jnp.float32)
             + jnp.dot(lx, w11_ref[...], preferred_element_type=jnp.float32)
             + b1_ref[...])
        h_ref[pl.ds(row0, tm), :] = jnp.maximum(h, 0.0).astype(h_ref.dtype)

    @pl.when(phase == 1)
    def _():
        lh = jnp.dot(l_rows(), h_ref[...], preferred_element_type=jnp.float32)
        h_tile = h_ref[pl.ds(row0, tm), :].astype(jnp.float32)       # [TM, Hp]
        # Padded class columns already carry -1e30 via b2 -> exp underflows to 0.
        logits = (jnp.dot(h_tile, w02_ref[...], preferred_element_type=jnp.float32)
                  + jnp.dot(lh, w12_ref[...], preferred_element_type=jnp.float32)
                  + b2_ref[...])
        m = jnp.max(logits, axis=-1, keepdims=True)
        s = logits - m
        lse = jnp.log(jnp.sum(jnp.exp(s), axis=-1, keepdims=True))
        o_ref[...] = (s - lse).astype(o_ref.dtype)


# ---------------------------------------------------------------------------
# Wrapper: padding / pallas_call plumbing
# ---------------------------------------------------------------------------
def chebnet_forward(x, l_hat, params, *, tm=None, compute_dtype=jnp.bfloat16,
                    l_resident=None):
    """Full ChebNet forward (inference: dropout == identity).

    compute_dtype: storage/compute dtype of L_hat, x and the hidden scratch h
      (f32 MXU accumulation either way). bf16 (default) halves the dominant
      O(N^2) HBM traffic; pass jnp.float32 to match the torch reference closely.
    tm: node-row tile size (multiple of 8). Default is derived from the VMEM
      budget (256 on v7x, 512 on v5e/v6e), capped at the padded graph size.
    l_resident: force L_hat fully VMEM-resident (True) / streamed row tiles
      (False). Default: auto from the VMEM budget.
    """
    n, f_in = x.shape
    hidden = params["w0_1"].shape[1]
    n_cls = params["w0_2"].shape[1]

    c_dtype = jnp.dtype(compute_dtype)
    itm = c_dtype.itemsize

    # Padded, lane-dense sizes.
    f1p = _round_up(f_in, 128)
    hp = _round_up(hidden, 128)
    cp = _round_up(n_cls, 128)

    budget = _vmem_budget_bytes()
    if tm is None:
        tm = min(512 if budget >= 96 * 1024 * 1024 else 256, _round_up(n, 128))
    assert tm % 8 == 0, "row tile must be a multiple of 8 sublanes"
    # npad is also the lane (last) dim of the streamed L row tile -> keep it a
    # multiple of 128 (and of tm).
    npad = _round_up(n, (tm * 128) // math.gcd(tm, 128))
    n_tiles = npad // tm

    # Decide whether the whole padded L_hat fits in VMEM (one HBM pass instead
    # of two). Conservative accounting: assume double-buffered invariants.
    param_bytes = (2 * f1p * hp + 2 * hp * cp + hp + cp) * 4
    fixed_bytes = (2 * npad * f1p * itm        # x (worst case 2 buffers)
                   + npad * hp * itm           # h scratch
                   + 2 * param_bytes           # weights/biases
                   + 2 * tm * cp * 4)          # output double buffer
    if l_resident is None:
        l_resident = fixed_bytes + 2 * npad * npad * itm <= int(0.8 * budget)

    # Zero-padded operands (exact: padded rows/cols contribute nothing).
    xp = jnp.zeros((npad, f1p), c_dtype).at[:n, :f_in].set(x.astype(c_dtype))
    lp = jnp.zeros((npad, npad), c_dtype).at[:n, :n].set(l_hat.astype(c_dtype))
    w01 = jnp.zeros((f1p, hp), jnp.float32).at[:f_in, :hidden].set(params["w0_1"])
    w11 = jnp.zeros((f1p, hp), jnp.float32).at[:f_in, :hidden].set(params["w1_1"])
    b1 = jnp.zeros((1, hp), jnp.float32).at[0, :hidden].set(params["b1"])
    w02 = jnp.zeros((hp, cp), jnp.float32).at[:hidden, :n_cls].set(params["w0_2"])
    w12 = jnp.zeros((hp, cp), jnp.float32).at[:hidden, :n_cls].set(params["w1_2"])
    # Padded-class mask baked into b2: padded logits are 0 + (-1e30).
    b2 = jnp.full((1, cp), -1e30, jnp.float32).at[0, :n_cls].set(params["b2"])

    l_passes = 1 if l_resident else 2
    cost = pl.CostEstimate(
        flops=int(2 * npad * npad * (f1p + hp)
                  + 4 * npad * f1p * hp + 4 * npad * hp * cp),
        transcendentals=int(npad * (cp + 1)),
        bytes_accessed=int(l_passes * npad * npad * itm + npad * f1p * itm
                           + param_bytes + npad * cp * 4),
    )

    kernel = functools.partial(_chebnet_fused_kernel, tm=tm,
                               l_resident=l_resident)

    def build(single_buffer_invariants):
        # Grid-invariant blocks (constant index_map) don't benefit from double
        # buffering; single-buffer them to free VMEM for bigger tiles.
        inv = ({"pipeline_mode": pl.Buffered(buffer_count=1)}
               if single_buffer_invariants else {})
        if l_resident:
            l_spec = pl.BlockSpec((npad, npad), lambda p, j: (0, 0), **inv)
        else:
            l_spec = pl.BlockSpec((tm, npad), lambda p, j: (j, 0))
        return pl.pallas_call(
            kernel,
            out_shape=jax.ShapeDtypeStruct((npad, cp), jnp.float32),
            grid_spec=pltpu.PrefetchScalarGridSpec(
                num_scalar_prefetch=0,
                grid=(2, n_tiles),                                   # (phase, rows)
                in_specs=[
                    l_spec,                                          # L_hat
                    pl.BlockSpec((npad, f1p), lambda p, j: (0, 0), **inv),  # x
                    pl.BlockSpec((f1p, hp), lambda p, j: (0, 0), **inv),    # W0_1
                    pl.BlockSpec((f1p, hp), lambda p, j: (0, 0), **inv),    # W1_1
                    pl.BlockSpec((1, hp), lambda p, j: (0, 0)),              # b1
                    pl.BlockSpec((hp, cp), lambda p, j: (0, 0), **inv),      # W0_2
                    pl.BlockSpec((hp, cp), lambda p, j: (0, 0), **inv),      # W1_2
                    pl.BlockSpec((1, cp), lambda p, j: (0, 0)),              # b2
                ],
                # Phase 0 never touches the output; alias all phase-0 steps to
                # block (0,0) so every output block is written exactly once
                # (at its last, phase-1 visit) -> no wasted HBM writes.
                out_specs=pl.BlockSpec((tm, cp), lambda p, j: (j * p, 0)),
                scratch_shapes=[pltpu.VMEM((npad, hp), c_dtype)],    # hidden h
            ),
            compiler_params=pltpu.CompilerParams(
                # Row axis must stay "arbitrary": phase 1 consumes ALL of
                # phase 0's hidden activations via the per-core VMEM scratch.
                dimension_semantics=("arbitrary", "arbitrary"),
                vmem_limit_bytes=budget,
            ),
            cost_estimate=cost,
        )

    args = (lp, xp, w01, w11, b1, w02, w12, b2)
    try:
        out_pad = build(single_buffer_invariants=True)(*args)
    except Exception:
        # Fallback for JAX/Mosaic builds that reject Buffered(buffer_count=1):
        # default double-buffering of the grid-invariant operands.
        out_pad = build(single_buffer_invariants=False)(*args)

    # TODO(synk): v7x dual-TensorCore: split into two row-"parallel"
    #   pallas_calls (h round-trips HBM) or keep h in pltpu.VMEM_SHARED + core
    #   barrier so both cores can run the fused kernel.
    # TODO(synk): tile the contraction (K) axis of L@x / L@h for graphs whose
    #   x/h cannot stay VMEM-resident (large N, especially v7x's 64 MiB).
    # TODO(synk): optional fp8 L_hat storage on v7x (per-row scale folded in).
    # TODO(synk): F.dropout with training=True needs an RNG mask; eval mode
    #   (identity) is what is implemented here.
    return out_pad[:n, :n_cls]


# ---------------------------------------------------------------------------
# Graph / parameter construction + pure-JAX reference (plain JAX glue)
# ---------------------------------------------------------------------------
def build_scaled_laplacian(edge_index, num_nodes):
    """Dense L_hat = -D^{-1/2} A D^{-1/2} (sym norm, lambda_max=2, no self-loops)."""
    src, dst = edge_index
    a = jnp.zeros((num_nodes, num_nodes), jnp.float32).at[src, dst].set(1.0)
    deg = a.sum(axis=1)
    d_inv_sqrt = jnp.where(deg > 0, 1.0 / jnp.sqrt(deg), 0.0)
    return -(d_inv_sqrt[:, None] * a * d_inv_sqrt[None, :])


def glorot(key, fan_in, fan_out):
    a = jnp.sqrt(6.0 / (fan_in + fan_out))
    return jax.random.uniform(key, (fan_in, fan_out), jnp.float32, -a, a)


def _reference_forward(x, l_hat, params):
    def conv(xx, w0, w1, b):
        return xx @ w0 + (l_hat @ xx) @ w1 + b
    h = jax.nn.relu(conv(x, params["w0_1"], params["w1_1"], params["b1"]))
    logits = conv(h, params["w0_2"], params["w1_2"], params["b2"])
    return jax.nn.log_softmax(logits, axis=1)


if __name__ == "__main__":
    # Small synthetic graph: N nodes on a ring (undirected -> both directions).
    N_NODES = 16
    NUM_FEATURES = 8
    HIDDEN = 32
    NUM_CLASSES = 4

    key = jax.random.PRNGKey(0)
    k_x, k1a, k1b, kb1, k2a, k2b, kb2 = jax.random.split(key, 7)

    nodes = jnp.arange(N_NODES)
    src = jnp.concatenate([nodes, (nodes + 1) % N_NODES])
    dst = jnp.concatenate([(nodes + 1) % N_NODES, nodes])
    edge_index = jnp.stack([src, dst])                     # [2, 2N]

    x = jax.random.normal(k_x, (N_NODES, NUM_FEATURES), jnp.float32)
    l_hat = build_scaled_laplacian(edge_index, N_NODES)

    params = {
        "w0_1": glorot(k1a, NUM_FEATURES, HIDDEN),
        "w1_1": glorot(k1b, NUM_FEATURES, HIDDEN),
        "b1": 0.1 * jax.random.normal(kb1, (HIDDEN,), jnp.float32),
        "w0_2": glorot(k2a, HIDDEN, NUM_CLASSES),
        "w1_2": glorot(k2b, HIDDEN, NUM_CLASSES),
        "b2": 0.1 * jax.random.normal(kb2, (NUM_CLASSES,), jnp.float32),
    }

    ref = _reference_forward(x, l_hat, params)

    # 1) f32 path (bit-close to the torch reference), resident L, single tile.
    out_f32 = chebnet_forward(x, l_hat, params, compute_dtype=jnp.float32)
    jax.block_until_ready(out_f32)
    assert out_f32.shape == (N_NODES, NUM_CLASSES)
    assert jnp.allclose(jnp.exp(out_f32).sum(axis=1), 1.0, atol=1e-5)
    assert jnp.allclose(out_f32, ref, atol=1e-4, rtol=1e-4)

    # 2) Default bf16-L/x/h path (f32 accumulation).
    out_bf16 = chebnet_forward(x, l_hat, params)
    jax.block_until_ready(out_bf16)
    assert jnp.allclose(jnp.exp(out_bf16).sum(axis=1), 1.0, atol=1e-4)
    assert jnp.allclose(out_bf16, ref, atol=5e-2, rtol=5e-2)

    # 3) Multi-row-tile + streamed-L path (exercises grid=(2, n_tiles) and the
    #    persistent VMEM h scratch across phases).
    out_tiled = chebnet_forward(x, l_hat, params, tm=64, l_resident=False,
                                compute_dtype=jnp.float32)
    jax.block_until_ready(out_tiled)
    assert jnp.allclose(out_tiled, ref, atol=1e-4, rtol=1e-4)

    print("KERNEL_OK")
</pallas_src>

<mosaic_0001>
module attributes {stable_mosaic.version = 11 : i64} {
  func.func @_chebnet_fused_kernel(%arg0: i32, %arg1: i32, %arg2: memref<128x128xf32, #tpu.memory_space<vmem>>, %arg3: memref<128x128xf32, #tpu.memory_space<vmem>>, %arg4: memref<128x128xf32, #tpu.memory_space<vmem>>, %arg5: memref<128x128xf32, #tpu.memory_space<vmem>>, %arg6: memref<1x128xf32, #tpu.memory_space<vmem>>, %arg7: memref<128x128xf32, #tpu.memory_space<vmem>>, %arg8: memref<128x128xf32, #tpu.memory_space<vmem>>, %arg9: memref<1x128xf32, #tpu.memory_space<vmem>>, %arg10: memref<128x128xf32, #tpu.memory_space<vmem>>, %arg11: memref<128x128xf32, #tpu.memory_space<vmem>>) attributes {dimension_semantics = [#tpu.dimension_semantics<arbitrary>, #tpu.dimension_semantics<arbitrary>], iteration_bounds = array<i64: 2, 1>, scalar_prefetch = 0 : i64, scratch_operands = 1 : i64, tpu.core_type = #tpu.core_type<tc>, window_params = [{pipeline_mode = #tpu.pipeline_mode<synchronous>, transform_indices = @transform_0, window_bounds = array<i64: 128, 128>}, {pipeline_mode = #tpu.pipeline_mode<synchronous>, transform_indices = @transform_1, window_bounds = array<i64: 128, 128>}, {pipeline_mode = #tpu.pipeline_mode<synchronous>, transform_indices = @transform_2, window_bounds = array<i64: 128, 128>}, {pipeline_mode = #tpu.pipeline_mode<synchronous>, transform_indices = @transform_3, window_bounds = array<i64: 128, 128>}, {pipeline_mode = #tpu.pipeline_mode<synchronous>, transform_indices = @transform_4, window_bounds = array<i64: 1, 128>}, {pipeline_mode = #tpu.pipeline_mode<synchronous>, transform_indices = @transform_5, window_bounds = array<i64: 128, 128>}, {pipeline_mode = #tpu.pipeline_mode<synchronous>, transform_indices = @transform_6, window_bounds = array<i64: 128, 128>}, {pipeline_mode = #tpu.pipeline_mode<synchronous>, transform_indices = @transform_7, window_bounds = array<i64: 1, 128>}, {transform_indices = @transform_8, window_bounds = array<i64: 128, 128>}]} {
    %c128_i32 = arith.constant 128 : i32
    %0 = arith.muli %arg1, %c128_i32 : i32
    %1 = tpu.assume_multiple %0, 128 : i32
    %c0_i32 = arith.constant 0 : i32
    %2 = arith.cmpi eq, %arg0, %c0_i32 : i32
    %3 = arith.extui %2 : i1 to i32
    %c0_i32_0 = arith.constant 0 : i32
    %4 = arith.cmpi ne, %3, %c0_i32_0 : i32
    scf.if %4 {
      %8 = arith.index_cast %1 : i32 to index
      %c0 = arith.constant 0 : index
      %9 = vector.load %arg2[%8, %c0] : memref<128x128xf32, #tpu.memory_space<vmem>>, vector<128x128xf32>
      %c0_2 = arith.constant 0 : index
      %c0_3 = arith.constant 0 : index
      %10 = vector.load %arg3[%c0_2, %c0_3] : memref<128x128xf32, #tpu.memory_space<vmem>>, vector<128x128xf32>
      %cst = arith.constant dense<0.000000e+00> : vector<128x128xf32>
      %11 = tpu.matmul %9, %10, %cst {dimension_numbers = #tpu.dot_dimension_numbers<[1], [0], [0], [1], [0, 0, 1, 1], [], []>} : vector<128x128xf32>, vector<128x128xf32>, vector<128x128xf32> -> vector<128x128xf32>
      %12 = arith.index_cast %1 : i32 to index
      %c0_4 = arith.constant 0 : index
      %13 = vector.load %arg3[%12, %c0_4] : memref<128x128xf32, #tpu.memory_space<vmem>>, vector<128x128xf32>
      %c0_5 = arith.constant 0 : index
      %c0_6 = arith.constant 0 : index
      %14 = vector.load %arg4[%c0_5, %c0_6] : memref<128x128xf32, #tpu.memory_space<vmem>>, vector<128x128xf32>
      %cst_7 = arith.constant dense<0.000000e+00> : vector<128x128xf32>
      %15 = tpu.matmul %13, %14, %cst_7 {dimension_numbers = #tpu.dot_dimension_numbers<[1], [0], [0], [1], [0, 0, 1, 1], [], []>} : vector<128x128xf32>, vector<128x128xf32>, vector<128x128xf32> -> vector<128x128xf32>
      %c0_8 = arith.constant 0 : index
      %c0_9 = arith.constant 0 : index
      %16 = vector.load %arg5[%c0_8, %c0_9] : memref<128x128xf32, #tpu.memory_space<vmem>>, vector<128x128xf32>
      %cst_10 = arith.constant dense<0.000000e+00> : vector<128x128xf32>
      %17 = tpu.matmul %11, %16, %cst_10 {dimension_numbers = #tpu.dot_dimension_numbers<[1], [0], [0], [1], [0, 0, 1, 1], [], []>} : vector<128x128xf32>, vector<128x128xf32>, vector<128x128xf32> -> vector<128x128xf32>
      %18 = arith.addf %15, %17 : vector<128x128xf32>
      %c0_11 = arith.constant 0 : index
      %c0_12 = arith.constant 0 : index
      %19 = vector.load %arg6[%c0_11, %c0_12] : memref<1x128xf32, #tpu.memory_space<vmem>>, vector<1x128xf32>
      %20 = vector.broadcast %19 : vector<1x128xf32> to vector<128x128xf32>
      %21 = arith.addf %18, %20 : vector<128x128xf32>
      %cst_13 = arith.constant 0.000000e+00 : f32
      %22 = vector.broadcast %cst_13 : f32 to vector<128x128xf32>
      %23 = arith.maximumf %21, %22 : vector<128x128xf32>
      %24 = arith.index_cast %1 : i32 to index
      %c0_14 = arith.constant 0 : index
      %25 = vector.load %arg11[%24, %c0_14] : memref<128x128xf32, #tpu.memory_space<vmem>>, vector<128x128xf32>
      tpu.vector_store %arg11[%24, %c0_14], %23 {strides = array<i32>} : memref<128x128xf32, #tpu.memory_space<vmem>>, vector<128x128xf32>,
    } else {
    }
    %c1_i32 = arith.constant 1 : i32
    %5 = arith.cmpi eq, %arg0, %c1_i32 : i32
    %6 = arith.extui %5 : i1 to i32
    %c0_i32_1 = arith.constant 0 : i32
    %7 = arith.cmpi ne, %6, %c0_i32_1 : i32
    scf.if %7 {
      %8 = arith.index_cast %1 : i32 to index
      %c0 = arith.constant 0 : index
      %9 = vector.load %arg2[%8, %c0] : memref<128x128xf32, #tpu.memory_space<vmem>>, vector<128x128xf32>
      %c0_2 = arith.constant 0 : index
      %c0_3 = arith.constant 0 : index
      %10 = vector.load %arg11[%c0_2, %c0_3] : memref<128x128xf32, #tpu.memory_space<vmem>>, vector<128x128xf32>
      %cst = arith.constant dense<0.000000e+00> : vector<128x128xf32>
      %11 = tpu.matmul %9, %10, %cst {dimension_numbers = #tpu.dot_dimension_numbers<[1], [0], [0], [1], [0, 0, 1, 1], [], []>} : vector<128x128xf32>, vector<128x128xf32>, vector<128x128xf32> -> vector<128x128xf32>
      %12 = arith.index_cast %1 : i32 to index
      %c0_4 = arith.constant 0 : index
      %13 = vector.load %arg11[%12, %c0_4] : memref<128x128xf32, #tpu.memory_space<vmem>>, vector<128x128xf32>
      %c0_5 = arith.constant 0 : index
      %c0_6 = arith.constant 0 : index
      %14 = vector.load %arg7[%c0_5, %c0_6] : memref<128x128xf32, #tpu.memory_space<vmem>>, vector<128x128xf32>
      %cst_7 = arith.constant dense<0.000000e+00> : vector<128x128xf32>
      %15 = tpu.matmul %13, %14, %cst_7 {dimension_numbers = #tpu.dot_dimension_numbers<[1], [0], [0], [1], [0, 0, 1, 1], [], []>} : vector<128x128xf32>, vector<128x128xf32>, vector<128x128xf32> -> vector<128x128xf32>
      %c0_8 = arith.constant 0 : index
      %c0_9 = arith.constant 0 : index
      %16 = vector.load %arg8[%c0_8, %c0_9] : memref<128x128xf32, #tpu.memory_space<vmem>>, vector<128x128xf32>
      %cst_10 = arith.constant dense<0.000000e+00> : vector<128x128xf32>
      %17 = tpu.matmul %11, %16, %cst_10 {dimension_numbers = #tpu.dot_dimension_numbers<[1], [0], [0], [1], [0, 0, 1, 1], [], []>} : vector<128x128xf32>, vector<128x128xf32>, vector<128x128xf32> -> vector<128x128xf32>
      %18 = arith.addf %15, %17 : vector<128x128xf32>
      %c0_11 = arith.constant 0 : index
      %c0_12 = arith.constant 0 : index
      %19 = vector.load %arg9[%c0_11, %c0_12] : memref<1x128xf32, #tpu.memory_space<vmem>>, vector<1x128xf32>
      %20 = vector.broadcast %19 : vector<1x128xf32> to vector<128x128xf32>
      %21 = arith.addf %18, %20 : vector<128x128xf32>
      %cst_13 = arith.constant dense<0xFF800000> : vector<128xf32>
      %22 = vector.multi_reduction <maximumf>, %21, %cst_13 [1] : vector<128x128xf32> to vector<128xf32>
      %23 = vector.shape_cast %22 : vector<128xf32> to vector<128x1xf32>
      %24 = vector.broadcast %23 : vector<128x1xf32> to vector<128x128xf32>
      %25 = arith.subf %21, %24 : vector<128x128xf32>
      %26 = math.exp %25 : vector<128x128xf32>
      %cst_14 = arith.constant dense<0.000000e+00> : vector<128xf32>
      %27 = vector.multi_reduction <add>, %26, %cst_14 [1] : vector<128x128xf32> to vector<128xf32>
      %28 = vector.shape_cast %27 : vector<128xf32> to vector<128x1xf32>
      %29 = math.log %28 : vector<128x1xf32>
      %30 = vector.broadcast %29 : vector<128x1xf32> to vector<128x128xf32>
      %31 = arith.subf %25, %30 : vector<128x128xf32>
      %c0_15 = arith.constant 0 : index
      %c0_16 = arith.constant 0 : index
      %32 = vector.load %arg10[%c0_15, %c0_16] : memref<128x128xf32, #tpu.memory_space<vmem>>, vector<128x128xf32>
      tpu.vector_store %arg10[%c0_15, %c0_16], %31 {strides = array<i32>} : memref<128x128xf32, #tpu.memory_space<vmem>>, vector<128x128xf32>,
    } else {
    }
    return
  }
  func.func @transform_0(%arg0: i32, %arg1: i32) -> (i32, i32) {
    %c0_i32 = arith.constant 0 : i32
    %c0_i32_0 = arith.constant 0 : i32
    %c0_i32_1 = arith.constant 0 : i32
    return %c0_i32, %c0_i32_0 : i32, i32
  }
  func.func @transform_1(%arg0: i32, %arg1: i32) -> (i32, i32) {
    %c0_i32 = arith.constant 0 : i32
    %c0_i32_0 = arith.constant 0 : i32
    %c0_i32_1 = arith.constant 0 : i32
    return %c0_i32, %c0_i32_0 : i32, i32
  }
  func.func @transform_2(%arg0: i32, %arg1: i32) -> (i32, i32) {
    %c0_i32 = arith.constant 0 : i32
    %c0_i32_0 = arith.constant 0 : i32
    %c0_i32_1 = arith.constant 0 : i32
    return %c0_i32, %c0_i32_0 : i32, i32
  }
  func.func @transform_3(%arg0: i32, %arg1: i32) -> (i32, i32) {
    %c0_i32 = arith.constant 0 : i32
    %c0_i32_0 = arith.constant 0 : i32
    %c0_i32_1 = arith.constant 0 : i32
    return %c0_i32, %c0_i32_0 : i32, i32
  }
  func.func @transform_4(%arg0: i32, %arg1: i32) -> (i32, i32) {
    %c0_i32 = arith.constant 0 : i32
    %c0_i32_0 = arith.constant 0 : i32
    %c0_i32_1 = arith.constant 0 : i32
    return %c0_i32, %c0_i32_0 : i32, i32
  }
  func.func @transform_5(%arg0: i32, %arg1: i32) -> (i32, i32) {
    %c0_i32 = arith.constant 0 : i32
    %c0_i32_0 = arith.constant 0 : i32
    %c0_i32_1 = arith.constant 0 : i32
    return %c0_i32, %c0_i32_0 : i32, i32
  }
  func.func @transform_6(%arg0: i32, %arg1: i32) -> (i32, i32) {
    %c0_i32 = arith.constant 0 : i32
    %c0_i32_0 = arith.constant 0 : i32
    %c0_i32_1 = arith.constant 0 : i32
    return %c0_i32, %c0_i32_0 : i32, i32
  }
  func.func @transform_7(%arg0: i32, %arg1: i32) -> (i32, i32) {
    %c0_i32 = arith.constant 0 : i32
    %c0_i32_0 = arith.constant 0 : i32
    %c0_i32_1 = arith.constant 0 : i32
    return %c0_i32, %c0_i32_0 : i32, i32
  }
  func.func @transform_8(%arg0: i32, %arg1: i32) -> (i32, i32) {
    %0 = arith.muli %arg1, %arg0 : i32
    %c0_i32 = arith.constant 0 : i32
    %c0_i32_0 = arith.constant 0 : i32
    return %0, %c0_i32 : i32, i32
  }
}

module attributes {stable_mosaic.version = 11 : i64} {
  func.func @_chebnet_fused_kernel(%arg0: i32, %arg1: i32, %arg2: memref<128x128xf32, #tpu.memory_space<vmem>>, %arg3: memref<128x128xf32, #tpu.memory_space<vmem>>, %arg4: memref<128x128xf32, #tpu.memory_space<vmem>>, %arg5: memref<128x128xf32, #tpu.memory_space<vmem>>, %arg6: memref<1x128xf32, #tpu.memory_space<vmem>>, %arg7: memref<128x128xf32, #tpu.memory_space<vmem>>, %arg8: memref<128x128xf32, #tpu.memory_space<vmem>>, %arg9: memref<1x128xf32, #tpu.memory_space<vmem>>, %arg10: memref<128x128xf32, #tpu.memory_space<vmem>>, %arg11: memref<128x128xf32, #tpu.memory_space<vmem>>) attributes {dimension_semantics = [#tpu.dimension_semantics<arbitrary>, #tpu.dimension_semantics<arbitrary>], iteration_bounds = array<i64: 2, 1>, scalar_prefetch = 0 : i64, scratch_operands = 1 : i64, tpu.core_type = #tpu.core_type<tc>, window_params = [{pipeline_mode = #tpu.pipeline_mode<synchronous>, transform_indices = @transform_0, window_bounds = array<i64: 128, 128>}, {pipeline_mode = #tpu.pipeline_mode<synchronous>, transform_indices = @transform_1, window_bounds = array<i64: 128, 128>}, {pipeline_mode = #tpu.pipeline_mode<synchronous>, transform_indices = @transform_2, window_bounds = array<i64: 128, 128>}, {pipeline_mode = #tpu.pipeline_mode<synchronous>, transform_indices = @transform_3, window_bounds = array<i64: 128, 128>}, {pipeline_mode = #tpu.pipeline_mode<synchronous>, transform_indices = @transform_4, window_bounds = array<i64: 1, 128>}, {pipeline_mode = #tpu.pipeline_mode<synchronous>, transform_indices = @transform_5, window_bounds = array<i64: 128, 128>}, {pipeline_mode = #tpu.pipeline_mode<synchronous>, transform_indices = @transform_6, window_bounds = array<i64: 128, 128>}, {pipeline_mode = #tpu.pipeline_mode<synchronous>, transform_indices = @transform_7, window_bounds = array<i64: 1, 128>}, {transform_indices = @transform_8, window_bounds = array<i64: 128, 128>}]} {
    %c128_i32 = arith.constant 128 : i32
    %0 = arith.muli %arg1, %c128_i32 : i32
    %1 = tpu.assume_multiple %0, 128 : i32
    %c0_i32 = arith.constant 0 : i32
    %2 = arith.cmpi eq, %arg0, %c0_i32 : i32
    %3 = arith.extui %2 : i1 to i32
    %c0_i32_0 = arith.constant 0 : i32
    %4 = arith.cmpi ne, %3, %c0_i32_0 : i32
    scf.if %4 {
      %8 = arith.index_cast %1 : i32 to index
      %c0 = arith.constant 0 : index
      %9 = vector.load %arg2[%8, %c0] : memref<128x128xf32, #tpu.memory_space<vmem>>, vector<128x128xf32>
      %c0_2 = arith.constant 0 : index
      %c0_3 = arith.constant 0 : index
      %10 = vector.load %arg3[%c0_2, %c0_3] : memref<128x128xf32, #tpu.memory_space<vmem>>, vector<128x128xf32>
      %cst = arith.constant dense<0.000000e+00> : vector<128x128xf32>
      %11 = tpu.matmul %9, %10, %cst {dimension_numbers = #tpu.dot_dimension_numbers<[1], [0], [0], [1], [0, 0, 1, 1], [], []>} : vector<128x128xf32>, vector<128x128xf32>, vector<128x128xf32> -> vector<128x128xf32>
      %12 = arith.index_cast %1 : i32 to index
      %c0_4 = arith.constant 0 : index
      %13 = vector.load %arg3[%12, %c0_4] : memref<128x128xf32, #tpu.memory_space<vmem>>, vector<128x128xf32>
      %c0_5 = arith.constant 0 : index
      %c0_6 = arith.constant 0 : index
      %14 = vector.load %arg4[%c0_5, %c0_6] : memref<128x128xf32, #tpu.memory_space<vmem>>, vector<128x128xf32>
      %cst_7 = arith.constant dense<0.000000e+00> : vector<128x128xf32>
      %15 = tpu.matmul %13, %14, %cst_7 {dimension_numbers = #tpu.dot_dimension_numbers<[1], [0], [0], [1], [0, 0, 1, 1], [], []>} : vector<128x128xf32>, vector<128x128xf32>, vector<128x128xf32> -> vector<128x128xf32>
      %c0_8 = arith.constant 0 : index
      %c0_9 = arith.constant 0 : index
      %16 = vector.load %arg5[%c0_8, %c0_9] : memref<128x128xf32, #tpu.memory_space<vmem>>, vector<128x128xf32>
      %cst_10 = arith.constant dense<0.000000e+00> : vector<128x128xf32>
      %17 = tpu.matmul %11, %16, %cst_10 {dimension_numbers = #tpu.dot_dimension_numbers<[1], [0], [0], [1], [0, 0, 1, 1], [], []>} : vector<128x128xf32>, vector<128x128xf32>, vector<128x128xf32> -> vector<128x128xf32>
      %18 = arith.addf %15, %17 : vector<128x128xf32>
      %c0_11 = arith.constant 0 : index
      %c0_12 = arith.constant 0 : index
      %19 = vector.load %arg6[%c0_11, %c0_12] : memref<1x128xf32, #tpu.memory_space<vmem>>, vector<1x128xf32>
      %20 = vector.broadcast %19 : vector<1x128xf32> to vector<128x128xf32>
      %21 = arith.addf %18, %20 : vector<128x128xf32>
      %cst_13 = arith.constant 0.000000e+00 : f32
      %22 = vector.broadcast %cst_13 : f32 to vector<128x128xf32>
      %23 = arith.maximumf %21, %22 : vector<128x128xf32>
      %24 = arith.index_cast %1 : i32 to index
      %c0_14 = arith.constant 0 : index
      %25 = vector.load %arg11[%24, %c0_14] : memref<128x128xf32, #tpu.memory_space<vmem>>, vector<128x128xf32>
      tpu.vector_store %arg11[%24, %c0_14], %23 {strides = array<i32>} : memref<128x128xf32, #tpu.memory_space<vmem>>, vector<128x128xf32>,
    } else {
    }
    %c1_i32 = arith.constant 1 : i32
    %5 = arith.cmpi eq, %arg0, %c1_i32 : i32
    %6 = arith.extui %5 : i1 to i32
    %c0_i32_1 = arith.constant 0 : i32
    %7 = arith.cmpi ne, %6, %c0_i32_1 : i32
    scf.if %7 {
      %8 = arith.index_cast %1 : i32 to index
      %c0 = arith.constant 0 : index
      %9 = vector.load %arg2[%8, %c0] : memref<128x128xf32, #tpu.memory_space<vmem>>, vector<128x128xf32>
      %c0_2 = arith.constant 0 : index
      %c0_3 = arith.constant 0 : index
      %10 = vector.load %arg11[%c0_2, %c0_3] : memref<128x128xf32, #tpu.memory_space<vmem>>, vector<128x128xf32>
      %cst = arith.constant dense<0.000000e+00> : vector<128x128xf32>
      %11 = tpu.matmul %9, %10, %cst {dimension_numbers = #tpu.dot_dimension_numbers<[1], [0], [0], [1], [0, 0, 1, 1], [], []>} : vector<128x128xf32>, vector<128x128xf32>, vector<128x128xf32> -> vector<128x128xf32>
      %12 = arith.index_cast %1 : i32 to index
      %c0_4 = arith.constant 0 : index
      %13 = vector.load %arg11[%12, %c0_4] : memref<128x128xf32, #tpu.memory_space<vmem>>, vector<128x128xf32>
      %c0_5 = arith.constant 0 : index
      %c0_6 = arith.constant 0 : index
      %14 = vector.load %arg7[%c0_5, %c0_6] : memref<128x128xf32, #tpu.memory_space<vmem>>, vector<128x128xf32>
      %cst_7 = arith.constant dense<0.000000e+00> : vector<128x128xf32>
      %15 = tpu.matmul %13, %14, %cst_7 {dimension_numbers = #tpu.dot_dimension_numbers<[1], [0], [0], [1], [0, 0, 1, 1], [], []>} : vector<128x128xf32>, vector<128x128xf32>, vector<128x128xf32> -> vector<128x128xf32>
      %c0_8 = arith.constant 0 : index
      %c0_9 = arith.constant 0 : index
      %16 = vector.load %arg8[%c0_8, %c0_9] : memref<128x128xf32, #tpu.memory_space<vmem>>, vector<128x128xf32>
      %cst_10 = arith.constant dense<0.000000e+00> : vector<128x128xf32>
      %17 = tpu.matmul %11, %16, %cst_10 {dimension_numbers = #tpu.dot_dimension_numbers<[1], [0], [0], [1], [0, 0, 1, 1], [], []>} : vector<128x128xf32>, vector<128x128xf32>, vector<128x128xf32> -> vector<128x128xf32>
      %18 = arith.addf %15, %17 : vector<128x128xf32>
      %c0_11 = arith.constant 0 : index
      %c0_12 = arith.constant 0 : index
      %19 = vector.load %arg9[%c0_11, %c0_12] : memref<1x128xf32, #tpu.memory_space<vmem>>, vector<1x128xf32>
      %20 = vector.broadcast %19 : vector<1x128xf32> to vector<128x128xf32>
      %21 = arith.addf %18, %20 : vector<128x128xf32>
      %cst_13 = arith.constant dense<0xFF800000> : vector<128xf32>
      %22 = vector.multi_reduction <maximumf>, %21, %cst_13 [1] : vector<128x128xf32> to vector<128xf32>
      %23 = vector.shape_cast %22 : vector<128xf32> to vector<128x1xf32>
      %24 = vector.broadcast %23 : vector<128x1xf32> to vector<128x128xf32>
      %25 = arith.subf %21, %24 : vector<128x128xf32>
      %26 = math.exp %25 : vector<128x128xf32>
      %cst_14 = arith.constant dense<0.000000e+00> : vector<128xf32>
      %27 = vector.multi_reduction <add>, %26, %cst_14 [1] : vector<128x128xf32> to vector<128xf32>
      %28 = vector.shape_cast %27 : vector<128xf32> to vector<128x1xf32>
      %29 = math.log %28 : vector<128x1xf32>
      %30 = vector.broadcast %29 : vector<128x1xf32> to vector<128x128xf32>
      %31 = arith.subf %25, %30 : vector<128x128xf32>
      %c0_15 = arith.constant 0 : index
      %c0_16 = arith.constant 0 : index
      %32 = vector.load %arg10[%c0_15, %c0_16] : memref<128x128xf32, #tpu.memory_space<vmem>>, vector<128x128xf32>
      tpu.vector_store %arg10[%c0_15, %c0_16], %31 {strides = array<i32>} : memref<128x128xf32, #tpu.memory_space<vmem>>, vector<128x128xf32>,
    } else {
    }
    return
  }
  func.func @transform_0(%arg0: i32, %arg1: i32) -> (i32, i32) {
    %c0_i32 = arith.constant 0 : i32
    %c0_i32_0 = arith.constant 0 : i32
    %c0_i32_1 = arith.constant 0 : i32
    return %c0_i32, %c0_i32_0 : i32, i32
  }
  func.func @transform_1(%arg0: i32, %arg1: i32) -> (i32, i32) {
    %c0_i32 = arith.constant 0 : i32
    %c0_i32_0 = arith.constant 0 : i32
    %c0_i32_1 = arith.constant 0 : i32
    return %c0_i32, %c0_i32_0 : i32, i32
  }
  func.func @transform_2(%arg0: i32, %arg1: i32) -> (i32, i32) {
    %c0_i32 = arith.constant 0 : i32
    %c0_i32_0 = arith.constant 0 : i32
    %c0_i32_1 = arith.constant 0 : i32
    return %c0_i32, %c0_i32_0 : i32, i32
  }
  func.func @transform_3(%arg0: i32, %arg1: i32) -> (i32, i32) {
    %c0_i32 = arith.constant 0 : i32
    %c0_i32_0 = arith.constant 0 : i32
    %c0_i32_1 = arith.constant 0 : i32
    return %c0_i32, %c0_i32_0 : i32, i32
  }
  func.func @transform_4(%arg0: i32, %arg1: i32) -> (i32, i32) {
    %c0_i32 = arith.constant 0 : i32
    %c0_i32_0 = arith.constant 0 : i32
    %c0_i32_1 = arith.constant 0 : i32
    return %c0_i32, %c0_i32_0 : i32, i32
  }
  func.func @transform_5(%arg0: i32, %arg1: i32) -> (i32, i32) {
    %c0_i32 = arith.constant 0 : i32
    %c0_i32_0 = arith.constant 0 : i32
    %c0_i32_1 = arith.constant 0 : i32
    return %c0_i32, %c0_i32_0 : i32, i32
  }
  func.func @transform_6(%arg0: i32, %arg1: i32) -> (i32, i32) {
    %c0_i32 = arith.constant 0 : i32
    %c0_i32_0 = arith.constant 0 : i32
    %c0_i32_1 = arith.constant 0 : i32
    return %c0_i32, %c0_i32_0 : i32, i32
  }
  func.func @transform_7(%arg0: i32, %arg1: i32) -> (i32, i32) {
    %c0_i32 = arith.constant 0 : i32
    %c0_i32_0 = arith.constant 0 : i32
    %c0_i32_1 = arith.constant 0 : i32
    return %c0_i32, %c0_i32_0 : i32, i32
  }
  func.func @transform_8(%arg0: i32, %arg1: i32) -> (i32, i32) {
    %0 = arith.muli %arg1, %arg0 : i32
    %c0_i32 = arith.constant 0 : i32
    %c0_i32_0 = arith.constant 0 : i32
    return %0, %c0_i32 : i32, i32
  }
}

</mosaic_0001>

<bundles_post_ra>
// kernel: tpu_custom_call.1
= control target key start
LH: loop header
LB: loop body
LE: loop exit
PB: predicated region body
PF: predicated region fallthrough
CT: control target
= control target key end

     0   :  { %s3663_s0 = inlined_call_operand.hbm [shape: f32[128,128], index: 0, kind: input, shape index: {}]   ;;  %s3664_s1 = inlined_call_operand.hbm [shape: f32[128,128], index: 1, kind: input, shape index: {}]   ;;  %s3665_s2 = inlined_call_operand.hbm [shape: f32[128,128], index: 2, kind: input, shape index: {}]   ;;  %s3666_s3 = inlined_call_operand.hbm [shape: f32[128,128], index: 3, kind: input, shape index: {}]   ;;  %s3667_s4 = inlined_call_operand.vmem [shape: f32[1,128], index: 4, kind: input, shape index: {}]   ;;  %s3668_s5 = inlined_call_operand.hbm [shape: f32[128,128], index: 5, kind: input, shape index: {}]   ;;  %s3669_s6 = inlined_call_operand.hbm [shape: f32[128,128], index: 6, kind: input, shape index: {}]   ;;  %s3670_s7 = inlined_call_operand.vmem [shape: f32[1,128], index: 7, kind: input, shape index: {}]   ;;  %s3671_s8 = inlined_call_operand.hbm [shape: f32[128,128], index: 8, kind: output, shape index: {}]  }
   0x1   :  { %3676 = sst [smem:[#allocation20_spill]] %s3664_s1 }
   0x2   :  { %13 = vsyncpa [#allocation4], 0 }
   0x3   :  { %14 = vsyncpa [#allocation7], 0 }
   0x4   :  { %15 = vsyncpa [#allocation10], 0 }
   0x5   :  { %16 = vsyncpa [#allocation13], 0 }
   0x6   :  { %17 = vsyncpa [#allocation5], 0 }
   0x7   :  { %19 = vsyncpa [#allocation5 + $0x1], 0  ;;  %s3096_s27 = smov 0   ;;  %s3098_s28 = smov 0  }
   0x8   :  { %s3100_s29 = smov 0  }
   0x9 LB: > { %s3675_s30 = sadd.s32 4294967295, %s3038_s29   ;;  %p1831_p0 = scmp.ge.s32.totalorder %s3038_s29, 1  ;;  %s3038_s29 = sphi %s3100_s29, %s25_s29   ;;  %s3034_s28 = sphi %s3098_s28, %s3688_s28   ;;  %s3030_s27 = sphi %s3096_s27, %s3687_s27  }
   0xa   : > { %p238_p1 = scmp.lt.s32.totalorder %s3038_s29, 3  ;;  %p3117_p2 = scmp.eq.s32.totalorder %s3675_s30, 0 }
   0xb   : > { %s3040_s12 = smov [#allocation6]   ;;  %s3041_s14 = smov [#allocation9]  }
   0xc   : > { %s3677_s10 = scalar_select %p3117_p2, 1, 0 }
   0xd   : > { %p3121_p3 = pnand %p1831_p0, %p238_p1  ;;  %s263_s13 = sshll.u32 %s3040_s12, 4  ;;  %s264_s13 = int_to_ptr.vmem [resolvable:$true] %s263_s13 }
   0xe   : > { %s289_s15 = sshll.u32 %s3041_s14, 4  ;;  %s3680_s1 = sld [smem:[#allocation20_spill]]  ;;  %s3133_s15 = int_to_ptr.vmem [resolvable:$true] %s289_s15 }
   0xf   : > { %s3678_s11 = scalar_select %p3121_p3, 1, 0 }
  0x10   : > { %p2665_p4 = pneg %p3121_p3 }
  0x12   : > { %p3129_p5 = pnand %p3117_p2, %p2665_p4 }
  0x14   : > { %s2802_s19 = scalar_lea.hbm %s3680_s1, 2048  ;;  %p3143_p7 = pneg %p3129_p5 }
  0x15   : > { %p2803_p6 = scmp.ne.s32.totalorder %s3680_s1, %s2802_s19  ;;  %p2809_p10 = scmp.lt.u32.totalorder %s2802_s19, %s3680_s1 }
  0x17   : > { %p2805_p8 = pnand %p3143_p7, %p2803_p6 }
  0x19   : > { %p2806_p9 = pneg %p2805_p8 }
  0x1b   : > { %p2811_p11 = pnand %p2809_p10, %p2806_p9 }
  0x1d   : > { %2814 = shalt.err (!%p2811_p11)
}
  0x1e   : > { %s2815_s25 = scalar_lea.vmem %s264_s13, 2048  ;;  %p2823_p1 = scmp.lt.s32.totalorder %s264_s13, %s264_s13 }
  0x1f   : > { %p2816_p12 = scmp.ne.s32.totalorder %s264_s13, %s2815_s25  ;;  %p2824_p4 = scmp.lt.s32.totalorder %s2815_s25, %s2815_s25 }
  0x21   : > { %p2818_p13 = pnand %p2816_p12, %p3143_p7  ;;  %p2825_p2 = por %p2824_p4, %p2823_p1 }
  0x23   : > { %p2819_p0 = pneg %p2818_p13 }
  0x25   : > { %p2826_p3 = pnand %p2825_p2, %p2819_p0 }
  0x27   : > { %2829 = shalt.err (!%p2826_p3)
}
  0x28   : > { %s3042_s26 = smov 128   ;;  %s3043_s12 = smov 8  }
  0x29   : > { %2671 = dma.hbm_to_vmem [thread:$0]  (!%p3129_p5), %s3680_s1, 2048, %s264_s13, [#allocation7], %s3042_s26, %s3042_s26, %s3043_s12  }
  0x2a   : > { %s2830_s20 = scalar_lea.hbm %s3666_s3, 2048 }
  0x2b   : > { %p2831_p2 = scmp.ne.s32.totalorder %s3666_s3, %s2830_s20  ;;  %p2837_p8 = scmp.lt.u32.totalorder %s2830_s20, %s3666_s3 }
  0x2d   : > { %p2833_p3 = pnand %p2831_p2, %p3143_p7 }
  0x2f   : > { %p2834_p6 = pneg %p2833_p3 }
  0x31   : > { %p2839_p9 = pnand %p2837_p8, %p2834_p6 }
  0x33   : > { %2842 = shalt.err (!%p2839_p9)
}
  0x34   : > { %s2843_s13 = scalar_lea.vmem %s3133_s15, 2048  ;;  %p2851_p13 = scmp.lt.s32.totalorder %s3133_s15, %s3133_s15 }
  0x35   : > { %p2844_p10 = scmp.ne.s32.totalorder %s3133_s15, %s2843_s13  ;;  %p2852_p0 = scmp.lt.s32.totalorder %s2843_s13, %s2843_s13 }
  0x37   : > { %p2846_p11 = pnand %p2844_p10, %p3143_p7  ;;  %p2853_p1 = por %p2852_p0, %p2851_p13 }
  0x39   : > { %p2847_p12 = pneg %p2846_p11 }
  0x3b   : > { %p2854_p4 = pnand %p2853_p1, %p2847_p12 }
  0x3d   : > { %2857 = shalt.err (!%p2854_p4)
}
  0x3e   : > { %2677 = dma.hbm_to_vmem [thread:$0]  (!%p3129_p5), %s3666_s3, 2048, %s3133_s15, [#allocation10], %s3042_s26, %s3042_s26, %s3043_s12  }
  0x3f   : > { %s37_s18 = sadd.s32 1, %s3034_s28  ;;  %s3044_s19 = smov [#allocation3]  }
  0x40   : > { %p39_p2 = scmp.ge.s32.totalorder %s37_s18, 2  ;;  %s250_s20 = sshll.u32 %s3044_s19, 4  ;;  %s251_s20 = int_to_ptr.vmem [resolvable:$true] %s250_s20 }
  0x41   : > { %s2858_s24 = scalar_lea.hbm %s3663_s0, 2048 }
  0x42   : > { %s3690_s18 = smov (%p39_p2, %s37_s18), 0  ;;  %p2859_p3 = scmp.ne.s32.totalorder %s3663_s0, %s2858_s24 }
  0x43   : > { %p2865_p9 = scmp.lt.u32.totalorder %s2858_s24, %s3663_s0 }
  0x44   : > { %p2861_p6 = pnand %p2859_p3, %p3143_p7 }
  0x46   : > { %p2862_p8 = pneg %p2861_p6 }
  0x48   : > { %p2867_p10 = pnand %p2865_p9, %p2862_p8 }
  0x4a   : > { %2870 = shalt.err (!%p2867_p10)
}
  0x4b   : > { %s2871_s17 = scalar_lea.vmem %s251_s20, 2048  ;;  %p2879_p0 = scmp.lt.s32.totalorder %s251_s20, %s251_s20 }
  0x4c   : > { %p2872_p11 = scmp.ne.s32.totalorder %s251_s20, %s2871_s17  ;;  %p2880_p1 = scmp.lt.s32.totalorder %s2871_s17, %s2871_s17 }
  0x4e   : > { %p2874_p12 = pnand %p2872_p11, %p3143_p7  ;;  %p2881_p4 = por %p2880_p1, %p2879_p0 }
  0x50   : > { %p2875_p13 = pneg %p2874_p12 }
  0x52   : > { %p2882_p2 = pnand %p2881_p4, %p2875_p13 }
  0x54   : > { %2885 = shalt.err (!%p2882_p2)
}
  0x55   : > { %2668 = dma.hbm_to_vmem [thread:$0]  (!%p3129_p5), %s3663_s0, 2048, %s251_s20, [#allocation4], %s3042_s26, %s3042_s26, %s3043_s12  }
  0x56   : > { %s3045_s23 = smov [#allocation8]   ;;  %s3046_s25 = smov [#allocation11]  }
  0x57   : > { %s276_s24 = sshll.u32 %s3045_s23, 4  ;;  %s305_s13 = sshll.u32 %s3046_s25, 4  ;;  %s277_s24 = int_to_ptr.vmem [resolvable:$true] %s276_s24  ;;  %s306_s13 = int_to_ptr.vmem [resolvable:$true] %s305_s13 }
  0x58   : > { %s2886_s17 = scalar_lea.hbm %s3665_s2, 2048 }
  0x59   : > { %p2887_p3 = scmp.ne.s32.totalorder %s3665_s2, %s2886_s17  ;;  %p2893_p9 = scmp.lt.u32.totalorder %s2886_s17, %s3665_s2 }
  0x5b   : > { %p2889_p6 = pnand %p2887_p3, %p3143_p7 }
  0x5d   : > { %p2890_p8 = pneg %p2889_p6 }
  0x5f   : > { %p2895_p10 = pnand %p2893_p9, %p2890_p8 }
  0x61   : > { %2898 = shalt.err (!%p2895_p10)
}
  0x62   : > { %s2899_s20 = scalar_lea.vmem %s277_s24, 2048  ;;  %p2907_p0 = scmp.lt.s32.totalorder %s277_s24, %s277_s24 }
  0x63   : > { %p2900_p11 = scmp.ne.s32.totalorder %s277_s24, %s2899_s20  ;;  %p2908_p1 = scmp.lt.s32.totalorder %s2899_s20, %s2899_s20 }
  0x65   : > { %p2902_p12 = pnand %p2900_p11, %p3143_p7  ;;  %p2909_p4 = por %p2908_p1, %p2907_p0 }
  0x67   : > { %p2903_p13 = pneg %p2902_p12 }
  0x69   : > { %p2910_p2 = pnand %p2909_p4, %p2903_p13 }
  0x6b   : > { %2913 = shalt.err (!%p2910_p2)
}
  0x6c   : > { %2674 = dma.hbm_to_vmem [thread:$0]  (!%p3129_p5), %s3665_s2, 2048, %s277_s24, [#allocation7], %s3042_s26, %s3042_s26, %s3043_s12  }
  0x6d   : > { %s2914_s23 = scalar_lea.hbm %s3668_s5, 2048 }
  0x6e   : > { %p2915_p3 = scmp.ne.s32.totalorder %s3668_s5, %s2914_s23  ;;  %p2921_p9 = scmp.lt.u32.totalorder %s2914_s23, %s3668_s5 }
  0x70   : > { %p2917_p6 = pnand %p2915_p3, %p3143_p7 }
  0x72   : > { %p2918_p8 = pneg %p2917_p6 }
  0x74   : > { %p2923_p10 = pnand %p2921_p9, %p2918_p8 }
  0x76   : > { %2926 = shalt.err (!%p2923_p10)
}
  0x77   : > { %s2927_s19 = scalar_lea.vmem %s306_s13, 2048  ;;  %p2935_p0 = scmp.lt.s32.totalorder %s306_s13, %s306_s13 }
  0x78   : > { %p2928_p11 = scmp.ne.s32.totalorder %s306_s13, %s2927_s19  ;;  %p2936_p1 = scmp.lt.s32.totalorder %s2927_s19, %s2927_s19 }
  0x7a   : > { %p2930_p12 = pnand %p2928_p11, %p3143_p7  ;;  %p2937_p4 = por %p2936_p1, %p2935_p0 }
  0x7c   : > { %p2931_p13 = pneg %p2930_p12 }
  0x7e   : > { %p2938_p2 = pnand %p2937_p4, %p2931_p13 }
  0x80   : > { %2941 = shalt.err (!%p2938_p2)
}
  0x81   : > { %2680 = dma.hbm_to_vmem [thread:$0]  (!%p3129_p5), %s3668_s5, 2048, %s306_s13, [#allocation10], %s3042_s26, %s3042_s26, %s3043_s12  }
  0x82   : > { %s3047_s1 = smov [#allocation12]   ;;  %s2942_s23 = scalar_lea.hbm %s3669_s6, 2048 }
  0x83   : > { %s318_s30 = sshll.u32 %s3047_s1, 4  ;;  %p2943_p3 = scmp.ne.s32.totalorder %s3669_s6, %s2942_s23  ;;  %s319_s30 = int_to_ptr.vmem [resolvable:$true] %s318_s30 }
  0x84   : > { %p2949_p9 = scmp.lt.u32.totalorder %s2942_s23, %s3669_s6 }
  0x85   : > { %p2945_p6 = pnand %p2943_p3, %p3143_p7 }
  0x87   : > { %p2946_p8 = pneg %p2945_p6 }
  0x89   : > { %p2951_p10 = pnand %p2949_p9, %p2946_p8 }
  0x8b   : > { %2954 = shalt.err (!%p2951_p10)
}
  0x8c   : > { %s2955_s13 = scalar_lea.vmem %s319_s30, 2048  ;;  %p2963_p0 = scmp.lt.s32.totalorder %s319_s30, %s319_s30 }
  0x8d   : > { %p2956_p11 = scmp.ne.s32.totalorder %s319_s30, %s2955_s13  ;;  %p2964_p1 = scmp.lt.s32.totalorder %s2955_s13, %s2955_s13 }
  0x8f   : > { %p2958_p12 = pnand %p2956_p11, %p3143_p7  ;;  %p2965_p4 = por %p2964_p1, %p2963_p0 }
  0x91   : > { %p2959_p13 = pneg %p2958_p12 }
  0x93   : > { %p2966_p2 = pnand %p2965_p4, %p2959_p13 }
  0x95   : > { %2969 = shalt.err (!%p2966_p2)
}
  0x96   : > { %2683 = dma.hbm_to_vmem [thread:$0]  (!%p3129_p5), %s3669_s6, 2048, %s319_s30, [#allocation13], %s3042_s26, %s3042_s26, %s3043_s12  }
  0x97   : > { %p3682_p3 = scmp.ne.s32.totalorder %s3678_s11, 0 }
  0x98   : > { %p3683_p7 = scmp.ne.s32.totalorder (!%p3682_p3), %s3677_s10, 0 }
  0x99   : > { %337 = sbr.rel (%p3682_p3) target bundleno = 1527 (0x5f7), region = 52 }
  0xa0   : > { %3009 = dma.done.wait (%p3683_p7), [#allocation4], 2048  }
  0xa1   : > { %3011 = vsyncadd (%p3683_p7), [#allocation4], 4294965248 }
  0xa2   : > { %3013 = dma.done.wait (%p3683_p7), [#allocation7], 4096  }
  0xa3   : > { %3015 = vsyncadd (%p3683_p7), [#allocation7], 4294963200 }
  0xa4   : > { %3017 = dma.done.wait (%p3683_p7), [#allocation10], 4096  }
  0xa5   : > { %3019 = vsyncadd (%p3683_p7), [#allocation10], 4294963200 }
  0xa6   : > { %3021 = dma.done.wait (%p3683_p7), [#allocation13], 2048  }
  0xa7   : > { %3023 = vsyncadd (%p3683_p7), [#allocation13], 4294965248  ;;  %p1845_p5 = scmp.ne.s32.totalorder %s3030_s27, 0 }
  0xa8   : > { %v3294_v0 = vld [vmem:[#allocation6] sm:$0xff] (!%p1845_p5)  ;;  %v3296_v1 = vld [vmem:[#allocation6 + $0x8] sm:$0xff] (!%p1845_p5)  ;;  %v3298_v2 = vld [vmem:[#allocation6 + $0x10] sm:$0xff] (!%p1845_p5) }
  0xa9   : > { %392 = sbr.rel (%p1845_p5) target bundleno = 679 (0x2a7), region = 80  ;;  %v2381_v3 = vpack.c.bf16 (!%p1845_p5), %v3296_v1, %v3294_v0  ;;  %v3302_v4 = vld [vmem:[#allocation6 + $0x18] sm:$0xff] (!%p1845_p5)  ;;  %v3306_v6 = vld [vmem:[#allocation6 + $0x20] sm:$0xff] (!%p1845_p5)  ;;  %v3308_v7 = vld [vmem:[#allocation6 + $0x28] sm:$0xff] (!%p1845_p5) }
  0xaa   : > { %v2385_v5 = vpack.c.bf16 (!%p1845_p5), %v3302_v4, %v3298_v2  ;;  %v2389_v8 = vpack.c.bf16 (!%p1845_p5), %v3308_v7, %v3306_v6  ;;  %v394_v9 = vld [vmem:[#allocation3] sm:$0xff] (!%p1845_p5)  ;;  %v3312_v10 = vld [vmem:[#allocation6 + $0x30] sm:$0xff] (!%p1845_p5)  ;;  %v3314_v11 = vld [vmem:[#allocation6 + $0x38] sm:$0xff] (!%p1845_p5) }
  0xab   : > { %2382 = vmatprep.subr.bf16.mxu0 (!%p1845_p5), %v2381_v3  ;;  %2077 = vmatprep.mubr.f32.mxu0 (!%p1845_p5), %v394_v9  ;;  %v2393_v12 = vpack.c.bf16 (!%p1845_p5), %v3314_v11, %v3312_v10  ;;  %v3318_v13 = vld [vmem:[#allocation6 + $0x40] sm:$0xff] (!%p1845_p5)  ;;  %v3320_v14 = vld [vmem:[#allocation6 + $0x48] sm:$0xff] (!%p1845_p5)  ;;  %v606_v18 = vld [vmem:[#allocation9 + $0x10] sm:$0xff] (!%p1845_p5) }
  0xac   : > { %2384 = vmatpush3.bf16.msra.mxu0 (!%p1845_p5), %v2381_v3  ;;  %v604_v15 = vld [vmem:[#allocation9] sm:$0xff] (!%p1845_p5)  ;;  %v605_v16 = vld [vmem:[#allocation9 + $0x8] sm:$0xff] (!%p1845_p5)  ;;  %v607_v19 = vld [vmem:[#allocation9 + $0x18] sm:$0xff] (!%p1845_p5)  ;;  %v2397_v20 = vpack.c.bf16 (!%p1845_p5), %v3320_v14, %v3318_v13 }
  0xad   : > { %2386 = vmatprep.subr.bf16.mxu0 (!%p1845_p5), %v2385_v5  ;;  %v2413_v17 = vpack.c.bf16 (!%p1845_p5), %v605_v16, %v604_v15  ;;  %v2417_v21 = vpack.c.bf16 (!%p1845_p5), %v607_v19, %v606_v18  ;;  %v608_v22 = vld [vmem:[#allocation9 + $0x20] sm:$0xff] (!%p1845_p5)  ;;  %v609_v23 = vld [vmem:[#allocation9 + $0x28] sm:$0xff] (!%p1845_p5)  ;;  %v3324_v24 = vld [vmem:[#allocation6 + $0x50] sm:$0xff] (!%p1845_p5) }
  0xae   : > { %v3326_v25 = vld [vmem:[#allocation6 + $0x58] sm:$0xff] (!%p1845_p5)  ;;  %v2421_v26 = vpack.c.bf16 (!%p1845_p5), %v609_v23, %v608_v22  ;;  %v610_v28 = vld [vmem:[#allocation9 + $0x30] sm:$0xff] (!%p1845_p5)  ;;  %v3330_v30 = vld [vmem:[#allocation6 + $0x60] sm:$0xff] (!%p1845_p5) }
  0xaf   : > { %2414 = vmatprep.subr.bf16.mxu1 (!%p1845_p5), %v2413_v17  ;;  %v2401_v27 = vpack.c.bf16 (!%p1845_p5), %v3326_v25, %v3324_v24  ;;  %v611_v29 = vld [vmem:[#allocation9 + $0x38] sm:$0xff] (!%p1845_p5)  ;;  %v3332_v31 = vld [vmem:[#allocation6 + $0x68] sm:$0xff] (!%p1845_p5)  ;;  %v612_v34 = vld [vmem:[#allocation9 + $0x40] sm:$0xff] (!%p1845_p5) }
  0xb0   : > { %2388 = vmatpush3.bf16.msra.mxu0 %v2385_v5  ;;  %2416 = vmatpush3.bf16.msra.mxu1 %v2413_v17  ;;  %v2425_v32 = vpack.c.bf16 %v611_v29, %v610_v28  ;;  %v2405_v33 = vpack.c.bf16 %v3332_v31, %v3330_v30  ;;  %v613_v35 = vld [vmem:[#allocation9 + $0x48] sm:$0xff]  ;;  %v3336_v36 = vld [vmem:[#allocation6 + $0x70] sm:$0xff]  ;;  %v3338_v37 = vld [vmem:[#allocation6 + $0x78] sm:$0xff] }
  0xb1   : > { %2390 = vmatprep.subr.bf16.mxu0 %v2389_v8  ;;  %2418 = vmatprep.subr.bf16.mxu1 %v2417_v21  ;;  %v2429_v38 = vpack.c.bf16 %v613_v35, %v612_v34  ;;  %v2409_v39 = vpack.c.bf16 %v3338_v37, %v3336_v36  ;;  %v614_v40 = vld [vmem:[#allocation9 + $0x50] sm:$0xff]  ;;  %v615_v41 = vld [vmem:[#allocation9 + $0x58] sm:$0xff]  ;;  %v588_v42 = vld [vmem:[#allocation8] sm:$0xff] }
  0xb2   : > { %v589_v43 = vld [vmem:[#allocation8 + $0x8] sm:$0xff]  ;;  %v2433_v44 = vpack.c.bf16 %v615_v41, %v614_v40  ;;  %v590_v46 = vld [vmem:[#allocation8 + $0x10] sm:$0xff]  ;;  %v591_v47 = vld [vmem:[#allocation8 + $0x18] sm:$0xff] }
  0xb3   : > { %v3342_v45 = vpack.c.bf16 %v589_v43, %v588_v42  ;;  %v616_v48 = vld [vmem:[#allocation9 + $0x60] sm:$0xff]  ;;  %v617_v49 = vld [vmem:[#allocation9 + $0x68] sm:$0xff]  ;;  %v396_v51 = vld [vmem:[#allocation3 + $0x10] sm:$0xff]  ;;  %v3345_v52 = vpack.c.bf16 %v591_v47, %v590_v46 }
  0xb4   : > { %2392 = vmatpush3.bf16.msra.mxu0 %v2389_v8  ;;  %2420 = vmatpush3.bf16.msra.mxu1 %v2417_v21  ;;  %v395_v50 = vld [vmem:[#allocation3 + $0x8] sm:$0xff]  ;;  %v592_v53 = vld [vmem:[#allocation8 + $0x20] sm:$0xff]  ;;  %v2437_v54 = vpack.c.bf16 %v617_v49, %v616_v48  ;;  %v618_v56 = vld [vmem:[#allocation9 + $0x70] sm:$0xff] }
  0xb5   : > { %2394 = vmatprep.subr.bf16.mxu0 %v2393_v12  ;;  %2422 = vmatprep.subr.bf16.mxu1 %v2421_v26  ;;  %v593_v55 = vld [vmem:[#allocation8 + $0x28] sm:$0xff]  ;;  %v619_v57 = vld [vmem:[#allocation9 + $0x78] sm:$0xff]  ;;  %v398_v59 = vld [vmem:[#allocation3 + $0x20] sm:$0xff] }
  0xb6   : > { %v397_v58 = vld [vmem:[#allocation3 + $0x18] sm:$0xff]  ;;  %v3349_v60 = vpack.c.bf16 %v593_v55, %v592_v53  ;;  %v2441_v61 = vpack.c.bf16 %v619_v57, %v618_v56  ;;  %v594_v62 = vld [vmem:[#allocation8 + $0x30] sm:$0xff]  ;;  %v399_v3 = vld [vmem:[#allocation3 + $0x28] sm:$0xff] }
  0xb7   : > { %v595_v63 = vld [vmem:[#allocation8 + $0x38] sm:$0xff]  ;;  %v400_v5 = vld [vmem:[#allocation3 + $0x30] sm:$0xff]  ;;  %v596_v9 = vld [vmem:[#allocation8 + $0x40] sm:$0xff] }
  0xb8   : > { %2396 = vmatpush3.bf16.msra.mxu0 %v2393_v12  ;;  %2424 = vmatpush3.bf16.msra.mxu1 %v2421_v26  ;;  %v3353_v8 = vpack.c.bf16 %v595_v63, %v594_v62  ;;  %v597_v12 = vld [vmem:[#allocation8 + $0x48] sm:$0xff]  ;;  %v401_v15 = vld [vmem:[#allocation3 + $0x38] sm:$0xff]  ;;  %v402_v16 = vld [vmem:[#allocation3 + $0x40] sm:$0xff] }
  0xb9   : > { %2398 = vmatprep.subr.bf16.mxu0 %v2397_v20  ;;  %2426 = vmatprep.subr.bf16.mxu1 %v2425_v32  ;;  %v3357_v17 = vpack.c.bf16 %v597_v12, %v596_v9  ;;  %v598_v18 = vld [vmem:[#allocation8 + $0x50] sm:$0xff]  ;;  %v599_v19 = vld [vmem:[#allocation8 + $0x58] sm:$0xff]  ;;  %v600_v23 = vld [vmem:[#allocation8 + $0x60] sm:$0xff] }
  0xba   : > { %v404_v21 = vld [vmem:[#allocation3 + $0x50] sm:$0xff]  ;;  %v3362_v22 = vpack.c.bf16 %v599_v19, %v598_v18  ;;  %v601_v26 = vld [vmem:[#allocation8 + $0x68] sm:$0xff]  ;;  %v406_v28 = vld [vmem:[#allocation3 + $0x60] sm:$0xff] }
  0xbb   : > { %v3366_v29 = vpack.c.bf16 %v601_v26, %v600_v23  ;;  %v407_v34 = vld [vmem:[#allocation3 + $0x68] sm:$0xff]  ;;  %v408_v35 = vld [vmem:[#allocation3 + $0x70] sm:$0xff] }
  0xbc   : > { %2400 = vmatpush3.bf16.msra.mxu0 %v2397_v20  ;;  %2428 = vmatpush3.bf16.msra.mxu1 %v2425_v32  ;;  %v403_v20 = vld [vmem:[#allocation3 + $0x48] sm:$0xff]  ;;  %v602_v32 = vld [vmem:[#allocation8 + $0x70] sm:$0xff] }
  0xbd   : > { %2402 = vmatprep.subr.bf16.mxu0 %v2401_v27  ;;  %2430 = vmatprep.subr.bf16.mxu1 %v2429_v38 }
  0xc0   : > { %2404 = vmatpush3.bf16.msra.mxu0 %v2401_v27  ;;  %2432 = vmatpush3.bf16.msra.mxu1 %v2429_v38  ;;  %v405_v27 = vld [vmem:[#allocation3 + $0x58] sm:$0xff] }
  0xc1   : > { %2406 = vmatprep.subr.bf16.mxu0 %v2405_v33  ;;  %2434 = vmatprep.subr.bf16.mxu1 %v2433_v44 }
  0xc4   : > { %2408 = vmatpush3.bf16.msra.mxu0 %v2405_v33  ;;  %2436 = vmatpush3.bf16.msra.mxu1 %v2433_v44  ;;  %v603_v33 = vld [vmem:[#allocation8 + $0x78] sm:$0xff] }
  0xc5   : > { %2410 = vmatprep.subr.bf16.mxu0 %v2409_v39  ;;  %2438 = vmatprep.subr.bf16.mxu1 %v2437_v54  ;;  %v2473_v38 = vpack.c.bf16 %v603_v33, %v602_v32 }
  0xc8   : > { %2412 = vmatpush3.bf16.msra.mxu0 %v2409_v39  ;;  %2440 = vmatpush3.bf16.msra.mxu1 %v2437_v54  ;;  %v409_v39 = vld [vmem:[#allocation3 + $0x78] sm:$0xff] }
  0xc9   : > { %2446 = vmatprep.subr.bf16.mxu0 %v3342_v45  ;;  %2442 = vmatprep.subr.bf16.mxu1 %v2441_v61 }
  0xcb   : > { %2078 = vmatmul.mubr.f32.vlgmr.msra.gmra.mrb[0].mxu0 %v395_v50 }
  0xcc   : > { %2080 = vmatprep.mubr.f32.mxu0 %v396_v51  ;;  %2448 = vmatpush3.bf16.msra.mxu0 %v3342_v45 }
  0xcd   : > { %2450 = vmatprep.subr.bf16.mxu0 %v3345_v52  ;;  %2444 = vmatpush3.bf16.msra.mxu1 %v2441_v61 }
  0xce   : > { %2573 = vmatprep.subr.bf16.mxu1 %v3342_v45 }
  0xcf   : > { %2081 = vmatmul.mubr.f32.gmra.mrb[2].mxu0 %v397_v58 }
  0xd0   : > { %2083 = vmatprep.mubr.f32.mxu0 %v398_v59  ;;  %2452 = vmatpush3.bf16.msra.mxu0 %v3345_v52 }
  0xd1   : > { %2454 = vmatprep.subr.bf16.mxu0 %v3349_v60 }
  0xd3   : > { %2084 = vmatmul.mubr.f32.gmra.mrb[4].mxu0 %v399_v3 }
  0xd4   : > { %2086 = vmatprep.mubr.f32.mxu0 %v400_v5  ;;  %2456 = vmatpush3.bf16.msra.mxu0 %v3349_v60 }
  0xd5   : > { %2458 = vmatprep.subr.bf16.mxu0 %v3353_v8 }
  0xd7   : > { %2087 = vmatmul.mubr.f32.gmra.mrb[6].mxu0 %v401_v15 }
  0xd8   : > { %2089 = vmatprep.mubr.f32.mxu0 %v402_v16  ;;  %2460 = vmatpush3.bf16.msra.mxu0 %v3353_v8 }
  0xd9   : > { %2462 = vmatprep.subr.bf16.mxu0 %v3357_v17 }
  0xdb   : > { %2090 = vmatmul.mubr.f32.gmra.mrb[8].mxu0 %v403_v20 }
  0xdc   : > { %2092 = vmatprep.mubr.f32.mxu0 %v404_v21  ;;  %2464 = vmatpush3.bf16.msra.mxu0 %v3357_v17 }
  0xdd   : > { %2466 = vmatprep.subr.bf16.mxu0 %v3362_v22 }
  0xdf   : > { %2093 = vmatmul.mubr.f32.gmra.mrb[10].mxu0 %v405_v27 }
  0xe0   : > { %2095 = vmatprep.mubr.f32.mxu0 %v406_v28  ;;  %2468 = vmatpush3.bf16.msra.mxu0 %v3362_v22 }
  0xe1   : > { %2470 = vmatprep.subr.bf16.mxu0 %v3366_v29 }
  0xe3   : > { %2096 = vmatmul.mubr.f32.gmra.mrb[12].mxu0 %v407_v34 }
  0xe4   : > { %2098 = vmatprep.mubr.f32.mxu0 %v408_v35  ;;  %2472 = vmatpush3.bf16.msra.mxu0 %v3366_v29 }
  0xe5   : > { %2474 = vmatprep.subr.bf16.mxu0 %v2473_v38 }
  0xe7   : > { %2099 = vmatmul.mubr.f32.gmra.mrb[14].mxu0 %v409_v39 }
  0xe8   : > { %2476 = vmatpush3.bf16.msra.mxu0 %v2473_v38  ;;  %2189 = vmatprep.mubr.f32.mxu0 %v3294_v0 }
  0xeb   : > { %2190 = vmatmul.mubr.f32.vlgmr.msra.gmra.mrb[16].mxu0 %v3296_v1 }
  0xec   : > { %2192 = vmatprep.mubr.f32.mxu0 %v3298_v2 }
  0xef   : > { %2193 = vmatmul.mubr.f32.gmra.mrb[18].mxu0 %v3302_v4 }
  0xf0   : > { %2195 = vmatprep.mubr.f32.mxu0 %v3306_v6 }
  0xf3   : > { %2196 = vmatmul.mubr.f32.gmra.mrb[20].mxu0 %v3308_v7 }
  0xf4   : > { %2198 = vmatprep.mubr.f32.mxu0 %v3312_v10 }
  0xf7   : > { %2199 = vmatmul.mubr.f32.gmra.mrb[22].mxu0 %v3314_v11 }
 0x19e   : > { %v2079_v40 = vpop.f32.mrb[0].mxu0 }
 0x19f   : > { %v492_v41 = vpop.f32.mrb[1].mxu0 }
 0x1a0   : > { %2133 = vmatprep.mubr.f32.mxu1 %v492_v41 }
 0x1a1   : > { %2134 = vmatmul.mubr.f32.vlgmr.msra.gmra.mrb[0].mxu1 %v2079_v40 }
 0x1a2   : > { %2581 = vmatpush3.bf16.msra.mxu1 %v3342_v45  ;;  %v2082_v0 = vpop.f32.mrb[2].mxu0 }
 0x1a3   : > { %v502_v1 = vpop.f32.mrb[3].mxu0  ;;  %2574 = vmatprep.subr.bf16.mxu1 %v3345_v52 }
 0x1a4   : > { %2136 = vmatprep.mubr.f32.mxu1 %v502_v1 }
 0x1a5   : > { %2137 = vmatmul.mubr.f32.gmra.mrb[2].mxu1 %v2082_v0 }
 0x1a6   : > { %2582 = vmatpush3.bf16.msra.mxu1 %v3345_v52  ;;  %v2085_v2 = vpop.f32.mrb[4].mxu0 }
 0x1a7   : > { %v512_v4 = vpop.f32.mrb[5].mxu0  ;;  %2575 = vmatprep.subr.bf16.mxu1 %v3349_v60 }
 0x1a8   : > { %2139 = vmatprep.mubr.f32.mxu1 %v512_v4 }
 0x1a9   : > { %2140 = vmatmul.mubr.f32.gmra.mrb[4].mxu1 %v2085_v2 }
 0x1aa   : > { %2583 = vmatpush3.bf16.msra.mxu1 %v3349_v60  ;;  %v2088_v6 = vpop.f32.mrb[6].mxu0 }
 0x1ab   : > { %v522_v7 = vpop.f32.mrb[7].mxu0  ;;  %2576 = vmatprep.subr.bf16.mxu1 %v3353_v8 }
 0x1ac   : > { %2142 = vmatprep.mubr.f32.mxu1 %v522_v7 }
 0x1ad   : > { %2143 = vmatmul.mubr.f32.gmra.mrb[6].mxu1 %v2088_v6 }
 0x1ae   : > { %2584 = vmatpush3.bf16.msra.mxu1 %v3353_v8  ;;  %v2091_v10 = vpop.f32.mrb[8].mxu0 }
 0x1af   : > { %v532_v11 = vpop.f32.mrb[9].mxu0  ;;  %2577 = vmatprep.subr.bf16.mxu1 %v3357_v17 }
 0x1b0   : > { %2145 = vmatprep.mubr.f32.mxu1 %v532_v11 }
 0x1b1   : > { %2146 = vmatmul.mubr.f32.gmra.mrb[8].mxu1 %v2091_v10 }
 0x1b2   : > { %2585 = vmatpush3.bf16.msra.mxu1 %v3357_v17  ;;  %v2094_v42 = vpop.f32.mrb[10].mxu0 }
 0x1b3   : > { %v542_v43 = vpop.f32.mrb[11].mxu0  ;;  %2578 = vmatprep.subr.bf16.mxu1 %v3362_v22 }
 0x1b4   : > { %2148 = vmatprep.mubr.f32.mxu1 %v542_v43 }
 0x1b5   : > { %2149 = vmatmul.mubr.f32.gmra.mrb[10].mxu1 %v2094_v42 }
 0x1b6   : > { %2586 = vmatpush3.bf16.msra.mxu1 %v3362_v22  ;;  %v2097_v44 = vpop.f32.mrb[12].mxu0 }
 0x1b7   : > { %v552_v45 = vpop.f32.mrb[13].mxu0  ;;  %2579 = vmatprep.subr.bf16.mxu1 %v3366_v29 }
 0x1b8   : > { %2151 = vmatprep.mubr.f32.mxu1 %v552_v45 }
 0x1b9   : > { %2152 = vmatmul.mubr.f32.gmra.mrb[12].mxu1 %v2097_v44 }
 0x1ba   : > { %2587 = vmatpush3.bf16.msra.mxu1 %v3366_v29  ;;  %v2100_v46 = vpop.f32.mrb[14].mxu0 }
 0x1bb   : > { %v562_v47 = vpop.f32.mrb[15].mxu0  ;;  %2580 = vmatprep.subr.bf16.mxu1 %v2473_v38 }
 0x1bc   : > { %2154 = vmatprep.mubr.f32.mxu1 %v562_v47 }
 0x1bd   : > { %2155 = vmatmul.mubr.f32.gmra.mrb[14].mxu1 %v2100_v46 }
 0x1be   : > { %2588 = vmatpush3.bf16.msra.mxu1 %v2473_v38  ;;  %2201 = vmatprep.mubr.f32.mxu1 %v3318_v13  ;;  %v2191_v48 = vpop.f32.mrb[16].mxu0 }
 0x1bf   : > { %v831_v49 = vpop.f32.mrb[17].mxu0 }
 0x1c1   : > { %2202 = vmatmul.mubr.f32.vlgmr.msra.gmra.mrb[8].mxu1 %v3320_v14 }
 0x1c2   : > { %2204 = vmatprep.mubr.f32.mxu1 %v3324_v24  ;;  %v2194_v50 = vpop.f32.mrb[18].mxu0  ;;  %v3403_v24 = vld [vmem:[%s3667_s4] ss:$0 sm:$0xff] }
 0x1c3   : > { %v841_v51 = vpop.f32.mrb[19].mxu0 }
 0x1c5   : > { %2205 = vmatmul.mubr.f32.gmra.mrb[10].mxu1 %v3326_v25 }
 0x1c6   : > { %2207 = vmatprep.mubr.f32.mxu1 %v3330_v30  ;;  %v2197_v52 = vpop.f32.mrb[20].mxu0 }
 0x1c7   : > { %v851_v13 = vpop.f32.mrb[21].mxu0 }
 0x1c9   : > { %2208 = vmatmul.mubr.f32.gmra.mrb[12].mxu1 %v3332_v31 }
 0x1ca   : > { %2210 = vmatprep.mubr.f32.mxu1 %v3336_v36  ;;  %v2200_v53 = vpop.f32.mrb[22].mxu0 }
 0x1cb   : > { %v861_v14 = vpop.f32.mrb[23].mxu0 }
 0x1cd   : > { %2211 = vmatmul.mubr.f32.gmra.mrb[14].mxu1 %v3338_v37 }
 0x274   : > { %v2135_v54 = vpop.f32.mrb[0].mxu1 }
 0x275   : > { %v837_v25 = vadd.f32 %v2191_v48, %v2135_v54  ;;  %v686_v30 = vpop.f32.mrb[1].mxu1 }
 0x276   : > { %v832_v31 = vadd.f32 %v831_v49, %v686_v30 }
 0x277   : > { %v918_v36 = vadd.f32 %v3403_v24, %v837_v25 }
 0x278   : > { %v917_v37 = vadd.f32 %v3403_v24, %v832_v31  ;;  %v2138_v55 = vpop.f32.mrb[2].mxu1 }
 0x279   : > { %v934_v56 = vmax.f32 %v918_v36, 0.0  ;;  %v847_v57 = vadd.f32 %v2194_v50, %v2138_v55  ;;  %v696_v58 = vpop.f32.mrb[3].mxu1 }
 0x27a   : > { %v933_v59 = vmax.f32 %v917_v37, 0.0  ;;  %v842_v60 = vadd.f32 %v841_v51, %v696_v58 }
 0x27b   : > { %951 = vst [vmem:[#allocation2 + $0x8] sm:$0xff] %v934_v56  ;;  %v920_v61 = vadd.f32 %v3403_v24, %v847_v57 }
 0x27c   : > { %950 = vst [vmem:[#allocation2] sm:$0xff] %v933_v59  ;;  %v919_v62 = vadd.f32 %v3403_v24, %v842_v60  ;;  %v2141_v63 = vpop.f32.mrb[4].mxu1 }
 0x27d   : > { %v936_v3 = vmax.f32 %v920_v61, 0.0  ;;  %v857_v5 = vadd.f32 %v2197_v52, %v2141_v63  ;;  %v706_v8 = vpop.f32.mrb[5].mxu1 }
 0x27e   : > { %v935_v9 = vmax.f32 %v919_v62, 0.0  ;;  %v852_v12 = vadd.f32 %v851_v13, %v706_v8 }
 0x27f   : > { %953 = vst [vmem:[#allocation2 + $0x18] sm:$0xff] %v936_v3  ;;  %v922_v15 = vadd.f32 %v3403_v24, %v857_v5 }
 0x280   : > { %952 = vst [vmem:[#allocation2 + $0x10] sm:$0xff] %v935_v9  ;;  %v921_v16 = vadd.f32 %v3403_v24, %v852_v12  ;;  %v2144_v17 = vpop.f32.mrb[6].mxu1 }
 0x281   : > { %v938_v18 = vmax.f32 %v922_v15, 0.0  ;;  %v867_v19 = vadd.f32 %v2200_v53, %v2144_v17  ;;  %v716_v20 = vpop.f32.mrb[7].mxu1 }
 0x282   : > { %v937_v21 = vmax.f32 %v921_v16, 0.0  ;;  %v862_v22 = vadd.f32 %v861_v14, %v716_v20 }
 0x283   : > { %955 = vst [vmem:[#allocation2 + $0x28] sm:$0xff] %v938_v18  ;;  %v924_v23 = vadd.f32 %v3403_v24, %v867_v19 }
 0x284   : > { %954 = vst [vmem:[#allocation2 + $0x20] sm:$0xff] %v937_v21  ;;  %v923_v26 = vadd.f32 %v3403_v24, %v862_v22 }
 0x285   : > { %v940_v27 = vmax.f32 %v924_v23, 0.0 }
 0x286   : > { %v939_v28 = vmax.f32 %v923_v26, 0.0 }
 0x287   : > { %957 = vst [vmem:[#allocation2 + $0x38] sm:$0xff] %v940_v27 }
 0x288   : > { %956 = vst [vmem:[#allocation2 + $0x30] sm:$0xff] %v939_v28 }
 0x294   : > { %v2203_v29 = vpop.f32.mrb[8].mxu1 }
 0x295   : > { %v926_v32 = vadd.f32 %v2203_v29, %v3403_v24  ;;  %v871_v33 = vpop.f32.mrb[9].mxu1 }
 0x296   : > { %v925_v34 = vadd.f32 %v3403_v24, %v871_v33 }
 0x297   : > { %v942_v35 = vmax.f32 %v926_v32, 0.0 }
 0x298   : > { %v941_v38 = vmax.f32 %v925_v34, 0.0  ;;  %v2206_v39 = vpop.f32.mrb[10].mxu1 }
 0x299   : > { %959 = vst [vmem:[#allocation2 + $0x48] sm:$0xff] %v942_v35  ;;  %v928_v40 = vadd.f32 %v2206_v39, %v3403_v24  ;;  %v881_v41 = vpop.f32.mrb[11].mxu1 }
 0x29a   : > { %958 = vst [vmem:[#allocation2 + $0x40] sm:$0xff] %v941_v38  ;;  %v927_v0 = vadd.f32 %v3403_v24, %v881_v41 }
 0x29b   : > { %v944_v1 = vmax.f32 %v928_v40, 0.0 }
 0x29c   : > { %v943_v2 = vmax.f32 %v927_v0, 0.0  ;;  %v2209_v4 = vpop.f32.mrb[12].mxu1 }
 0x29d   : > { %961 = vst [vmem:[#allocation2 + $0x58] sm:$0xff] %v944_v1  ;;  %v930_v6 = vadd.f32 %v2209_v4, %v3403_v24  ;;  %v891_v7 = vpop.f32.mrb[13].mxu1 }
 0x29e   : > { %960 = vst [vmem:[#allocation2 + $0x50] sm:$0xff] %v943_v2  ;;  %v929_v10 = vadd.f32 %v3403_v24, %v891_v7 }
 0x29f   : > { %v946_v11 = vmax.f32 %v930_v6, 0.0 }
 0x2a0   : > { %v945_v42 = vmax.f32 %v929_v10, 0.0  ;;  %v2212_v43 = vpop.f32.mrb[14].mxu1 }
 0x2a1   : > { %963 = vst [vmem:[#allocation2 + $0x68] sm:$0xff] %v946_v11  ;;  %v932_v44 = vadd.f32 %v2212_v43, %v3403_v24  ;;  %v901_v45 = vpop.f32.mrb[15].mxu1 }
 0x2a2   : > { %962 = vst [vmem:[#allocation2 + $0x60] sm:$0xff] %v945_v42  ;;  %v931_v46 = vadd.f32 %v3403_v24, %v901_v45 }
 0x2a3   : > { %v948_v47 = vmax.f32 %v932_v44, 0.0 }
 0x2a4   : > { %v947_v48 = vmax.f32 %v931_v46, 0.0 }
 0x2a5   : > { %965 = vst [vmem:[#allocation2 + $0x78] sm:$0xff] %v948_v47 }
 0x2a6   : > { %964 = vst [vmem:[#allocation2 + $0x70] sm:$0xff] %v947_v48 }
 0x2a7 PF: > { %p1847_p6 = scmp.ne.s32.totalorder %s3030_s27, 1 }
 0x2a8   : > { %v3422_v49 = vld [vmem:[#allocation2] sm:$0xff] (!%p1847_p6)  ;;  %v3424_v50 = vld [vmem:[#allocation2 + $0x8] sm:$0xff] (!%p1847_p6)  ;;  %v3426_v51 = vld [vmem:[#allocation2 + $0x10] sm:$0xff] (!%p1847_p6) }
 0x2a9   : > { %969 = sbr.rel (%p1847_p6) target bundleno = 1503 (0x5df), region = 84  ;;  %v2477_v52 = vpack.c.bf16 (!%p1847_p6), %v3424_v50, %v3422_v49  ;;  %v3430_v13 = vld [vmem:[#allocation2 + $0x18] sm:$0xff] (!%p1847_p6)  ;;  %v3434_v14 = vld [vmem:[#allocation2 + $0x20] sm:$0xff] (!%p1847_p6)  ;;  %v3436_v54 = vld [vmem:[#allocation2 + $0x28] sm:$0xff] (!%p1847_p6) }
 0x2aa   : > { %v2481_v53 = vpack.c.bf16 (!%p1847_p6), %v3430_v13, %v3426_v51  ;;  %v2485_v24 = vpack.c.bf16 (!%p1847_p6), %v3436_v54, %v3434_v14  ;;  %v971_v25 = vld [vmem:[#allocation3] sm:$0xff] (!%p1847_p6)  ;;  %v3440_v30 = vld [vmem:[#allocation2 + $0x30] sm:$0xff] (!%p1847_p6)  ;;  %v3442_v31 = vld [vmem:[#allocation2 + $0x38] sm:$0xff] (!%p1847_p6) }
 0x2ab   : > { %2478 = vmatprep.subr.bf16.mxu0 (!%p1847_p6), %v2477_v52  ;;  %2245 = vmatprep.mubr.f32.mxu0 (!%p1847_p6), %v971_v25  ;;  %v2489_v36 = vpack.c.bf16 (!%p1847_p6), %v3442_v31, %v3440_v30  ;;  %v3446_v37 = vld [vmem:[#allocation2 + $0x40] sm:$0xff] (!%p1847_p6)  ;;  %v3448_v55 = vld [vmem:[#allocation2 + $0x48] sm:$0xff] (!%p1847_p6)  ;;  %v1183_v59 = vld [vmem:[#allocation12 + $0x10] sm:$0xff] (!%p1847_p6) }
 0x2ac   : > { %2480 = vmatpush3.bf16.msra.mxu0 (!%p1847_p6), %v2477_v52  ;;  %v1181_v56 = vld [vmem:[#allocation12] sm:$0xff] (!%p1847_p6)  ;;  %v1182_v57 = vld [vmem:[#allocation12 + $0x8] sm:$0xff] (!%p1847_p6)  ;;  %v1184_v60 = vld [vmem:[#allocation12 + $0x18] sm:$0xff] (!%p1847_p6)  ;;  %v2493_v61 = vpack.c.bf16 (!%p1847_p6), %v3448_v55, %v3446_v37 }
 0x2ad   : > { %2482 = vmatprep.subr.bf16.mxu0 (!%p1847_p6), %v2481_v53  ;;  %v2509_v58 = vpack.c.bf16 (!%p1847_p6), %v1182_v57, %v1181_v56  ;;  %v2513_v62 = vpack.c.bf16 (!%p1847_p6), %v1184_v60, %v1183_v59  ;;  %v1185_v63 = vld [vmem:[#allocation12 + $0x20] sm:$0xff] (!%p1847_p6)  ;;  %v1186_v3 = vld [vmem:[#allocation12 + $0x28] sm:$0xff] (!%p1847_p6)  ;;  %v3452_v5 = vld [vmem:[#allocation2 + $0x50] sm:$0xff] (!%p1847_p6) }
 0x2ae   : > { %v3454_v8 = vld [vmem:[#allocation2 + $0x58] sm:$0xff] (!%p1847_p6)  ;;  %v2517_v9 = vpack.c.bf16 (!%p1847_p6), %v1186_v3, %v1185_v63  ;;  %v1187_v15 = vld [vmem:[#allocation12 + $0x30] sm:$0xff] (!%p1847_p6)  ;;  %v3458_v17 = vld [vmem:[#allocation2 + $0x60] sm:$0xff] (!%p1847_p6) }
 0x2af   : > { %2510 = vmatprep.subr.bf16.mxu1 (!%p1847_p6), %v2509_v58  ;;  %v2497_v12 = vpack.c.bf16 (!%p1847_p6), %v3454_v8, %v3452_v5  ;;  %v1188_v16 = vld [vmem:[#allocation12 + $0x38] sm:$0xff] (!%p1847_p6)  ;;  %v3460_v18 = vld [vmem:[#allocation2 + $0x68] sm:$0xff] (!%p1847_p6)  ;;  %v1189_v21 = vld [vmem:[#allocation12 + $0x40] sm:$0xff] (!%p1847_p6) }
 0x2b0   : > { %2484 = vmatpush3.bf16.msra.mxu0 %v2481_v53  ;;  %2512 = vmatpush3.bf16.msra.mxu1 %v2509_v58  ;;  %v2521_v19 = vpack.c.bf16 %v1188_v16, %v1187_v15  ;;  %v2501_v20 = vpack.c.bf16 %v3460_v18, %v3458_v17  ;;  %v1190_v22 = vld [vmem:[#allocation12 + $0x48] sm:$0xff]  ;;  %v3464_v23 = vld [vmem:[#allocation2 + $0x70] sm:$0xff]  ;;  %v3466_v26 = vld [vmem:[#allocation2 + $0x78] sm:$0xff] }
 0x2b1   : > { %2486 = vmatprep.subr.bf16.mxu0 %v2485_v24  ;;  %2514 = vmatprep.subr.bf16.mxu1 %v2513_v62  ;;  %v2525_v27 = vpack.c.bf16 %v1190_v22, %v1189_v21  ;;  %v2505_v28 = vpack.c.bf16 %v3466_v26, %v3464_v23  ;;  %v1191_v29 = vld [vmem:[#allocation12 + $0x50] sm:$0xff]  ;;  %v1192_v32 = vld [vmem:[#allocation12 + $0x58] sm:$0xff]  ;;  %v1165_v33 = vld [vmem:[#allocation11] sm:$0xff] }
 0x2b2   : > { %v1166_v34 = vld [vmem:[#allocation11 + $0x8] sm:$0xff]  ;;  %v2529_v35 = vpack.c.bf16 %v1192_v32, %v1191_v29  ;;  %v1167_v39 = vld [vmem:[#allocation11 + $0x10] sm:$0xff]  ;;  %v1168_v40 = vld [vmem:[#allocation11 + $0x18] sm:$0xff] }
 0x2b3   : > { %v3470_v38 = vpack.c.bf16 %v1166_v34, %v1165_v33  ;;  %v1193_v41 = vld [vmem:[#allocation12 + $0x60] sm:$0xff]  ;;  %v1194_v0 = vld [vmem:[#allocation12 + $0x68] sm:$0xff]  ;;  %v973_v2 = vld [vmem:[#allocation3 + $0x10] sm:$0xff]  ;;  %v3473_v4 = vpack.c.bf16 %v1168_v40, %v1167_v39 }
 0x2b4   : > { %2488 = vmatpush3.bf16.msra.mxu0 %v2485_v24  ;;  %2516 = vmatpush3.bf16.msra.mxu1 %v2513_v62  ;;  %v972_v1 = vld [vmem:[#allocation3 + $0x8] sm:$0xff]  ;;  %v1169_v6 = vld [vmem:[#allocation11 + $0x20] sm:$0xff]  ;;  %v2533_v7 = vpack.c.bf16 %v1194_v0, %v1193_v41  ;;  %v1195_v11 = vld [vmem:[#allocation12 + $0x70] sm:$0xff] }
 0x2b5   : > { %2490 = vmatprep.subr.bf16.mxu0 %v2489_v36  ;;  %2518 = vmatprep.subr.bf16.mxu1 %v2517_v9  ;;  %v1170_v10 = vld [vmem:[#allocation11 + $0x28] sm:$0xff]  ;;  %v1196_v42 = vld [vmem:[#allocation12 + $0x78] sm:$0xff]  ;;  %v975_v44 = vld [vmem:[#allocation3 + $0x20] sm:$0xff] }
 0x2b6   : > { %v974_v43 = vld [vmem:[#allocation3 + $0x18] sm:$0xff]  ;;  %v3477_v45 = vpack.c.bf16 %v1170_v10, %v1169_v6  ;;  %v2537_v46 = vpack.c.bf16 %v1196_v42, %v1195_v11  ;;  %v1171_v47 = vld [vmem:[#allocation11 + $0x30] sm:$0xff]  ;;  %v976_v52 = vld [vmem:[#allocation3 + $0x28] sm:$0xff] }
 0x2b7   : > { %v1172_v48 = vld [vmem:[#allocation11 + $0x38] sm:$0xff]  ;;  %v977_v53 = vld [vmem:[#allocation3 + $0x30] sm:$0xff]  ;;  %v1173_v25 = vld [vmem:[#allocation11 + $0x40] sm:$0xff] }
 0x2b8   : > { %2492 = vmatpush3.bf16.msra.mxu0 %v2489_v36  ;;  %2520 = vmatpush3.bf16.msra.mxu1 %v2517_v9  ;;  %v3481_v24 = vpack.c.bf16 %v1172_v48, %v1171_v47  ;;  %v1174_v36 = vld [vmem:[#allocation11 + $0x48] sm:$0xff]  ;;  %v978_v56 = vld [vmem:[#allocation3 + $0x38] sm:$0xff]  ;;  %v979_v57 = vld [vmem:[#allocation3 + $0x40] sm:$0xff] }
 0x2b9   : > { %2494 = vmatprep.subr.bf16.mxu0 %v2493_v61  ;;  %2522 = vmatprep.subr.bf16.mxu1 %v2521_v19  ;;  %v3485_v58 = vpack.c.bf16 %v1174_v36, %v1173_v25  ;;  %v1175_v59 = vld [vmem:[#allocation11 + $0x50] sm:$0xff]  ;;  %v1176_v60 = vld [vmem:[#allocation11 + $0x58] sm:$0xff]  ;;  %v1177_v3 = vld [vmem:[#allocation11 + $0x60] sm:$0xff] }
 0x2ba   : > { %v981_v62 = vld [vmem:[#allocation3 + $0x50] sm:$0xff]  ;;  %v3490_v63 = vpack.c.bf16 %v1176_v60, %v1175_v59  ;;  %v1178_v9 = vld [vmem:[#allocation11 + $0x68] sm:$0xff]  ;;  %v983_v15 = vld [vmem:[#allocation3 + $0x60] sm:$0xff] }
 0x2bb   : > { %v3494_v16 = vpack.c.bf16 %v1178_v9, %v1177_v3  ;;  %v984_v21 = vld [vmem:[#allocation3 + $0x68] sm:$0xff]  ;;  %v985_v22 = vld [vmem:[#allocation3 + $0x70] sm:$0xff] }
 0x2bc   : > { %2496 = vmatpush3.bf16.msra.mxu0 %v2493_v61  ;;  %2524 = vmatpush3.bf16.msra.mxu1 %v2521_v19  ;;  %v980_v61 = vld [vmem:[#allocation3 + $0x48] sm:$0xff]  ;;  %v1179_v19 = vld [vmem:[#allocation11 + $0x70] sm:$0xff] }
 0x2bd   : > { %2498 = vmatprep.subr.bf16.mxu0 %v2497_v12  ;;  %2526 = vmatprep.subr.bf16.mxu1 %v2525_v27 }
 0x2c0   : > { %2500 = vmatpush3.bf16.msra.mxu0 %v2497_v12  ;;  %2528 = vmatpush3.bf16.msra.mxu1 %v2525_v27  ;;  %v982_v12 = vld [vmem:[#allocation3 + $0x58] sm:$0xff] }
 0x2c1   : > { %2502 = vmatprep.subr.bf16.mxu0 %v2501_v20  ;;  %2530 = vmatprep.subr.bf16.mxu1 %v2529_v35 }
 0x2c4   : > { %2504 = vmatpush3.bf16.msra.mxu0 %v2501_v20  ;;  %2532 = vmatpush3.bf16.msra.mxu1 %v2529_v35  ;;  %v1180_v20 = vld [vmem:[#allocation11 + $0x78] sm:$0xff] }
 0x2c5   : > { %2506 = vmatprep.subr.bf16.mxu0 %v2505_v28  ;;  %2534 = vmatprep.subr.bf16.mxu1 %v2533_v7  ;;  %v2569_v27 = vpack.c.bf16 %v1180_v20, %v1179_v19 }
 0x2c8   : > { %2508 = vmatpush3.bf16.msra.mxu0 %v2505_v28  ;;  %2536 = vmatpush3.bf16.msra.mxu1 %v2533_v7  ;;  %v986_v28 = vld [vmem:[#allocation3 + $0x78] sm:$0xff] }
 0x2c9   : > { %2542 = vmatprep.subr.bf16.mxu0 %v3470_v38  ;;  %2538 = vmatprep.subr.bf16.mxu1 %v2537_v46 }
 0x2cb   : > { %2246 = vmatmul.mubr.f32.vlgmr.msra.gmra.mrb[0].mxu0 %v972_v1 }
 0x2cc   : > { %2248 = vmatprep.mubr.f32.mxu0 %v973_v2  ;;  %2544 = vmatpush3.bf16.msra.mxu0 %v3470_v38 }
 0x2cd   : > { %2546 = vmatprep.subr.bf16.mxu0 %v3473_v4  ;;  %2540 = vmatpush3.bf16.msra.mxu1 %v2537_v46 }
 0x2ce   : > { %2605 = vmatprep.subr.bf16.mxu1 %v3470_v38 }
 0x2cf   : > { %2249 = vmatmul.mubr.f32.gmra.mrb[2].mxu0 %v974_v43 }
 0x2d0   : > { %2251 = vmatprep.mubr.f32.mxu0 %v975_v44  ;;  %2548 = vmatpush3.bf16.msra.mxu0 %v3473_v4 }
 0x2d1   : > { %2550 = vmatprep.subr.bf16.mxu0 %v3477_v45 }
 0x2d3   : > { %2252 = vmatmul.mubr.f32.gmra.mrb[4].mxu0 %v976_v52 }
 0x2d4   : > { %2254 = vmatprep.mubr.f32.mxu0 %v977_v53  ;;  %2552 = vmatpush3.bf16.msra.mxu0 %v3477_v45 }
 0x2d5   : > { %2554 = vmatprep.subr.bf16.mxu0 %v3481_v24 }
 0x2d7   : > { %2255 = vmatmul.mubr.f32.gmra.mrb[6].mxu0 %v978_v56 }
 0x2d8   : > { %2257 = vmatprep.mubr.f32.mxu0 %v979_v57  ;;  %2556 = vmatpush3.bf16.msra.mxu0 %v3481_v24 }
 0x2d9   : > { %2558 = vmatprep.subr.bf16.mxu0 %v3485_v58 }
 0x2db   : > { %2258 = vmatmul.mubr.f32.gmra.mrb[8].mxu0 %v980_v61 }
 0x2dc   : > { %2260 = vmatprep.mubr.f32.mxu0 %v981_v62  ;;  %2560 = vmatpush3.bf16.msra.mxu0 %v3485_v58 }
 0x2dd   : > { %2562 = vmatprep.subr.bf16.mxu0 %v3490_v63 }
 0x2df   : > { %2261 = vmatmul.mubr.f32.gmra.mrb[10].mxu0 %v982_v12 }
 0x2e0   : > { %2263 = vmatprep.mubr.f32.mxu0 %v983_v15  ;;  %2564 = vmatpush3.bf16.msra.mxu0 %v3490_v63 }
 0x2e1   : > { %2566 = vmatprep.subr.bf16.mxu0 %v3494_v16 }
 0x2e3   : > { %2264 = vmatmul.mubr.f32.gmra.mrb[12].mxu0 %v984_v21 }
 0x2e4   : > { %2266 = vmatprep.mubr.f32.mxu0 %v985_v22  ;;  %2568 = vmatpush3.bf16.msra.mxu0 %v3494_v16 }
 0x2e5   : > { %2570 = vmatprep.subr.bf16.mxu0 %v2569_v27 }
 0x2e7   : > { %2267 = vmatmul.mubr.f32.gmra.mrb[14].mxu0 %v986_v28 }
 0x2e8   : > { %2572 = vmatpush3.bf16.msra.mxu0 %v2569_v27  ;;  %2357 = vmatprep.mubr.f32.mxu0 %v3422_v49 }
 0x2eb   : > { %2358 = vmatmul.mubr.f32.vlgmr.msra.gmra.mrb[16].mxu0 %v3424_v50 }
 0x2ec   : > { %2360 = vmatprep.mubr.f32.mxu0 %v3426_v51 }
 0x2ef   : > { %2361 = vmatmul.mubr.f32.gmra.mrb[18].mxu0 %v3430_v13 }
 0x2f0   : > { %2363 = vmatprep.mubr.f32.mxu0 %v3434_v14 }
 0x2f3   : > { %2364 = vmatmul.mubr.f32.gmra.mrb[20].mxu0 %v3436_v54 }
 0x2f4   : > { %2366 = vmatprep.mubr.f32.mxu0 %v3440_v30 }
 0x2f7   : > { %2367 = vmatmul.mubr.f32.gmra.mrb[22].mxu0 %v3442_v31 }
 0x39e   : > { %v2247_v29 = vpop.f32.mrb[0].mxu0 }
 0x39f   : > { %v1069_v32 = vpop.f32.mrb[1].mxu0 }
 0x3a0   : > { %2301 = vmatprep.mubr.f32.mxu1 %v1069_v32 }
 0x3a1   : > { %2302 = vmatmul.mubr.f32.vlgmr.msra.gmra.mrb[0].mxu1 %v2247_v29 }
 0x3a2   : > { %2613 = vmatpush3.bf16.msra.mxu1 %v3470_v38  ;;  %v2250_v49 = vpop.f32.mrb[2].mxu0 }
 0x3a3   : > { %v1079_v50 = vpop.f32.mrb[3].mxu0  ;;  %2606 = vmatprep.subr.bf16.mxu1 %v3473_v4 }
 0x3a4   : > { %2304 = vmatprep.mubr.f32.mxu1 %v1079_v50 }
 0x3a5   : > { %2305 = vmatmul.mubr.f32.gmra.mrb[2].mxu1 %v2250_v49 }
 0x3a6   : > { %2614 = vmatpush3.bf16.msra.mxu1 %v3473_v4  ;;  %v2253_v51 = vpop.f32.mrb[4].mxu0 }
 0x3a7   : > { %v1089_v13 = vpop.f32.mrb[5].mxu0  ;;  %2607 = vmatprep.subr.bf16.mxu1 %v3477_v45 }
 0x3a8   : > { %2307 = vmatprep.mubr.f32.mxu1 %v1089_v13 }
 0x3a9   : > { %2308 = vmatmul.mubr.f32.gmra.mrb[4].mxu1 %v2253_v51 }
 0x3aa   : > { %2615 = vmatpush3.bf16.msra.mxu1 %v3477_v45  ;;  %v2256_v14 = vpop.f32.mrb[6].mxu0 }
 0x3ab   : > { %v1099_v54 = vpop.f32.mrb[7].mxu0  ;;  %2608 = vmatprep.subr.bf16.mxu1 %v3481_v24 }
 0x3ac   : > { %2310 = vmatprep.mubr.f32.mxu1 %v1099_v54 }
 0x3ad   : > { %2311 = vmatmul.mubr.f32.gmra.mrb[6].mxu1 %v2256_v14 }
 0x3ae   : > { %2616 = vmatpush3.bf16.msra.mxu1 %v3481_v24  ;;  %v2259_v30 = vpop.f32.mrb[8].mxu0 }
 0x3af   : > { %v1109_v31 = vpop.f32.mrb[9].mxu0  ;;  %2609 = vmatprep.subr.bf16.mxu1 %v3485_v58 }
 0x3b0   : > { %2313 = vmatprep.mubr.f32.mxu1 %v1109_v31 }
 0x3b1   : > { %2314 = vmatmul.mubr.f32.gmra.mrb[8].mxu1 %v2259_v30 }
 0x3b2   : > { %2617 = vmatpush3.bf16.msra.mxu1 %v3485_v58  ;;  %v2262_v33 = vpop.f32.mrb[10].mxu0 }
 0x3b3   : > { %v1119_v34 = vpop.f32.mrb[11].mxu0  ;;  %2610 = vmatprep.subr.bf16.mxu1 %v3490_v63 }
 0x3b4   : > { %2316 = vmatprep.mubr.f32.mxu1 %v1119_v34 }
 0x3b5   : > { %2317 = vmatmul.mubr.f32.gmra.mrb[10].mxu1 %v2262_v33 }
 0x3b6   : > { %2618 = vmatpush3.bf16.msra.mxu1 %v3490_v63  ;;  %v2265_v35 = vpop.f32.mrb[12].mxu0 }
 0x3b7   : > { %v1129_v38 = vpop.f32.mrb[13].mxu0  ;;  %2611 = vmatprep.subr.bf16.mxu1 %v3494_v16 }
 0x3b8   : > { %2319 = vmatprep.mubr.f32.mxu1 %v1129_v38 }
 0x3b9   : > { %2320 = vmatmul.mubr.f32.gmra.mrb[12].mxu1 %v2265_v35 }
 0x3ba   : > { %2619 = vmatpush3.bf16.msra.mxu1 %v3494_v16  ;;  %v2268_v39 = vpop.f32.mrb[14].mxu0 }
 0x3bb   : > { %v1139_v40 = vpop.f32.mrb[15].mxu0  ;;  %2612 = vmatprep.subr.bf16.mxu1 %v2569_v27 }
 0x3bc   : > { %2322 = vmatprep.mubr.f32.mxu1 %v1139_v40 }
 0x3bd   : > { %2323 = vmatmul.mubr.f32.gmra.mrb[14].mxu1 %v2268_v39 }
 0x3be   : > { %2620 = vmatpush3.bf16.msra.mxu1 %v2569_v27  ;;  %2369 = vmatprep.mubr.f32.mxu1 %v3446_v37  ;;  %v2359_v41 = vpop.f32.mrb[16].mxu0 }
 0x3bf   : > { %v1408_v0 = vpop.f32.mrb[17].mxu0 }
 0x3c1   : > { %2370 = vmatmul.mubr.f32.vlgmr.msra.gmra.mrb[8].mxu1 %v3448_v55 }
 0x3c2   : > { %2372 = vmatprep.mubr.f32.mxu1 %v3452_v5  ;;  %v2362_v1 = vpop.f32.mrb[18].mxu0  ;;  %v1848_v5 = vld [vmem:[%s3670_s7] ss:$0 sm:$0xff] }
 0x3c3   : > { %v1418_v2 = vpop.f32.mrb[19].mxu0 }
 0x3c5   : > { %2373 = vmatmul.mubr.f32.gmra.mrb[10].mxu1 %v3454_v8 }
 0x3c6   : > { %2375 = vmatprep.mubr.f32.mxu1 %v3458_v17  ;;  %v2365_v4 = vpop.f32.mrb[20].mxu0 }
 0x3c7   : > { %v1428_v37 = vpop.f32.mrb[21].mxu0 }
 0x3c9   : > { %2376 = vmatmul.mubr.f32.gmra.mrb[12].mxu1 %v3460_v18 }
 0x3ca   : > { %2378 = vmatprep.mubr.f32.mxu1 %v3464_v23  ;;  %v2368_v6 = vpop.f32.mrb[22].mxu0 }
 0x3cb   : > { %v1438_v55 = vpop.f32.mrb[23].mxu0 }
 0x3cd   : > { %2379 = vmatmul.mubr.f32.gmra.mrb[14].mxu1 %v3466_v26 }
 0x474   : > { %v2303_v7 = vpop.f32.mrb[0].mxu1 }
 0x475   : > { %v1414_v8 = vadd.f32 %v2359_v41, %v2303_v7  ;;  %v1263_v17 = vpop.f32.mrb[1].mxu1 }
 0x476   : > { %v1409_v18 = vadd.f32 %v1408_v0, %v1263_v17 }
 0x477   : > { %v1495_v10 = vadd.f32 %v1848_v5, %v1414_v8 }
 0x478   : > { %v2306_v23 = vpop.f32.mrb[2].mxu1  ;;  %v1494_v44 = vadd.f32 %v1848_v5, %v1409_v18 }
 0x479   : > { %v1424_v11 = vadd.f32 %v2362_v1, %v2306_v23  ;;  %v1273_v26 = vpop.f32.mrb[3].mxu1  ;;  %1512 = vmax.xlane.f32.xlu0 %v1495_v10 }
 0x47a   : > { %v1419_v42 = vadd.f32 %v1418_v2, %v1273_v26 }
 0x47b   : > { %v1497_v43 = vadd.f32 %v1848_v5, %v1424_v11 }
 0x47c   : > { %v2309_v45 = vpop.f32.mrb[4].mxu1  ;;  %v1496_v52 = vadd.f32 %v1848_v5, %v1419_v42 }
 0x47d   : > { %v1434_v46 = vadd.f32 %v2365_v4, %v2309_v45  ;;  %v1283_v47 = vpop.f32.mrb[5].mxu1  ;;  %1516 = vmax.xlane.f32.xlu1 %v1497_v43  ;;  %1510 = vmax.xlane.f32.xlu0 %v1494_v44 }
 0x47e   : > { %v1429_v48 = vadd.f32 %v1428_v37, %v1283_v47 }
 0x47f   : > { %v1499_v57 = vadd.f32 %v1848_v5, %v1434_v46 }
 0x480   : > { %v2312_v53 = vpop.f32.mrb[6].mxu1  ;;  %v1498_v24 = vadd.f32 %v1848_v5, %v1429_v48 }
 0x481   : > { %v1444_v25 = vadd.f32 %v2368_v6, %v2312_v53  ;;  %v1293_v36 = vpop.f32.mrb[7].mxu1  ;;  %1514 = vmax.xlane.f32.xlu1 %v1496_v52 }
 0x482   : > { %v1439_v56 = vadd.f32 %v1438_v55, %v1293_v36  ;;  %1518 = vmax.xlane.f32.xlu0 %v1498_v24 }
 0x483   : > { %v1501_v59 = vadd.f32 %v1848_v5, %v1444_v25 }
 0x484   : > { %v1500_v58 = vadd.f32 %v1848_v5, %v1439_v56 }
 0x485   : > { %1520 = vmax.xlane.f32.xlu1 %v1499_v57 }
 0x486   : > { %1522 = vmax.xlane.f32.xlu0 %v1500_v58 }
 0x489   : > { %1524 = vmax.xlane.f32.xlu1 %v1501_v59 }
 0x494   : > { %v2371_v60 = vpop.f32.mrb[8].mxu1 }
 0x495   : > { %v3531_v61 = vadd.f32 %v2371_v60, %v1848_v5  ;;  %v1448_v62 = vpop.f32.mrb[9].mxu1 }
 0x496   : > { %v3533_v63 = vadd.f32 %v1848_v5, %v1448_v62 }
 0x497   : > { %1528 = vmax.xlane.f32.xlu1 %v3531_v61 }
 0x498   : > { %1526 = vmax.xlane.f32.xlu0 %v3533_v63  ;;  %v2374_v3 = vpop.f32.mrb[10].mxu1 }
 0x499   : > { %v3537_v9 = vadd.f32 %v2374_v3, %v1848_v5  ;;  %v1458_v12 = vpop.f32.mrb[11].mxu1 }
 0x49a   : > { %v3539_v15 = vadd.f32 %v1848_v5, %v1458_v12 }
 0x49b   : > { %1532 = vmax.xlane.f32.xlu1 %v3537_v9 }
 0x49c   : > { %1530 = vmax.xlane.f32.xlu0 %v3539_v15  ;;  %v2377_v16 = vpop.f32.mrb[12].mxu1 }
 0x49d   : > { %v3543_v19 = vadd.f32 %v2377_v16, %v1848_v5  ;;  %v1468_v20 = vpop.f32.mrb[13].mxu1 }
 0x49e   : > { %v3545_v21 = vadd.f32 %v1848_v5, %v1468_v20 }
 0x49f   : > { %1536 = vmax.xlane.f32.xlu1 %v3543_v19 }
 0x4a0   : > { %1534 = vmax.xlane.f32.xlu0 %v3545_v21  ;;  %v2380_v22 = vpop.f32.mrb[14].mxu1 }
 0x4a1   : > { %v3549_v27 = vadd.f32 %v2380_v22, %v1848_v5  ;;  %v1478_v28 = vpop.f32.mrb[15].mxu1 }
 0x4a2   : > { %v3551_v29 = vadd.f32 %v1848_v5, %v1478_v28 }
 0x4a3   : > { %1540 = vmax.xlane.f32.xlu1 %v3549_v27 }
 0x4a4   : > { %1538 = vmax.xlane.f32.xlu0 %v3551_v29 }
 0x506   : > { %v1513_v32 = vpop.xlane.xlu0 %1512 }
 0x507   : > { %v3555_v49 = vsub.f32 %v1495_v10, %v1513_v32 }
 0x509   : > { %v1560_v50 = vmul.f32 1.442695, %v3555_v49 }
 0x50a   : > { %v1517_v51 = vpop.xlane.xlu1 %1516  ;;  %v1511_v13 = vpop.xlane.xlu0 %1510 }
 0x50b   : > { %2738 = vpow2.f32 %v1560_v50  ;;  %v3558_v14 = vsub.f32 %v1497_v43, %v1517_v51  ;;  %v3560_v54 = vsub.f32 %v1494_v44, %v1511_v13 }
 0x50d   : > { %v1564_v30 = vmul.f32 1.442695, %v3558_v14  ;;  %v1558_v31 = vmul.f32 1.442695, %v3560_v54 }
 0x50e   : > { %v1515_v33 = vpop.xlane.xlu1 %1514 }
 0x50f   : > { %2740 = vpow2.f32 %v1564_v30  ;;  %v3564_v34 = vsub.f32 %v1496_v52, %v1515_v33  ;;  %v1519_v35 = vpop.xlane.xlu0 %1518 }
 0x510   : > { %2742 = vpow2.f32 %v1558_v31  ;;  %v3566_v38 = vsub.f32 %v1498_v24, %v1519_v35 }
 0x511   : > { %v1562_v39 = vmul.f32 1.442695, %v3564_v34 }
 0x512   : > { %v1521_v40 = vpop.xlane.xlu1 %1520  ;;  %v1566_v1 = vmul.f32 1.442695, %v3566_v38 }
 0x513   : > { %2744 = vpow2.f32 %v1562_v39  ;;  %v3569_v41 = vsub.f32 %v1499_v57, %v1521_v40  ;;  %v1523_v0 = vpop.xlane.xlu0 %1522 }
 0x514   : > { %v3572_v2 = vsub.f32 %v1500_v58, %v1523_v0 }
 0x515   : > { %v2739_v4 = vpop.eup %2738  ;;  %v1568_v37 = vmul.f32 1.442695, %v3569_v41 }
 0x516   : > { %v1525_v6 = vpop.xlane.xlu1 %1524  ;;  %1592 = vadd.xlane.f32.xlu1 %v2739_v4  ;;  %v1570_v7 = vmul.f32 1.442695, %v3572_v2 }
 0x517   : > { %2746 = vpow2.f32 %v1568_v37  ;;  %v3575_v55 = vsub.f32 %v1501_v59, %v1525_v6 }
 0x518   : > { %2748 = vpow2.f32 %v1566_v1 }
 0x519   : > { %v2741_v5 = vpop.eup %2740  ;;  %v1572_v8 = vmul.f32 1.442695, %v3575_v55 }
 0x51a   : > { %v2743_v17 = vpop.eup %2742  ;;  %1596 = vadd.xlane.f32.xlu1 %v2741_v5 }
 0x51b   : > { %2750 = vpow2.f32 %v1572_v8  ;;  %1590 = vadd.xlane.f32.xlu0 %v2743_v17 }
 0x51c   : > { %2752 = vpow2.f32 %v1570_v7 }
 0x51d   : > { %v2745_v18 = vpop.eup %2744 }
 0x51f   : > { %1594 = vadd.xlane.f32.xlu0 %v2745_v18 }
 0x521   : > { %v2747_v10 = vpop.eup %2746 }
 0x522   : > { %v2749_v23 = vpop.eup %2748  ;;  %1600 = vadd.xlane.f32.xlu1 %v2747_v10 }
 0x523   : > { %1598 = vadd.xlane.f32.xlu0 %v2749_v23 }
 0x524   : > { %v1529_v11 = vpop.xlane.xlu1 %1528 }
 0x525   : > { %v2751_v26 = vpop.eup %2750  ;;  %v3580_v42 = vsub.f32 %v3531_v61, %v1529_v11  ;;  %v1527_v43 = vpop.xlane.xlu0 %1526 }
 0x526   : > { %v2753_v44 = vpop.eup %2752  ;;  %v3583_v45 = vsub.f32 %v3533_v63, %v1527_v43  ;;  %1604 = vadd.xlane.f32.xlu1 %v2751_v26 }
 0x527   : > { %v1576_v46 = vmul.f32 1.442695, %v3580_v42  ;;  %1602 = vadd.xlane.f32.xlu0 %v2753_v44 }
 0x528   : > { %v1574_v47 = vmul.f32 1.442695, %v3583_v45  ;;  %v1533_v48 = vpop.xlane.xlu1 %1532 }
 0x529   : > { %2754 = vpow2.f32 %v1576_v46  ;;  %v3588_v52 = vsub.f32 %v3537_v9, %v1533_v48  ;;  %v1531_v53 = vpop.xlane.xlu0 %1530 }
 0x52a   : > { %2756 = vpow2.f32 %v1574_v47  ;;  %v3591_v24 = vsub.f32 %v3539_v15, %v1531_v53 }
 0x52b   : > { %v1580_v25 = vmul.f32 1.442695, %v3588_v52 }
 0x52c   : > { %v1578_v36 = vmul.f32 1.442695, %v3591_v24  ;;  %v1537_v56 = vpop.xlane.xlu1 %1536 }
 0x52d   : > { %2758 = vpow2.f32 %v1580_v25  ;;  %v3596_v57 = vsub.f32 %v3543_v19, %v1537_v56  ;;  %v1535_v58 = vpop.xlane.xlu0 %1534 }
 0x52e   : > { %2760 = vpow2.f32 %v1578_v36  ;;  %v3599_v59 = vsub.f32 %v3545_v21, %v1535_v58 }
 0x52f   : > { %v1584_v60 = vmul.f32 1.442695, %v3596_v57 }
 0x530   : > { %v1582_v61 = vmul.f32 1.442695, %v3599_v59  ;;  %v1541_v62 = vpop.xlane.xlu1 %1540 }
 0x531   : > { %2762 = vpow2.f32 %v1584_v60  ;;  %v3604_v63 = vsub.f32 %v3549_v27, %v1541_v62  ;;  %v1539_v3 = vpop.xlane.xlu0 %1538 }
 0x532   : > { %2764 = vpow2.f32 %v1582_v61  ;;  %v3607_v9 = vsub.f32 %v3551_v29, %v1539_v3 }
 0x533   : > { %v2755_v12 = vpop.eup %2754  ;;  %v1588_v15 = vmul.f32 1.442695, %v3604_v63 }
 0x534   : > { %v2757_v16 = vpop.eup %2756  ;;  %v1586_v19 = vmul.f32 1.442695, %v3607_v9  ;;  %1608 = vadd.xlane.f32.xlu1 %v2755_v12 }
 0x535   : > { %2766 = vpow2.f32 %v1588_v15  ;;  %1606 = vadd.xlane.f32.xlu0 %v2757_v16 }
 0x536   : > { %2768 = vpow2.f32 %v1586_v19 }
 0x537   : > { %v2759_v20 = vpop.eup %2758 }
 0x538   : > { %v2761_v21 = vpop.eup %2760  ;;  %1612 = vadd.xlane.f32.xlu1 %v2759_v20 }
 0x539   : > { %1610 = vadd.xlane.f32.xlu0 %v2761_v21 }
 0x53b   : > { %v2763_v22 = vpop.eup %2762 }
 0x53c   : > { %v2765_v27 = vpop.eup %2764  ;;  %1616 = vadd.xlane.f32.xlu1 %v2763_v22 }
 0x53d   : > { %1614 = vadd.xlane.f32.xlu0 %v2765_v27 }
 0x53f   : > { %v2767_v28 = vpop.eup %2766 }
 0x540   : > { %v2769_v29 = vpop.eup %2768  ;;  %1620 = vadd.xlane.f32.xlu1 %v2767_v28 }
 0x541   : > { %1618 = vadd.xlane.f32.xlu0 %v2769_v29 }
 0x5a3   : > { %v1593_v32 = vpop.xlane.xlu1 %1592 }
 0x5a4   : > { %2770 = vlog2.f32 %v1593_v32 }
 0x5a7   : > { %v1597_v50 = vpop.xlane.xlu1 %1596 }
 0x5a8   : > { %2772 = vlog2.f32 %v1597_v50  ;;  %v1591_v51 = vpop.xlane.xlu0 %1590 }
 0x5a9   : > { %2774 = vlog2.f32 %v1591_v51 }
 0x5ac   : > { %v1595_v13 = vpop.xlane.xlu0 %1594 }
 0x5ad   : > { %2776 = vlog2.f32 %v1595_v13 }
 0x5ae   : > { %v2771_v30 = vpop.eup %2770 }
 0x5af   : > { %v1625_v31 = vmul.f32 0.6931472, %v2771_v30  ;;  %v1601_v33 = vpop.xlane.xlu1 %1600 }
 0x5b0   : > { %2778 = vlog2.f32 %v1601_v33  ;;  %v1599_v35 = vpop.xlane.xlu0 %1598 }
 0x5b1   : > { %v1655_v39 = vsub.f32 %v3555_v49, %v1625_v31  ;;  %2780 = vlog2.f32 %v1599_v35 }
 0x5b2   : > { %v2773_v40 = vpop.eup %2772 }
 0x5b3   : > { %v2775_v0 = vpop.eup %2774  ;;  %1671 = vst [vmem:[#allocation14 + $0x8] sm:$0xff] %v1655_v39  ;;  %v1629_v1 = vmul.f32 0.6931472, %v2773_v40  ;;  %v1605_v4 = vpop.xlane.xlu1 %1604 }
 0x5b4   : > { %v1623_v37 = vmul.f32 0.6931472, %v2775_v0  ;;  %2782 = vlog2.f32 %v1605_v4  ;;  %v1603_v6 = vpop.xlane.xlu0 %1602 }
 0x5b5   : > { %v1657_v7 = vsub.f32 %v3558_v14, %v1629_v1  ;;  %2784 = vlog2.f32 %v1603_v6 }
 0x5b6   : > { %v1654_v5 = vsub.f32 %v3560_v54, %v1623_v37 }
 0x5b7   : > { %v2777_v8 = vpop.eup %2776  ;;  %1673 = vst [vmem:[#allocation14 + $0x18] sm:$0xff] %v1657_v7 }
 0x5b8   : > { %1670 = vst [vmem:[#allocation14] sm:$0xff] %v1654_v5  ;;  %v1627_v17 = vmul.f32 0.6931472, %v2777_v8 }
 0x5ba   : > { %v2779_v18 = vpop.eup %2778  ;;  %v1656_v49 = vsub.f32 %v3564_v34, %v1627_v17 }
 0x5bb   : > { %v2781_v10 = vpop.eup %2780  ;;  %v1633_v23 = vmul.f32 0.6931472, %v2779_v18 }
 0x5bc   : > { %1672 = vst [vmem:[#allocation14 + $0x10] sm:$0xff] %v1656_v49  ;;  %v1631_v11 = vmul.f32 0.6931472, %v2781_v10 }
 0x5bd   : > { %v1659_v26 = vsub.f32 %v3569_v41, %v1633_v23 }
 0x5be   : > { %v2783_v43 = vpop.eup %2782  ;;  %v1658_v44 = vsub.f32 %v3566_v38, %v1631_v11 }
 0x5bf   : > { %v2785_v14 = vpop.eup %2784  ;;  %1675 = vst [vmem:[#allocation14 + $0x28] sm:$0xff] %v1659_v26  ;;  %v1637_v46 = vmul.f32 0.6931472, %v2783_v43 }
 0x5c0   : > { %1674 = vst [vmem:[#allocation14 + $0x20] sm:$0xff] %v1658_v44  ;;  %v1635_v54 = vmul.f32 0.6931472, %v2785_v14 }
 0x5c1   : > { %v1661_v47 = vsub.f32 %v3575_v55, %v1637_v46  ;;  %v1609_v48 = vpop.xlane.xlu1 %1608 }
 0x5c2   : > { %v1660_v53 = vsub.f32 %v3572_v2, %v1635_v54  ;;  %2786 = vlog2.f32 %v1609_v48  ;;  %v1607_v34 = vpop.xlane.xlu0 %1606 }
 0x5c3   : > { %1677 = vst [vmem:[#allocation14 + $0x38] sm:$0xff] %v1661_v47  ;;  %2788 = vlog2.f32 %v1607_v34 }
 0x5c4   : > { %1676 = vst [vmem:[#allocation14 + $0x30] sm:$0xff] %v1660_v53 }
 0x5c5   : > { %v1613_v25 = vpop.xlane.xlu1 %1612 }
 0x5c6   : > { %2790 = vlog2.f32 %v1613_v25  ;;  %v1611_v41 = vpop.xlane.xlu0 %1610 }
 0x5c7   : > { %2792 = vlog2.f32 %v1611_v41 }
 0x5c9   : > { %v1617_v38 = vpop.xlane.xlu1 %1616 }
 0x5ca   : > { %2794 = vlog2.f32 %v1617_v38  ;;  %v1615_v36 = vpop.xlane.xlu0 %1614 }
 0x5cb   : > { %2796 = vlog2.f32 %v1615_v36 }
 0x5cc   : > { %v2787_v56 = vpop.eup %2786 }
 0x5cd   : > { %v2789_v58 = vpop.eup %2788  ;;  %v1641_v60 = vmul.f32 0.6931472, %v2787_v56  ;;  %v1621_v55 = vpop.xlane.xlu1 %1620 }
 0x5ce   : > { %v1639_v61 = vmul.f32 0.6931472, %v2789_v58  ;;  %2798 = vlog2.f32 %v1621_v55  ;;  %v1619_v2 = vpop.xlane.xlu0 %1618 }
 0x5cf   : > { %v1663_v62 = vsub.f32 %v3580_v42, %v1641_v60  ;;  %2800 = vlog2.f32 %v1619_v2 }
 0x5d0   : > { %v2791_v3 = vpop.eup %2790  ;;  %v1662_v12 = vsub.f32 %v3583_v45, %v1639_v61 }
 0x5d1   : > { %v2793_v15 = vpop.eup %2792  ;;  %1679 = vst [vmem:[#allocation14 + $0x48] sm:$0xff] %v1663_v62  ;;  %v1645_v16 = vmul.f32 0.6931472, %v2791_v3 }
 0x5d2   : > { %1678 = vst [vmem:[#allocation14 + $0x40] sm:$0xff] %v1662_v12  ;;  %v1643_v19 = vmul.f32 0.6931472, %v2793_v15 }
 0x5d3   : > { %v1665_v20 = vsub.f32 %v3588_v52, %v1645_v16 }
 0x5d4   : > { %v2795_v21 = vpop.eup %2794  ;;  %v1664_v22 = vsub.f32 %v3591_v24, %v1643_v19 }
 0x5d5   : > { %v2797_v27 = vpop.eup %2796  ;;  %1681 = vst [vmem:[#allocation14 + $0x58] sm:$0xff] %v1665_v20  ;;  %v1649_v28 = vmul.f32 0.6931472, %v2795_v21 }
 0x5d6   : > { %1680 = vst [vmem:[#allocation14 + $0x50] sm:$0xff] %v1664_v22  ;;  %v1647_v29 = vmul.f32 0.6931472, %v2797_v27 }
 0x5d7   : > { %v1667_v42 = vsub.f32 %v3596_v57, %v1649_v28 }
 0x5d8   : > { %v2799_v32 = vpop.eup %2798  ;;  %v1666_v45 = vsub.f32 %v3599_v59, %v1647_v29 }
 0x5d9   : > { %v2801_v50 = vpop.eup %2800  ;;  %1683 = vst [vmem:[#allocation14 + $0x68] sm:$0xff] %v1667_v42  ;;  %v1653_v51 = vmul.f32 0.6931472, %v2799_v32 }
 0x5da   : > { %1682 = vst [vmem:[#allocation14 + $0x60] sm:$0xff] %v1666_v45  ;;  %v1651_v13 = vmul.f32 0.6931472, %v2801_v50 }
 0x5db   : > { %v1669_v52 = vsub.f32 %v3604_v63, %v1653_v51 }
 0x5dc   : > { %v1668_v30 = vsub.f32 %v3607_v9, %v1651_v13 }
 0x5dd   : > { %1685 = vst [vmem:[#allocation14 + $0x78] sm:$0xff] %v1669_v52 }
 0x5de   : > { %1684 = vst [vmem:[#allocation14 + $0x70] sm:$0xff] %v1668_v30 }
 0x5df PF: > { %s3684_s22 = sadd.s32 4294967295, %s3038_s29   ;;  %s3048_s12 = smov [#allocation14]  }
 0x5e0   : > { %p3629_p8 = scmp.eq.s32.totalorder %s3684_s22, 1  ;;  %s1701_s20 = sshll.u32 %s3048_s12, 4  ;;  %s1702_s20 = int_to_ptr.vmem [resolvable:$true] %s1701_s20 }
 0x5e1   : > { %s2970_s1 = scalar_lea.vmem %s1702_s20, 2048  ;;  %s2976_s30 = scalar_lea.vmem %s1702_s20, 4096 }
 0x5e2   : > { %p2971_p9 = scmp.ne.s32.totalorder %s1702_s20, %s2970_s1  ;;  %p2977_p12 = scmp.lt.s32.totalorder %s1702_s20, %s1702_s20 }
 0x5e3   : > { %p2978_p13 = scmp.lt.s32.totalorder %s2976_s30, %s2970_s1 }
 0x5e4   : > { %p2972_p10 = pnand %p2971_p9, %p3629_p8 }
 0x5e5   : > { %p2979_p0 = por %p2978_p13, %p2977_p12 }
 0x5e6   : > { %p2973_p11 = pneg %p2972_p10 }
 0x5e8   : > { %p2980_p1 = pnand %p2979_p0, %p2973_p11 }
 0x5ea   : > { %2983 = shalt.err (!%p2980_p1)
}
 0x5eb   : > { %s2984_s23 = scalar_lea.hbm %s3671_s8, 2048 }
 0x5ec   : > { %p2985_p4 = scmp.ne.s32.totalorder %s3671_s8, %s2984_s23  ;;  %p2990_p7 = scmp.lt.u32.totalorder %s2984_s23, %s3671_s8 }
 0x5ee   : > { %p2986_p2 = pnand %p2985_p4, %p3629_p8 }
 0x5f0   : > { %p2987_p3 = pneg %p2986_p2 }
 0x5f2   : > { %p2992_p5 = pnand %p2990_p7, %p2987_p3 }
 0x5f4   : > { %2995 = shalt.err (!%p2992_p5)
}
 0x5f5   : > { %s3049_s13 = smov 128   ;;  %s3050_s19 = smov 8  }
 0x5f6   : > { %2662 = dma.vmem_to_hbm [thread:$0]  (%p3629_p8), %s1702_s20, 2048, %s3671_s8, [#allocation5], %s3049_s13, %s3049_s13, %s3050_s19  }
 0x5f7 PF: > { %p2701_p6 = scmp.ge.s32.totalorder %s3038_s29, 2  ;;  %s3686_s11 = sadd.s32 4294967294, %s3038_s29  }
 0x5f8   : > { %p2702_p9 = scmp.eq.s32.totalorder %s3686_s11, 1 }
 0x5fa   : > { %p2685_p10 = pnand %p2702_p9, %p2701_p6 }
 0x5fc   : > { %3025 = dma.done.wait (!%p2685_p10), [#allocation5], 2048  }
 0x5fd   : > { %3027 = vsyncadd (!%p2685_p10), [#allocation5], 4294965248  ;;  %s25_s29 = sadd.s32 1, %s3038_s29   ;;  %s3687_s27 = smov %s3034_s28 }
 0x5fe   : > { %p22_p11 = scmp.ge.s32.totalorder %s25_s29, 4   ;;  %s3688_s28 = smov %s3690_s18 }
 0x600   :  { %24 = sbr.rel (!%p22_p11) target bundleno = 9 (0x9), region = 122 }
 0x607   :  { %1722 = vsyncpa [#allocation4], 1 }
 0x608   :  { %1724 = vsyncpa [#allocation4 + $0x1], 1 }
 0x609   :  { %1725 = vsyncpa [#allocation7], 1 }
 0x60a   :  { %1726 = vsyncpa [#allocation10], 1 }
 0x60b   :  { %1727 = vsyncpa [#allocation13], 1 }
 0x60c   :  { %1728 = vsyncpa [#allocation5], 1 }
 0x60d   :  { %1730 = vsyncpa [#allocation5 + $0x1], 1 }

// kernel: tpu_custom_call.1
= control target key start
LH: loop header
LB: loop body
LE: loop exit
PB: predicated region body
PF: predicated region fallthrough
CT: control target
= control target key end

     0   :  { %s3663_s0 = inlined_call_operand.hbm [shape: f32[128,128], index: 0, kind: input, shape index: {}]   ;;  %s3664_s1 = inlined_call_operand.hbm [shape: f32[128,128], index: 1, kind: input, shape index: {}]   ;;  %s3665_s2 = inlined_call_operand.hbm [shape: f32[128,128], index: 2, kind: input, shape index: {}]   ;;  %s3666_s3 = inlined_call_operand.hbm [shape: f32[128,128], index: 3, kind: input, shape index: {}]   ;;  %s3667_s4 = inlined_call_operand.vmem [shape: f32[1,128], index: 4, kind: input, shape index: {}]   ;;  %s3668_s5 = inlined_call_operand.hbm [shape: f32[128,128], index: 5, kind: input, shape index: {}]   ;;  %s3669_s6 = inlined_call_operand.hbm [shape: f32[128,128], index: 6, kind: input, shape index: {}]   ;;  %s3670_s7 = inlined_call_operand.vmem [shape: f32[1,128], index: 7, kind: input, shape index: {}]   ;;  %s3671_s8 = inlined_call_operand.hbm [shape: f32[128,128], index: 8, kind: output, shape index: {}]  }
   0x1   :  { %3676 = sst [smem:[#allocation20_spill]] %s3664_s1 }
   0x2   :  { %13 = vsyncpa [#allocation4], 0 }
   0x3   :  { %14 = vsyncpa [#allocation7], 0 }
   0x4   :  { %15 = vsyncpa [#allocation10], 0 }
   0x5   :  { %16 = vsyncpa [#allocation13], 0 }
   0x6   :  { %17 = vsyncpa [#allocation5], 0 }
   0x7   :  { %19 = vsyncpa [#allocation5 + $0x1], 0  ;;  %s3096_s27 = smov 0   ;;  %s3098_s28 = smov 0  }
   0x8   :  { %s3100_s29 = smov 0  }
   0x9 LB: > { %s3675_s30 = sadd.s32 4294967295, %s3038_s29   ;;  %p1831_p0 = scmp.ge.s32.totalorder %s3038_s29, 1  ;;  %s3038_s29 = sphi %s3100_s29, %s25_s29   ;;  %s3034_s28 = sphi %s3098_s28, %s3688_s28   ;;  %s3030_s27 = sphi %s3096_s27, %s3687_s27  }
   0xa   : > { %p238_p1 = scmp.lt.s32.totalorder %s3038_s29, 3  ;;  %p3117_p2 = scmp.eq.s32.totalorder %s3675_s30, 0 }
   0xb   : > { %s3040_s12 = smov [#allocation6]   ;;  %s3041_s14 = smov [#allocation9]  }
   0xc   : > { %s3677_s10 = scalar_select %p3117_p2, 1, 0 }
   0xd   : > { %p3121_p3 = pnand %p1831_p0, %p238_p1  ;;  %s263_s13 = sshll.u32 %s3040_s12, 4  ;;  %s264_s13 = int_to_ptr.vmem [resolvable:$true] %s263_s13 }
   0xe   : > { %s289_s15 = sshll.u32 %s3041_s14, 4  ;;  %s3680_s1 = sld [smem:[#allocation20_spill]]  ;;  %s3133_s15 = int_to_ptr.vmem [resolvable:$true] %s289_s15 }
   0xf   : > { %s3678_s11 = scalar_select %p3121_p3, 1, 0 }
  0x10   : > { %p2665_p4 = pneg %p3121_p3 }
  0x12   : > { %p3129_p5 = pnand %p3117_p2, %p2665_p4 }
  0x14   : > { %s2802_s19 = scalar_lea.hbm %s3680_s1, 2048  ;;  %p3143_p7 = pneg %p3129_p5 }
  0x15   : > { %p2803_p6 = scmp.ne.s32.totalorder %s3680_s1, %s2802_s19  ;;  %p2809_p10 = scmp.lt.u32.totalorder %s2802_s19, %s3680_s1 }
  0x17   : > { %p2805_p8 = pnand %p3143_p7, %p2803_p6 }
  0x19   : > { %p2806_p9 = pneg %p2805_p8 }
  0x1b   : > { %p2811_p11 = pnand %p2809_p10, %p2806_p9 }
  0x1d   : > { %2814 = shalt.err (!%p2811_p11)
}
  0x1e   : > { %s2815_s25 = scalar_lea.vmem %s264_s13, 2048  ;;  %p2823_p1 = scmp.lt.s32.totalorder %s264_s13, %s264_s13 }
  0x1f   : > { %p2816_p12 = scmp.ne.s32.totalorder %s264_s13, %s2815_s25  ;;  %p2824_p4 = scmp.lt.s32.totalorder %s2815_s25, %s2815_s25 }
  0x21   : > { %p2818_p13 = pnand %p2816_p12, %p3143_p7  ;;  %p2825_p2 = por %p2824_p4, %p2823_p1 }
  0x23   : > { %p2819_p0 = pneg %p2818_p13 }
  0x25   : > { %p2826_p3 = pnand %p2825_p2, %p2819_p0 }
  0x27   : > { %2829 = shalt.err (!%p2826_p3)
}
  0x28   : > { %s3042_s26 = smov 128   ;;  %s3043_s12 = smov 8  }
  0x29   : > { %2671 = dma.hbm_to_vmem [thread:$0]  (!%p3129_p5), %s3680_s1, 2048, %s264_s13, [#allocation7], %s3042_s26, %s3042_s26, %s3043_s12  }
  0x2a   : > { %s2830_s20 = scalar_lea.hbm %s3666_s3, 2048 }
  0x2b   : > { %p2831_p2 = scmp.ne.s32.totalorder %s3666_s3, %s2830_s20  ;;  %p2837_p8 = scmp.lt.u32.totalorder %s2830_s20, %s3666_s3 }
  0x2d   : > { %p2833_p3 = pnand %p2831_p2, %p3143_p7 }
  0x2f   : > { %p2834_p6 = pneg %p2833_p3 }
  0x31   : > { %p2839_p9 = pnand %p2837_p8, %p2834_p6 }
  0x33   : > { %2842 = shalt.err (!%p2839_p9)
}
  0x34   : > { %s2843_s13 = scalar_lea.vmem %s3133_s15, 2048  ;;  %p2851_p13 = scmp.lt.s32.totalorder %s3133_s15, %s3133_s15 }
  0x35   : > { %p2844_p10 = scmp.ne.s32.totalorder %s3133_s15, %s2843_s13  ;;  %p2852_p0 = scmp.lt.s32.totalorder %s2843_s13, %s2843_s13 }
  0x37   : > { %p2846_p11 = pnand %p2844_p10, %p3143_p7  ;;  %p2853_p1 = por %p2852_p0, %p2851_p13 }
  0x39   : > { %p2847_p12 = pneg %p2846_p11 }
  0x3b   : > { %p2854_p4 = pnand %p2853_p1, %p2847_p12 }
  0x3d   : > { %2857 = shalt.err (!%p2854_p4)
}
  0x3e   : > { %2677 = dma.hbm_to_vmem [thread:$0]  (!%p3129_p5), %s3666_s3, 2048, %s3133_s15, [#allocation10], %s3042_s26, %s3042_s26, %s3043_s12  }
  0x3f   : > { %s37_s18 = sadd.s32 1, %s3034_s28  ;;  %s3044_s19 = smov [#allocation3]  }
  0x40   : > { %p39_p2 = scmp.ge.s32.totalorder %s37_s18, 2  ;;  %s250_s20 = sshll.u32 %s3044_s19, 4  ;;  %s251_s20 = int_to_ptr.vmem [resolvable:$true] %s250_s20 }
  0x41   : > { %s2858_s24 = scalar_lea.hbm %s3663_s0, 2048 }
  0x42   : > { %s3690_s18 = smov (%p39_p2, %s37_s18), 0  ;;  %p2859_p3 = scmp.ne.s32.totalorder %s3663_s0, %s2858_s24 }
  0x43   : > { %p2865_p9 = scmp.lt.u32.totalorder %s2858_s24, %s3663_s0 }
  0x44   : > { %p2861_p6 = pnand %p2859_p3, %p3143_p7 }
  0x46   : > { %p2862_p8 = pneg %p2861_p6 }
  0x48   : > { %p2867_p10 = pnand %p2865_p9, %p2862_p8 }
  0x4a   : > { %2870 = shalt.err (!%p2867_p10)
}
  0x4b   : > { %s2871_s17 = scalar_lea.vmem %s251_s20, 2048  ;;  %p2879_p0 = scmp.lt.s32.totalorder %s251_s20, %s251_s20 }
  0x4c   : > { %p2872_p11 = scmp.ne.s32.totalorder %s251_s20, %s2871_s17  ;;  %p2880_p1 = scmp.lt.s32.totalorder %s2871_s17, %s2871_s17 }
  0x4e   : > { %p2874_p12 = pnand %p2872_p11, %p3143_p7  ;;  %p2881_p4 = por %p2880_p1, %p2879_p0 }
  0x50   : > { %p2875_p13 = pneg %p2874_p12 }
  0x52   : > { %p2882_p2 = pnand %p2881_p4, %p2875_p13 }
  0x54   : > { %2885 = shalt.err (!%p2882_p2)
}
  0x55   : > { %2668 = dma.hbm_to_vmem [thread:$0]  (!%p3129_p5), %s3663_s0, 2048, %s251_s20, [#allocation4], %s3042_s26, %s3042_s26, %s3043_s12  }
  0x56   : > { %s3045_s23 = smov [#allocation8]   ;;  %s3046_s25 = smov [#allocation11]  }
  0x57   : > { %s276_s24 = sshll.u32 %s3045_s23, 4  ;;  %s305_s13 = sshll.u32 %s3046_s25, 4  ;;  %s277_s24 = int_to_ptr.vmem [resolvable:$true] %s276_s24  ;;  %s306_s13 = int_to_ptr.vmem [resolvable:$true] %s305_s13 }
  0x58   : > { %s2886_s17 = scalar_lea.hbm %s3665_s2, 2048 }
  0x59   : > { %p2887_p3 = scmp.ne.s32.totalorder %s3665_s2, %s2886_s17  ;;  %p2893_p9 = scmp.lt.u32.totalorder %s2886_s17, %s3665_s2 }
  0x5b   : > { %p2889_p6 = pnand %p2887_p3, %p3143_p7 }
  0x5d   : > { %p2890_p8 = pneg %p2889_p6 }
  0x5f   : > { %p2895_p10 = pnand %p2893_p9, %p2890_p8 }
  0x61   : > { %2898 = shalt.err (!%p2895_p10)
}
  0x62   : > { %s2899_s20 = scalar_lea.vmem %s277_s24, 2048  ;;  %p2907_p0 = scmp.lt.s32.totalorder %s277_s24, %s277_s24 }
  0x63   : > { %p2900_p11 = scmp.ne.s32.totalorder %s277_s24, %s2899_s20  ;;  %p2908_p1 = scmp.lt.s32.totalorder %s2899_s20, %s2899_s20 }
  0x65   : > { %p2902_p12 = pnand %p2900_p11, %p3143_p7  ;;  %p2909_p4 = por %p2908_p1, %p2907_p0 }
  0x67   : > { %p2903_p13 = pneg %p2902_p12 }
  0x69   : > { %p2910_p2 = pnand %p2909_p4, %p2903_p13 }
  0x6b   : > { %2913 = shalt.err (!%p2910_p2)
}
  0x6c   : > { %2674 = dma.hbm_to_vmem [thread:$0]  (!%p3129_p5), %s3665_s2, 2048, %s277_s24, [#allocation7], %s3042_s26, %s3042_s26, %s3043_s12  }
  0x6d   : > { %s2914_s23 = scalar_lea.hbm %s3668_s5, 2048 }
  0x6e   : > { %p2915_p3 = scmp.ne.s32.totalorder %s3668_s5, %s2914_s23  ;;  %p2921_p9 = scmp.lt.u32.totalorder %s2914_s23, %s3668_s5 }
  0x70   : > { %p2917_p6 = pnand %p2915_p3, %p3143_p7 }
  0x72   : > { %p2918_p8 = pneg %p2917_p6 }
  0x74   : > { %p2923_p10 = pnand %p2921_p9, %p2918_p8 }
  0x76   : > { %2926 = shalt.err (!%p2923_p10)
}
  0x77   : > { %s2927_s19 = scalar_lea.vmem %s306_s13, 2048  ;;  %p2935_p0 = scmp.lt.s32.totalorder %s306_s13, %s306_s13 }
  0x78   : > { %p2928_p11 = scmp.ne.s32.totalorder %s306_s13, %s2927_s19  ;;  %p2936_p1 = scmp.lt.s32.totalorder %s2927_s19, %s2927_s19 }
  0x7a   : > { %p2930_p12 = pnand %p2928_p11, %p3143_p7  ;;  %p2937_p4 = por %p2936_p1, %p2935_p0 }
  0x7c   : > { %p2931_p13 = pneg %p2930_p12 }
  0x7e   : > { %p2938_p2 = pnand %p2937_p4, %p2931_p13 }
  0x80   : > { %2941 = shalt.err (!%p2938_p2)
}
  0x81   : > { %2680 = dma.hbm_to_vmem [thread:$0]  (!%p3129_p5), %s3668_s5, 2048, %s306_s13, [#allocation10], %s3042_s26, %s3042_s26, %s3043_s12  }
  0x82   : > { %s3047_s1 = smov [#allocation12]   ;;  %s2942_s23 = scalar_lea.hbm %s3669_s6, 2048 }
  0x83   : > { %s318_s30 = sshll.u32 %s3047_s1, 4  ;;  %p2943_p3 = scmp.ne.s32.totalorder %s3669_s6, %s2942_s23  ;;  %s319_s30 = int_to_ptr.vmem [resolvable:$true] %s318_s30 }
  0x84   : > { %p2949_p9 = scmp.lt.u32.totalorder %s2942_s23, %s3669_s6 }
  0x85   : > { %p2945_p6 = pnand %p2943_p3, %p3143_p7 }
  0x87   : > { %p2946_p8 = pneg %p2945_p6 }
  0x89   : > { %p2951_p10 = pnand %p2949_p9, %p2946_p8 }
  0x8b   : > { %2954 = shalt.err (!%p2951_p10)
}
  0x8c   : > { %s2955_s13 = scalar_lea.vmem %s319_s30, 2048  ;;  %p2963_p0 = scmp.lt.s32.totalorder %s319_s30, %s319_s30 }
  0x8d   : > { %p2956_p11 = scmp.ne.s32.totalorder %s319_s30, %s2955_s13  ;;  %p2964_p1 = scmp.lt.s32.totalorder %s2955_s13, %s2955_s13 }
  0x8f   : > { %p2958_p12 = pnand %p2956_p11, %p3143_p7  ;;  %p2965_p4 = por %p2964_p1, %p2963_p0 }
  0x91   : > { %p2959_p13 = pneg %p2958_p12 }
  0x93   : > { %p2966_p2 = pnand %p2965_p4, %p2959_p13 }
  0x95   : > { %2969 = shalt.err (!%p2966_p2)
}
  0x96   : > { %2683 = dma.hbm_to_vmem [thread:$0]  (!%p3129_p5), %s3669_s6, 2048, %s319_s30, [#allocation13], %s3042_s26, %s3042_s26, %s3043_s12  }
  0x97   : > { %p3682_p3 = scmp.ne.s32.totalorder %s3678_s11, 0 }
  0x98   : > { %p3683_p7 = scmp.ne.s32.totalorder (!%p3682_p3), %s3677_s10, 0 }
  0x99   : > { %337 = sbr.rel (%p3682_p3) target bundleno = 1527 (0x5f7), region = 52 }
  0xa0   : > { %3009 = dma.done.wait (%p3683_p7), [#allocation4], 2048  }
  0xa1   : > { %3011 = vsyncadd (%p3683_p7), [#allocation4], 4294965248 }
  0xa2   : > { %3013 = dma.done.wait (%p3683_p7), [#allocation7], 4096  }
  0xa3   : > { %3015 = vsyncadd (%p3683_p7), [#allocation7], 4294963200 }
  0xa4   : > { %3017 = dma.done.wait (%p3683_p7), [#allocation10], 4096  }
  0xa5   : > { %3019 = vsyncadd (%p3683_p7), [#allocation10], 4294963200 }
  0xa6   : > { %3021 = dma.done.wait (%p3683_p7), [#allocation13], 2048  }
  0xa7   : > { %3023 = vsyncadd (%p3683_p7), [#allocation13], 4294965248  ;;  %p1845_p5 = scmp.ne.s32.totalorder %s3030_s27, 0 }
  0xa8   : > { %v3294_v0 = vld [vmem:[#allocation6] sm:$0xff] (!%p1845_p5)  ;;  %v3296_v1 = vld [vmem:[#allocation6 + $0x8] sm:$0xff] (!%p1845_p5)  ;;  %v3298_v2 = vld [vmem:[#allocation6 + $0x10] sm:$0xff] (!%p1845_p5) }
  0xa9   : > { %392 = sbr.rel (%p1845_p5) target bundleno = 679 (0x2a7), region = 80  ;;  %v2381_v3 = vpack.c.bf16 (!%p1845_p5), %v3296_v1, %v3294_v0  ;;  %v3302_v4 = vld [vmem:[#allocation6 + $0x18] sm:$0xff] (!%p1845_p5)  ;;  %v3306_v6 = vld [vmem:[#allocation6 + $0x20] sm:$0xff] (!%p1845_p5)  ;;  %v3308_v7 = vld [vmem:[#allocation6 + $0x28] sm:$0xff] (!%p1845_p5) }
  0xaa   : > { %v2385_v5 = vpack.c.bf16 (!%p1845_p5), %v3302_v4, %v3298_v2  ;;  %v2389_v8 = vpack.c.bf16 (!%p1845_p5), %v3308_v7, %v3306_v6  ;;  %v394_v9 = vld [vmem:[#allocation3] sm:$0xff] (!%p1845_p5)  ;;  %v3312_v10 = vld [vmem:[#allocation6 + $0x30] sm:$0xff] (!%p1845_p5)  ;;  %v3314_v11 = vld [vmem:[#allocation6 + $0x38] sm:$0xff] (!%p1845_p5) }
  0xab   : > { %2382 = vmatprep.subr.bf16.mxu0 (!%p1845_p5), %v2381_v3  ;;  %2077 = vmatprep.mubr.f32.mxu0 (!%p1845_p5), %v394_v9  ;;  %v2393_v12 = vpack.c.bf16 (!%p1845_p5), %v3314_v11, %v3312_v10  ;;  %v3318_v13 = vld [vmem:[#allocation6 + $0x40] sm:$0xff] (!%p1845_p5)  ;;  %v3320_v14 = vld [vmem:[#allocation6 + $0x48] sm:$0xff] (!%p1845_p5)  ;;  %v606_v18 = vld [vmem:[#allocation9 + $0x10] sm:$0xff] (!%p1845_p5) }
  0xac   : > { %2384 = vmatpush3.bf16.msra.mxu0 (!%p1845_p5), %v2381_v3  ;;  %v604_v15 = vld [vmem:[#allocation9] sm:$0xff] (!%p1845_p5)  ;;  %v605_v16 = vld [vmem:[#allocation9 + $0x8] sm:$0xff] (!%p1845_p5)  ;;  %v607_v19 = vld [vmem:[#allocation9 + $0x18] sm:$0xff] (!%p1845_p5)  ;;  %v2397_v20 = vpack.c.bf16 (!%p1845_p5), %v3320_v14, %v3318_v13 }
  0xad   : > { %2386 = vmatprep.subr.bf16.mxu0 (!%p1845_p5), %v2385_v5  ;;  %v2413_v17 = vpack.c.bf16 (!%p1845_p5), %v605_v16, %v604_v15  ;;  %v2417_v21 = vpack.c.bf16 (!%p1845_p5), %v607_v19, %v606_v18  ;;  %v608_v22 = vld [vmem:[#allocation9 + $0x20] sm:$0xff] (!%p1845_p5)  ;;  %v609_v23 = vld [vmem:[#allocation9 + $0x28] sm:$0xff] (!%p1845_p5)  ;;  %v3324_v24 = vld [vmem:[#allocation6 + $0x50] sm:$0xff] (!%p1845_p5) }
  0xae   : > { %v3326_v25 = vld [vmem:[#allocation6 + $0x58] sm:$0xff] (!%p1845_p5)  ;;  %v2421_v26 = vpack.c.bf16 (!%p1845_p5), %v609_v23, %v608_v22  ;;  %v610_v28 = vld [vmem:[#allocation9 + $0x30] sm:$0xff] (!%p1845_p5)  ;;  %v3330_v30 = vld [vmem:[#allocation6 + $0x60] sm:$0xff] (!%p1845_p5) }
  0xaf   : > { %2414 = vmatprep.subr.bf16.mxu1 (!%p1845_p5), %v2413_v17  ;;  %v2401_v27 = vpack.c.bf16 (!%p1845_p5), %v3326_v25, %v3324_v24  ;;  %v611_v29 = vld [vmem:[#allocation9 + $0x38] sm:$0xff] (!%p1845_p5)  ;;  %v3332_v31 = vld [vmem:[#allocation6 + $0x68] sm:$0xff] (!%p1845_p5)  ;;  %v612_v34 = vld [vmem:[#allocation9 + $0x40] sm:$0xff] (!%p1845_p5) }
  0xb0   : > { %2388 = vmatpush3.bf16.msra.mxu0 %v2385_v5  ;;  %2416 = vmatpush3.bf16.msra.mxu1 %v2413_v17  ;;  %v2425_v32 = vpack.c.bf16 %v611_v29, %v610_v28  ;;  %v2405_v33 = vpack.c.bf16 %v3332_v31, %v3330_v30  ;;  %v613_v35 = vld [vmem:[#allocation9 + $0x48] sm:$0xff]  ;;  %v3336_v36 = vld [vmem:[#allocation6 + $0x70] sm:$0xff]  ;;  %v3338_v37 = vld [vmem:[#allocation6 + $0x78] sm:$0xff] }
  0xb1   : > { %2390 = vmatprep.subr.bf16.mxu0 %v2389_v8  ;;  %2418 = vmatprep.subr.bf16.mxu1 %v2417_v21  ;;  %v2429_v38 = vpack.c.bf16 %v613_v35, %v612_v34  ;;  %v2409_v39 = vpack.c.bf16 %v3338_v37, %v3336_v36  ;;  %v614_v40 = vld [vmem:[#allocation9 + $0x50] sm:$0xff]  ;;  %v615_v41 = vld [vmem:[#allocation9 + $0x58] sm:$0xff]  ;;  %v588_v42 = vld [vmem:[#allocation8] sm:$0xff] }
  0xb2   : > { %v589_v43 = vld [vmem:[#allocation8 + $0x8] sm:$0xff]  ;;  %v2433_v44 = vpack.c.bf16 %v615_v41, %v614_v40  ;;  %v590_v46 = vld [vmem:[#allocation8 + $0x10] sm:$0xff]  ;;  %v591_v47 = vld [vmem:[#allocation8 + $0x18] sm:$0xff] }
  0xb3   : > { %v3342_v45 = vpack.c.bf16 %v589_v43, %v588_v42  ;;  %v616_v48 = vld [vmem:[#allocation9 + $0x60] sm:$0xff]  ;;  %v617_v49 = vld [vmem:[#allocation9 + $0x68] sm:$0xff]  ;;  %v396_v51 = vld [vmem:[#allocation3 + $0x10] sm:$0xff]  ;;  %v3345_v52 = vpack.c.bf16 %v591_v47, %v590_v46 }
  0xb4   : > { %2392 = vmatpush3.bf16.msra.mxu0 %v2389_v8  ;;  %2420 = vmatpush3.bf16.msra.mxu1 %v2417_v21  ;;  %v395_v50 = vld [vmem:[#allocation3 + $0x8] sm:$0xff]  ;;  %v592_v53 = vld [vmem:[#allocation8 + $0x20] sm:$0xff]  ;;  %v2437_v54 = vpack.c.bf16 %v617_v49, %v616_v48  ;;  %v618_v56 = vld [vmem:[#allocation9 + $0x70] sm:$0xff] }
  0xb5   : > { %2394 = vmatprep.subr.bf16.mxu0 %v2393_v12  ;;  %2422 = vmatprep.subr.bf16.mxu1 %v2421_v26  ;;  %v593_v55 = vld [vmem:[#allocation8 + $0x28] sm:$0xff]  ;;  %v619_v57 = vld [vmem:[#allocation9 + $0x78] sm:$0xff]  ;;  %v398_v59 = vld [vmem:[#allocation3 + $0x20] sm:$0xff] }
  0xb6   : > { %v397_v58 = vld [vmem:[#allocation3 + $0x18] sm:$0xff]  ;;  %v3349_v60 = vpack.c.bf16 %v593_v55, %v592_v53  ;;  %v2441_v61 = vpack.c.bf16 %v619_v57, %v618_v56  ;;  %v594_v62 = vld [vmem:[#allocation8 + $0x30] sm:$0xff]  ;;  %v399_v3 = vld [vmem:[#allocation3 + $0x28] sm:$0xff] }
  0xb7   : > { %v595_v63 = vld [vmem:[#allocation8 + $0x38] sm:$0xff]  ;;  %v400_v5 = vld [vmem:[#allocation3 + $0x30] sm:$0xff]  ;;  %v596_v9 = vld [vmem:[#allocation8 + $0x40] sm:$0xff] }
  0xb8   : > { %2396 = vmatpush3.bf16.msra.mxu0 %v2393_v12  ;;  %2424 = vmatpush3.bf16.msra.mxu1 %v2421_v26  ;;  %v3353_v8 = vpack.c.bf16 %v595_v63, %v594_v62  ;;  %v597_v12 = vld [vmem:[#allocation8 + $0x48] sm:$0xff]  ;;  %v401_v15 = vld [vmem:[#allocation3 + $0x38] sm:$0xff]  ;;  %v402_v16 = vld [vmem:[#allocation3 + $0x40] sm:$0xff] }
  0xb9   : > { %2398 = vmatprep.subr.bf16.mxu0 %v2397_v20  ;;  %2426 = vmatprep.subr.bf16.mxu1 %v2425_v32  ;;  %v3357_v17 = vpack.c.bf16 %v597_v12, %v596_v9  ;;  %v598_v18 = vld [vmem:[#allocation8 + $0x50] sm:$0xff]  ;;  %v599_v19 = vld [vmem:[#allocation8 + $0x58] sm:$0xff]  ;;  %v600_v23 = vld [vmem:[#allocation8 + $0x60] sm:$0xff] }
  0xba   : > { %v404_v21 = vld [vmem:[#allocation3 + $0x50] sm:$0xff]  ;;  %v3362_v22 = vpack.c.bf16 %v599_v19, %v598_v18  ;;  %v601_v26 = vld [vmem:[#allocation8 + $0x68] sm:$0xff]  ;;  %v406_v28 = vld [vmem:[#allocation3 + $0x60] sm:$0xff] }
  0xbb   : > { %v3366_v29 = vpack.c.bf16 %v601_v26, %v600_v23  ;;  %v407_v34 = vld [vmem:[#allocation3 + $0x68] sm:$0xff]  ;;  %v408_v35 = vld [vmem:[#allocation3 + $0x70] sm:$0xff] }
  0xbc   : > { %2400 = vmatpush3.bf16.msra.mxu0 %v2397_v20  ;;  %2428 = vmatpush3.bf16.msra.mxu1 %v2425_v32  ;;  %v403_v20 = vld [vmem:[#allocation3 + $0x48] sm:$0xff]  ;;  %v602_v32 = vld [vmem:[#allocation8 + $0x70] sm:$0xff] }
  0xbd   : > { %2402 = vmatprep.subr.bf16.mxu0 %v2401_v27  ;;  %2430 = vmatprep.subr.bf16.mxu1 %v2429_v38 }
  0xc0   : > { %2404 = vmatpush3.bf16.msra.mxu0 %v2401_v27  ;;  %2432 = vmatpush3.bf16.msra.mxu1 %v2429_v38  ;;  %v405_v27 = vld [vmem:[#allocation3 + $0x58] sm:$0xff] }
  0xc1   : > { %2406 = vmatprep.subr.bf16.mxu0 %v2405_v33  ;;  %2434 = vmatprep.subr.bf16.mxu1 %v2433_v44 }
  0xc4   : > { %2408 = vmatpush3.bf16.msra.mxu0 %v2405_v33  ;;  %2436 = vmatpush3.bf16.msra.mxu1 %v2433_v44  ;;  %v603_v33 = vld [vmem:[#allocation8 + $0x78] sm:$0xff] }
  0xc5   : > { %2410 = vmatprep.subr.bf16.mxu0 %v2409_v39  ;;  %2438 = vmatprep.subr.bf16.mxu1 %v2437_v54  ;;  %v2473_v38 = vpack.c.bf16 %v603_v33, %v602_v32 }
  0xc8   : > { %2412 = vmatpush3.bf16.msra.mxu0 %v2409_v39  ;;  %2440 = vmatpush3.bf16.msra.mxu1 %v2437_v54  ;;  %v409_v39 = vld [vmem:[#allocation3 + $0x78] sm:$0xff] }
  0xc9   : > { %2446 = vmatprep.subr.bf16.mxu0 %v3342_v45  ;;  %2442 = vmatprep.subr.bf16.mxu1 %v2441_v61 }
  0xcb   : > { %2078 = vmatmul.mubr.f32.vlgmr.msra.gmra.mrb[0].mxu0 %v395_v50 }
  0xcc   : > { %2080 = vmatprep.mubr.f32.mxu0 %v396_v51  ;;  %2448 = vmatpush3.bf16.msra.mxu0 %v3342_v45 }
  0xcd   : > { %2450 = vmatprep.subr.bf16.mxu0 %v3345_v52  ;;  %2444 = vmatpush3.bf16.msra.mxu1 %v2441_v61 }
  0xce   : > { %2573 = vmatprep.subr.bf16.mxu1 %v3342_v45 }
  0xcf   : > { %2081 = vmatmul.mubr.f32.gmra.mrb[2].mxu0 %v397_v58 }
  0xd0   : > { %2083 = vmatprep.mubr.f32.mxu0 %v398_v59  ;;  %2452 = vmatpush3.bf16.msra.mxu0 %v3345_v52 }
  0xd1   : > { %2454 = vmatprep.subr.bf16.mxu0 %v3349_v60 }
  0xd3   : > { %2084 = vmatmul.mubr.f32.gmra.mrb[4].mxu0 %v399_v3 }
  0xd4   : > { %2086 = vmatprep.mubr.f32.mxu0 %v400_v5  ;;  %2456 = vmatpush3.bf16.msra.mxu0 %v3349_v60 }
  0xd5   : > { %2458 = vmatprep.subr.bf16.mxu0 %v3353_v8 }
  0xd7   : > { %2087 = vmatmul.mubr.f32.gmra.mrb[6].mxu0 %v401_v15 }
  0xd8   : > { %2089 = vmatprep.mubr.f32.mxu0 %v402_v16  ;;  %2460 = vmatpush3.bf16.msra.mxu0 %v3353_v8 }
  0xd9   : > { %2462 = vmatprep.subr.bf16.mxu0 %v3357_v17 }
  0xdb   : > { %2090 = vmatmul.mubr.f32.gmra.mrb[8].mxu0 %v403_v20 }
  0xdc   : > { %2092 = vmatprep.mubr.f32.mxu0 %v404_v21  ;;  %2464 = vmatpush3.bf16.msra.mxu0 %v3357_v17 }
  0xdd   : > { %2466 = vmatprep.subr.bf16.mxu0 %v3362_v22 }
  0xdf   : > { %2093 = vmatmul.mubr.f32.gmra.mrb[10].mxu0 %v405_v27 }
  0xe0   : > { %2095 = vmatprep.mubr.f32.mxu0 %v406_v28  ;;  %2468 = vmatpush3.bf16.msra.mxu0 %v3362_v22 }
  0xe1   : > { %2470 = vmatprep.subr.bf16.mxu0 %v3366_v29 }
  0xe3   : > { %2096 = vmatmul.mubr.f32.gmra.mrb[12].mxu0 %v407_v34 }
  0xe4   : > { %2098 = vmatprep.mubr.f32.mxu0 %v408_v35  ;;  %2472 = vmatpush3.bf16.msra.mxu0 %v3366_v29 }
  0xe5   : > { %2474 = vmatprep.subr.bf16.mxu0 %v2473_v38 }
  0xe7   : > { %2099 = vmatmul.mubr.f32.gmra.mrb[14].mxu0 %v409_v39 }
  0xe8   : > { %2476 = vmatpush3.bf16.msra.mxu0 %v2473_v38  ;;  %2189 = vmatprep.mubr.f32.mxu0 %v3294_v0 }
  0xeb   : > { %2190 = vmatmul.mubr.f32.vlgmr.msra.gmra.mrb[16].mxu0 %v3296_v1 }
  0xec   : > { %2192 = vmatprep.mubr.f32.mxu0 %v3298_v2 }
  0xef   : > { %2193 = vmatmul.mubr.f32.gmra.mrb[18].mxu0 %v3302_v4 }
  0xf0   : > { %2195 = vmatprep.mubr.f32.mxu0 %v3306_v6 }
  0xf3   : > { %2196 = vmatmul.mubr.f32.gmra.mrb[20].mxu0 %v3308_v7 }
  0xf4   : > { %2198 = vmatprep.mubr.f32.mxu0 %v3312_v10 }
  0xf7   : > { %2199 = vmatmul.mubr.f32.gmra.mrb[22].mxu0 %v3314_v11 }
 0x19e   : > { %v2079_v40 = vpop.f32.mrb[0].mxu0 }
 0x19f   : > { %v492_v41 = vpop.f32.mrb[1].mxu0 }
 0x1a0   : > { %2133 = vmatprep.mubr.f32.mxu1 %v492_v41 }
 0x1a1   : > { %2134 = vmatmul.mubr.f32.vlgmr.msra.gmra.mrb[0].mxu1 %v2079_v40 }
 0x1a2   : > { %2581 = vmatpush3.bf16.msra.mxu1 %v3342_v45  ;;  %v2082_v0 = vpop.f32.mrb[2].mxu0 }
 0x1a3   : > { %v502_v1 = vpop.f32.mrb[3].mxu0  ;;  %2574 = vmatprep.subr.bf16.mxu1 %v3345_v52 }
 0x1a4   : > { %2136 = vmatprep.mubr.f32.mxu1 %v502_v1 }
 0x1a5   : > { %2137 = vmatmul.mubr.f32.gmra.mrb[2].mxu1 %v2082_v0 }
 0x1a6   : > { %2582 = vmatpush3.bf16.msra.mxu1 %v3345_v52  ;;  %v2085_v2 = vpop.f32.mrb[4].mxu0 }
 0x1a7   : > { %v512_v4 = vpop.f32.mrb[5].mxu0  ;;  %2575 = vmatprep.subr.bf16.mxu1 %v3349_v60 }
 0x1a8   : > { %2139 = vmatprep.mubr.f32.mxu1 %v512_v4 }
 0x1a9   : > { %2140 = vmatmul.mubr.f32.gmra.mrb[4].mxu1 %v2085_v2 }
 0x1aa   : > { %2583 = vmatpush3.bf16.msra.mxu1 %v3349_v60  ;;  %v2088_v6 = vpop.f32.mrb[6].mxu0 }
 0x1ab   : > { %v522_v7 = vpop.f32.mrb[7].mxu0  ;;  %2576 = vmatprep.subr.bf16.mxu1 %v3353_v8 }
 0x1ac   : > { %2142 = vmatprep.mubr.f32.mxu1 %v522_v7 }
 0x1ad   : > { %2143 = vmatmul.mubr.f32.gmra.mrb[6].mxu1 %v2088_v6 }
 0x1ae   : > { %2584 = vmatpush3.bf16.msra.mxu1 %v3353_v8  ;;  %v2091_v10 = vpop.f32.mrb[8].mxu0 }
 0x1af   : > { %v532_v11 = vpop.f32.mrb[9].mxu0  ;;  %2577 = vmatprep.subr.bf16.mxu1 %v3357_v17 }
 0x1b0   : > { %2145 = vmatprep.mubr.f32.mxu1 %v532_v11 }
 0x1b1   : > { %2146 = vmatmul.mubr.f32.gmra.mrb[8].mxu1 %v2091_v10 }
 0x1b2   : > { %2585 = vmatpush3.bf16.msra.mxu1 %v3357_v17  ;;  %v2094_v42 = vpop.f32.mrb[10].mxu0 }
 0x1b3   : > { %v542_v43 = vpop.f32.mrb[11].mxu0  ;;  %2578 = vmatprep.subr.bf16.mxu1 %v3362_v22 }
 0x1b4   : > { %2148 = vmatprep.mubr.f32.mxu1 %v542_v43 }
 0x1b5   : > { %2149 = vmatmul.mubr.f32.gmra.mrb[10].mxu1 %v2094_v42 }
 0x1b6   : > { %2586 = vmatpush3.bf16.msra.mxu1 %v3362_v22  ;;  %v2097_v44 = vpop.f32.mrb[12].mxu0 }
 0x1b7   : > { %v552_v45 = vpop.f32.mrb[13].mxu0  ;;  %2579 = vmatprep.subr.bf16.mxu1 %v3366_v29 }
 0x1b8   : > { %2151 = vmatprep.mubr.f32.mxu1 %v552_v45 }
 0x1b9   : > { %2152 = vmatmul.mubr.f32.gmra.mrb[12].mxu1 %v2097_v44 }
 0x1ba   : > { %2587 = vmatpush3.bf16.msra.mxu1 %v3366_v29  ;;  %v2100_v46 = vpop.f32.mrb[14].mxu0 }
 0x1bb   : > { %v562_v47 = vpop.f32.mrb[15].mxu0  ;;  %2580 = vmatprep.subr.bf16.mxu1 %v2473_v38 }
 0x1bc   : > { %2154 = vmatprep.mubr.f32.mxu1 %v562_v47 }
 0x1bd   : > { %2155 = vmatmul.mubr.f32.gmra.mrb[14].mxu1 %v2100_v46 }
 0x1be   : > { %2588 = vmatpush3.bf16.msra.mxu1 %v2473_v38  ;;  %2201 = vmatprep.mubr.f32.mxu1 %v3318_v13  ;;  %v2191_v48 = vpop.f32.mrb[16].mxu0 }
 0x1bf   : > { %v831_v49 = vpop.f32.mrb[17].mxu0 }
 0x1c1   : > { %2202 = vmatmul.mubr.f32.vlgmr.msra.gmra.mrb[8].mxu1 %v3320_v14 }
 0x1c2   : > { %2204 = vmatprep.mubr.f32.mxu1 %v3324_v24  ;;  %v2194_v50 = vpop.f32.mrb[18].mxu0  ;;  %v3403_v24 = vld [vmem:[%s3667_s4] ss:$0 sm:$0xff] }
 0x1c3   : > { %v841_v51 = vpop.f32.mrb[19].mxu0 }
 0x1c5   : > { %2205 = vmatmul.mubr.f32.gmra.mrb[10].mxu1 %v3326_v25 }
 0x1c6   : > { %2207 = vmatprep.mubr.f32.mxu1 %v3330_v30  ;;  %v2197_v52 = vpop.f32.mrb[20].mxu0 }
 0x1c7   : > { %v851_v13 = vpop.f32.mrb[21].mxu0 }
 0x1c9   : > { %2208 = vmatmul.mubr.f32.gmra.mrb[12].mxu1 %v3332_v31 }
 0x1ca   : > { %2210 = vmatprep.mubr.f32.mxu1 %v3336_v36  ;;  %v2200_v53 = vpop.f32.mrb[22].mxu0 }
 0x1cb   : > { %v861_v14 = vpop.f32.mrb[23].mxu0 }
 0x1cd   : > { %2211 = vmatmul.mubr.f32.gmra.mrb[14].mxu1 %v3338_v37 }
 0x274   : > { %v2135_v54 = vpop.f32.mrb[0].mxu1 }
 0x275   : > { %v837_v25 = vadd.f32 %v2191_v48, %v2135_v54  ;;  %v686_v30 = vpop.f32.mrb[1].mxu1 }
 0x276   : > { %v832_v31 = vadd.f32 %v831_v49, %v686_v30 }
 0x277   : > { %v918_v36 = vadd.f32 %v3403_v24, %v837_v25 }
 0x278   : > { %v917_v37 = vadd.f32 %v3403_v24, %v832_v31  ;;  %v2138_v55 = vpop.f32.mrb[2].mxu1 }
 0x279   : > { %v934_v56 = vmax.f32 %v918_v36, 0.0  ;;  %v847_v57 = vadd.f32 %v2194_v50, %v2138_v55  ;;  %v696_v58 = vpop.f32.mrb[3].mxu1 }
 0x27a   : > { %v933_v59 = vmax.f32 %v917_v37, 0.0  ;;  %v842_v60 = vadd.f32 %v841_v51, %v696_v58 }
 0x27b   : > { %951 = vst [vmem:[#allocation2 + $0x8] sm:$0xff] %v934_v56  ;;  %v920_v61 = vadd.f32 %v3403_v24, %v847_v57 }
 0x27c   : > { %950 = vst [vmem:[#allocation2] sm:$0xff] %v933_v59  ;;  %v919_v62 = vadd.f32 %v3403_v24, %v842_v60  ;;  %v2141_v63 = vpop.f32.mrb[4].mxu1 }
 0x27d   : > { %v936_v3 = vmax.f32 %v920_v61, 0.0  ;;  %v857_v5 = vadd.f32 %v2197_v52, %v2141_v63  ;;  %v706_v8 = vpop.f32.mrb[5].mxu1 }
 0x27e   : > { %v935_v9 = vmax.f32 %v919_v62, 0.0  ;;  %v852_v12 = vadd.f32 %v851_v13, %v706_v8 }
 0x27f   : > { %953 = vst [vmem:[#allocation2 + $0x18] sm:$0xff] %v936_v3  ;;  %v922_v15 = vadd.f32 %v3403_v24, %v857_v5 }
 0x280   : > { %952 = vst [vmem:[#allocation2 + $0x10] sm:$0xff] %v935_v9  ;;  %v921_v16 = vadd.f32 %v3403_v24, %v852_v12  ;;  %v2144_v17 = vpop.f32.mrb[6].mxu1 }
 0x281   : > { %v938_v18 = vmax.f32 %v922_v15, 0.0  ;;  %v867_v19 = vadd.f32 %v2200_v53, %v2144_v17  ;;  %v716_v20 = vpop.f32.mrb[7].mxu1 }
 0x282   : > { %v937_v21 = vmax.f32 %v921_v16, 0.0  ;;  %v862_v22 = vadd.f32 %v861_v14, %v716_v20 }
 0x283   : > { %955 = vst [vmem:[#allocation2 + $0x28] sm:$0xff] %v938_v18  ;;  %v924_v23 = vadd.f32 %v3403_v24, %v867_v19 }
 0x284   : > { %954 = vst [vmem:[#allocation2 + $0x20] sm:$0xff] %v937_v21  ;;  %v923_v26 = vadd.f32 %v3403_v24, %v862_v22 }
 0x285   : > { %v940_v27 = vmax.f32 %v924_v23, 0.0 }
 0x286   : > { %v939_v28 = vmax.f32 %v923_v26, 0.0 }
 0x287   : > { %957 = vst [vmem:[#allocation2 + $0x38] sm:$0xff] %v940_v27 }
 0x288   : > { %956 = vst [vmem:[#allocation2 + $0x30] sm:$0xff] %v939_v28 }
 0x294   : > { %v2203_v29 = vpop.f32.mrb[8].mxu1 }
 0x295   : > { %v926_v32 = vadd.f32 %v2203_v29, %v3403_v24  ;;  %v871_v33 = vpop.f32.mrb[9].mxu1 }
 0x296   : > { %v925_v34 = vadd.f32 %v3403_v24, %v871_v33 }
 0x297   : > { %v942_v35 = vmax.f32 %v926_v32, 0.0 }
 0x298   : > { %v941_v38 = vmax.f32 %v925_v34, 0.0  ;;  %v2206_v39 = vpop.f32.mrb[10].mxu1 }
 0x299   : > { %959 = vst [vmem:[#allocation2 + $0x48] sm:$0xff] %v942_v35  ;;  %v928_v40 = vadd.f32 %v2206_v39, %v3403_v24  ;;  %v881_v41 = vpop.f32.mrb[11].mxu1 }
 0x29a   : > { %958 = vst [vmem:[#allocation2 + $0x40] sm:$0xff] %v941_v38  ;;  %v927_v0 = vadd.f32 %v3403_v24, %v881_v41 }
 0x29b   : > { %v944_v1 = vmax.f32 %v928_v40, 0.0 }
 0x29c   : > { %v943_v2 = vmax.f32 %v927_v0, 0.0  ;;  %v2209_v4 = vpop.f32.mrb[12].mxu1 }
 0x29d   : > { %961 = vst [vmem:[#allocation2 + $0x58] sm:$0xff] %v944_v1  ;;  %v930_v6 = vadd.f32 %v2209_v4, %v3403_v24  ;;  %v891_v7 = vpop.f32.mrb[13].mxu1 }
 0x29e   : > { %960 = vst [vmem:[#allocation2 + $0x50] sm:$0xff] %v943_v2  ;;  %v929_v10 = vadd.f32 %v3403_v24, %v891_v7 }
 0x29f   : > { %v946_v11 = vmax.f32 %v930_v6, 0.0 }
 0x2a0   : > { %v945_v42 = vmax.f32 %v929_v10, 0.0  ;;  %v2212_v43 = vpop.f32.mrb[14].mxu1 }
 0x2a1   : > { %963 = vst [vmem:[#allocation2 + $0x68] sm:$0xff] %v946_v11  ;;  %v932_v44 = vadd.f32 %v2212_v43, %v3403_v24  ;;  %v901_v45 = vpop.f32.mrb[15].mxu1 }
 0x2a2   : > { %962 = vst [vmem:[#allocation2 + $0x60] sm:$0xff] %v945_v42  ;;  %v931_v46 = vadd.f32 %v3403_v24, %v901_v45 }
 0x2a3   : > { %v948_v47 = vmax.f32 %v932_v44, 0.0 }
 0x2a4   : > { %v947_v48 = vmax.f32 %v931_v46, 0.0 }
 0x2a5   : > { %965 = vst [vmem:[#allocation2 + $0x78] sm:$0xff] %v948_v47 }
 0x2a6   : > { %964 = vst [vmem:[#allocation2 + $0x70] sm:$0xff] %v947_v48 }
 0x2a7 PF: > { %p1847_p6 = scmp.ne.s32.totalorder %s3030_s27, 1 }
 0x2a8   : > { %v3422_v49 = vld [vmem:[#allocation2] sm:$0xff] (!%p1847_p6)  ;;  %v3424_v50 = vld [vmem:[#allocation2 + $0x8] sm:$0xff] (!%p1847_p6)  ;;  %v3426_v51 = vld [vmem:[#allocation2 + $0x10] sm:$0xff] (!%p1847_p6) }
 0x2a9   : > { %969 = sbr.rel (%p1847_p6) target bundleno = 1503 (0x5df), region = 84  ;;  %v2477_v52 = vpack.c.bf16 (!%p1847_p6), %v3424_v50, %v3422_v49  ;;  %v3430_v13 = vld [vmem:[#allocation2 + $0x18] sm:$0xff] (!%p1847_p6)  ;;  %v3434_v14 = vld [vmem:[#allocation2 + $0x20] sm:$0xff] (!%p1847_p6)  ;;  %v3436_v54 = vld [vmem:[#allocation2 + $0x28] sm:$0xff] (!%p1847_p6) }
 0x2aa   : > { %v2481_v53 = vpack.c.bf16 (!%p1847_p6), %v3430_v13, %v3426_v51  ;;  %v2485_v24 = vpack.c.bf16 (!%p1847_p6), %v3436_v54, %v3434_v14  ;;  %v971_v25 = vld [vmem:[#allocation3] sm:$0xff] (!%p1847_p6)  ;;  %v3440_v30 = vld [vmem:[#allocation2 + $0x30] sm:$0xff] (!%p1847_p6)  ;;  %v3442_v31 = vld [vmem:[#allocation2 + $0x38] sm:$0xff] (!%p1847_p6) }
 0x2ab   : > { %2478 = vmatprep.subr.bf16.mxu0 (!%p1847_p6), %v2477_v52  ;;  %2245 = vmatprep.mubr.f32.mxu0 (!%p1847_p6), %v971_v25  ;;  %v2489_v36 = vpack.c.bf16 (!%p1847_p6), %v3442_v31, %v3440_v30  ;;  %v3446_v37 = vld [vmem:[#allocation2 + $0x40] sm:$0xff] (!%p1847_p6)  ;;  %v3448_v55 = vld [vmem:[#allocation2 + $0x48] sm:$0xff] (!%p1847_p6)  ;;  %v1183_v59 = vld [vmem:[#allocation12 + $0x10] sm:$0xff] (!%p1847_p6) }
 0x2ac   : > { %2480 = vmatpush3.bf16.msra.mxu0 (!%p1847_p6), %v2477_v52  ;;  %v1181_v56 = vld [vmem:[#allocation12] sm:$0xff] (!%p1847_p6)  ;;  %v1182_v57 = vld [vmem:[#allocation12 + $0x8] sm:$0xff] (!%p1847_p6)  ;;  %v1184_v60 = vld [vmem:[#allocation12 + $0x18] sm:$0xff] (!%p1847_p6)  ;;  %v2493_v61 = vpack.c.bf16 (!%p1847_p6), %v3448_v55, %v3446_v37 }
 0x2ad   : > { %2482 = vmatprep.subr.bf16.mxu0 (!%p1847_p6), %v2481_v53  ;;  %v2509_v58 = vpack.c.bf16 (!%p1847_p6), %v1182_v57, %v1181_v56  ;;  %v2513_v62 = vpack.c.bf16 (!%p1847_p6), %v1184_v60, %v1183_v59  ;;  %v1185_v63 = vld [vmem:[#allocation12 + $0x20] sm:$0xff] (!%p1847_p6)  ;;  %v1186_v3 = vld [vmem:[#allocation12 + $0x28] sm:$0xff] (!%p1847_p6)  ;;  %v3452_v5 = vld [vmem:[#allocation2 + $0x50] sm:$0xff] (!%p1847_p6) }
 0x2ae   : > { %v3454_v8 = vld [vmem:[#allocation2 + $0x58] sm:$0xff] (!%p1847_p6)  ;;  %v2517_v9 = vpack.c.bf16 (!%p1847_p6), %v1186_v3, %v1185_v63  ;;  %v1187_v15 = vld [vmem:[#allocation12 + $0x30] sm:$0xff] (!%p1847_p6)  ;;  %v3458_v17 = vld [vmem:[#allocation2 + $0x60] sm:$0xff] (!%p1847_p6) }
 0x2af   : > { %2510 = vmatprep.subr.bf16.mxu1 (!%p1847_p6), %v2509_v58  ;;  %v2497_v12 = vpack.c.bf16 (!%p1847_p6), %v3454_v8, %v3452_v5  ;;  %v1188_v16 = vld [vmem:[#allocation12 + $0x38] sm:$0xff] (!%p1847_p6)  ;;  %v3460_v18 = vld [vmem:[#allocation2 + $0x68] sm:$0xff] (!%p1847_p6)  ;;  %v1189_v21 = vld [vmem:[#allocation12 + $0x40] sm:$0xff] (!%p1847_p6) }
 0x2b0   : > { %2484 = vmatpush3.bf16.msra.mxu0 %v2481_v53  ;;  %2512 = vmatpush3.bf16.msra.mxu1 %v2509_v58  ;;  %v2521_v19 = vpack.c.bf16 %v1188_v16, %v1187_v15  ;;  %v2501_v20 = vpack.c.bf16 %v3460_v18, %v3458_v17  ;;  %v1190_v22 = vld [vmem:[#allocation12 + $0x48] sm:$0xff]  ;;  %v3464_v23 = vld [vmem:[#allocation2 + $0x70] sm:$0xff]  ;;  %v3466_v26 = vld [vmem:[#allocation2 + $0x78] sm:$0xff] }
 0x2b1   : > { %2486 = vmatprep.subr.bf16.mxu0 %v2485_v24  ;;  %2514 = vmatprep.subr.bf16.mxu1 %v2513_v62  ;;  %v2525_v27 = vpack.c.bf16 %v1190_v22, %v1189_v21  ;;  %v2505_v28 = vpack.c.bf16 %v3466_v26, %v3464_v23  ;;  %v1191_v29 = vld [vmem:[#allocation12 + $0x50] sm:$0xff]  ;;  %v1192_v32 = vld [vmem:[#allocation12 + $0x58] sm:$0xff]  ;;  %v1165_v33 = vld [vmem:[#allocation11] sm:$0xff] }
 0x2b2   : > { %v1166_v34 = vld [vmem:[#allocation11 + $0x8] sm:$0xff]  ;;  %v2529_v35 = vpack.c.bf16 %v1192_v32, %v1191_v29  ;;  %v1167_v39 = vld [vmem:[#allocation11 + $0x10] sm:$0xff]  ;;  %v1168_v40 = vld [vmem:[#allocation11 + $0x18] sm:$0xff] }
 0x2b3   : > { %v3470_v38 = vpack.c.bf16 %v1166_v34, %v1165_v33  ;;  %v1193_v41 = vld [vmem:[#allocation12 + $0x60] sm:$0xff]  ;;  %v1194_v0 = vld [vmem:[#allocation12 + $0x68] sm:$0xff]  ;;  %v973_v2 = vld [vmem:[#allocation3 + $0x10] sm:$0xff]  ;;  %v3473_v4 = vpack.c.bf16 %v1168_v40, %v1167_v39 }
 0x2b4   : > { %2488 = vmatpush3.bf16.msra.mxu0 %v2485_v24  ;;  %2516 = vmatpush3.bf16.msra.mxu1 %v2513_v62  ;;  %v972_v1 = vld [vmem:[#allocation3 + $0x8] sm:$0xff]  ;;  %v1169_v6 = vld [vmem:[#allocation11 + $0x20] sm:$0xff]  ;;  %v2533_v7 = vpack.c.bf16 %v1194_v0, %v1193_v41  ;;  %v1195_v11 = vld [vmem:[#allocation12 + $0x70] sm:$0xff] }
 0x2b5   : > { %2490 = vmatprep.subr.bf16.mxu0 %v2489_v36  ;;  %2518 = vmatprep.subr.bf16.mxu1 %v2517_v9  ;;  %v1170_v10 = vld [vmem:[#allocation11 + $0x28] sm:$0xff]  ;;  %v1196_v42 = vld [vmem:[#allocation12 + $0x78] sm:$0xff]  ;;  %v975_v44 = vld [vmem:[#allocation3 + $0x20] sm:$0xff] }
 0x2b6   : > { %v974_v43 = vld [vmem:[#allocation3 + $0x18] sm:$0xff]  ;;  %v3477_v45 = vpack.c.bf16 %v1170_v10, %v1169_v6  ;;  %v2537_v46 = vpack.c.bf16 %v1196_v42, %v1195_v11  ;;  %v1171_v47 = vld [vmem:[#allocation11 + $0x30] sm:$0xff]  ;;  %v976_v52 = vld [vmem:[#allocation3 + $0x28] sm:$0xff] }
 0x2b7   : > { %v1172_v48 = vld [vmem:[#allocation11 + $0x38] sm:$0xff]  ;;  %v977_v53 = vld [vmem:[#allocation3 + $0x30] sm:$0xff]  ;;  %v1173_v25 = vld [vmem:[#allocation11 + $0x40] sm:$0xff] }
 0x2b8   : > { %2492 = vmatpush3.bf16.msra.mxu0 %v2489_v36  ;;  %2520 = vmatpush3.bf16.msra.mxu1 %v2517_v9  ;;  %v3481_v24 = vpack.c.bf16 %v1172_v48, %v1171_v47  ;;  %v1174_v36 = vld [vmem:[#allocation11 + $0x48] sm:$0xff]  ;;  %v978_v56 = vld [vmem:[#allocation3 + $0x38] sm:$0xff]  ;;  %v979_v57 = vld [vmem:[#allocation3 + $0x40] sm:$0xff] }
 0x2b9   : > { %2494 = vmatprep.subr.bf16.mxu0 %v2493_v61  ;;  %2522 = vmatprep.subr.bf16.mxu1 %v2521_v19  ;;  %v3485_v58 = vpack.c.bf16 %v1174_v36, %v1173_v25  ;;  %v1175_v59 = vld [vmem:[#allocation11 + $0x50] sm:$0xff]  ;;  %v1176_v60 = vld [vmem:[#allocation11 + $0x58] sm:$0xff]  ;;  %v1177_v3 = vld [vmem:[#allocation11 + $0x60] sm:$0xff] }
 0x2ba   : > { %v981_v62 = vld [vmem:[#allocation3 + $0x50] sm:$0xff]  ;;  %v3490_v63 = vpack.c.bf16 %v1176_v60, %v1175_v59  ;;  %v1178_v9 = vld [vmem:[#allocation11 + $0x68] sm:$0xff]  ;;  %v983_v15 = vld [vmem:[#allocation3 + $0x60] sm:$0xff] }
 0x2bb   : > { %v3494_v16 = vpack.c.bf16 %v1178_v9, %v1177_v3  ;;  %v984_v21 = vld [vmem:[#allocation3 + $0x68] sm:$0xff]  ;;  %v985_v22 = vld [vmem:[#allocation3 + $0x70] sm:$0xff] }
 0x2bc   : > { %2496 = vmatpush3.bf16.msra.mxu0 %v2493_v61  ;;  %2524 = vmatpush3.bf16.msra.mxu1 %v2521_v19  ;;  %v980_v61 = vld [vmem:[#allocation3 + $0x48] sm:$0xff]  ;;  %v1179_v19 = vld [vmem:[#allocation11 + $0x70] sm:$0xff] }
 0x2bd   : > { %2498 = vmatprep.subr.bf16.mxu0 %v2497_v12  ;;  %2526 = vmatprep.subr.bf16.mxu1 %v2525_v27 }
 0x2c0   : > { %2500 = vmatpush3.bf16.msra.mxu0 %v2497_v12  ;;  %2528 = vmatpush3.bf16.msra.mxu1 %v2525_v27  ;;  %v982_v12 = vld [vmem:[#allocation3 + $0x58] sm:$0xff] }
 0x2c1   : > { %2502 = vmatprep.subr.bf16.mxu0 %v2501_v20  ;;  %2530 = vmatprep.subr.bf16.mxu1 %v2529_v35 }
 0x2c4   : > { %2504 = vmatpush3.bf16.msra.mxu0 %v2501_v20  ;;  %2532 = vmatpush3.bf16.msra.mxu1 %v2529_v35  ;;  %v1180_v20 = vld [vmem:[#allocation11 + $0x78] sm:$0xff] }
 0x2c5   : > { %2506 = vmatprep.subr.bf16.mxu0 %v2505_v28  ;;  %2534 = vmatprep.subr.bf16.mxu1 %v2533_v7  ;;  %v2569_v27 = vpack.c.bf16 %v1180_v20, %v1179_v19 }
 0x2c8   : > { %2508 = vmatpush3.bf16.msra.mxu0 %v2505_v28  ;;  %2536 = vmatpush3.bf16.msra.mxu1 %v2533_v7  ;;  %v986_v28 = vld [vmem:[#allocation3 + $0x78] sm:$0xff] }
 0x2c9   : > { %2542 = vmatprep.subr.bf16.mxu0 %v3470_v38  ;;  %2538 = vmatprep.subr.bf16.mxu1 %v2537_v46 }
 0x2cb   : > { %2246 = vmatmul.mubr.f32.vlgmr.msra.gmra.mrb[0].mxu0 %v972_v1 }
 0x2cc   : > { %2248 = vmatprep.mubr.f32.mxu0 %v973_v2  ;;  %2544 = vmatpush3.bf16.msra.mxu0 %v3470_v38 }
 0x2cd   : > { %2546 = vmatprep.subr.bf16.mxu0 %v3473_v4  ;;  %2540 = vmatpush3.bf16.msra.mxu1 %v2537_v46 }
 0x2ce   : > { %2605 = vmatprep.subr.bf16.mxu1 %v3470_v38 }
 0x2cf   : > { %2249 = vmatmul.mubr.f32.gmra.mrb[2].mxu0 %v974_v43 }
 0x2d0   : > { %2251 = vmatprep.mubr.f32.mxu0 %v975_v44  ;;  %2548 = vmatpush3.bf16.msra.mxu0 %v3473_v4 }
 0x2d1   : > { %2550 = vmatprep.subr.bf16.mxu0 %v3477_v45 }
 0x2d3   : > { %2252 = vmatmul.mubr.f32.gmra.mrb[4].mxu0 %v976_v52 }
 0x2d4   : > { %2254 = vmatprep.mubr.f32.mxu0 %v977_v53  ;;  %2552 = vmatpush3.bf16.msra.mxu0 %v3477_v45 }
 0x2d5   : > { %2554 = vmatprep.subr.bf16.mxu0 %v3481_v24 }
 0x2d7   : > { %2255 = vmatmul.mubr.f32.gmra.mrb[6].mxu0 %v978_v56 }
 0x2d8   : > { %2257 = vmatprep.mubr.f32.mxu0 %v979_v57  ;;  %2556 = vmatpush3.bf16.msra.mxu0 %v3481_v24 }
 0x2d9   : > { %2558 = vmatprep.subr.bf16.mxu0 %v3485_v58 }
 0x2db   : > { %2258 = vmatmul.mubr.f32.gmra.mrb[8].mxu0 %v980_v61 }
 0x2dc   : > { %2260 = vmatprep.mubr.f32.mxu0 %v981_v62  ;;  %2560 = vmatpush3.bf16.msra.mxu0 %v3485_v58 }
 0x2dd   : > { %2562 = vmatprep.subr.bf16.mxu0 %v3490_v63 }
 0x2df   : > { %2261 = vmatmul.mubr.f32.gmra.mrb[10].mxu0 %v982_v12 }
 0x2e0   : > { %2263 = vmatprep.mubr.f32.mxu0 %v983_v15  ;;  %2564 = vmatpush3.bf16.msra.mxu0 %v3490_v63 }
 0x2e1   : > { %2566 = vmatprep.subr.bf16.mxu0 %v3494_v16 }
 0x2e3   : > { %2264 = vmatmul.mubr.f32.gmra.mrb[12].mxu0 %v984_v21 }
 0x2e4   : > { %2266 = vmatprep.mubr.f32.mxu0 %v985_v22  ;;  %2568 = vmatpush3.bf16.msra.mxu0 %v3494_v16 }
 0x2e5   : > { %2570 = vmatprep.subr.bf16.mxu0 %v2569_v27 }
 0x2e7   : > { %2267 = vmatmul.mubr.f32.gmra.mrb[14].mxu0 %v986_v28 }
 0x2e8   : > { %2572 = vmatpush3.bf16.msra.mxu0 %v2569_v27  ;;  %2357 = vmatprep.mubr.f32.mxu0 %v3422_v49 }
 0x2eb   : > { %2358 = vmatmul.mubr.f32.vlgmr.msra.gmra.mrb[16].mxu0 %v3424_v50 }
 0x2ec   : > { %2360 = vmatprep.mubr.f32.mxu0 %v3426_v51 }
 0x2ef   : > { %2361 = vmatmul.mubr.f32.gmra.mrb[18].mxu0 %v3430_v13 }
 0x2f0   : > { %2363 = vmatprep.mubr.f32.mxu0 %v3434_v14 }
 0x2f3   : > { %2364 = vmatmul.mubr.f32.gmra.mrb[20].mxu0 %v3436_v54 }
 0x2f4   : > { %2366 = vmatprep.mubr.f32.mxu0 %v3440_v30 }
 0x2f7   : > { %2367 = vmatmul.mubr.f32.gmra.mrb[22].mxu0 %v3442_v31 }
 0x39e   : > { %v2247_v29 = vpop.f32.mrb[0].mxu0 }
 0x39f   : > { %v1069_v32 = vpop.f32.mrb[1].mxu0 }
 0x3a0   : > { %2301 = vmatprep.mubr.f32.mxu1 %v1069_v32 }
 0x3a1   : > { %2302 = vmatmul.mubr.f32.vlgmr.msra.gmra.mrb[0].mxu1 %v2247_v29 }
 0x3a2   : > { %2613 = vmatpush3.bf16.msra.mxu1 %v3470_v38  ;;  %v2250_v49 = vpop.f32.mrb[2].mxu0 }
 0x3a3   : > { %v1079_v50 = vpop.f32.mrb[3].mxu0  ;;  %2606 = vmatprep.subr.bf16.mxu1 %v3473_v4 }
 0x3a4   : > { %2304 = vmatprep.mubr.f32.mxu1 %v1079_v50 }
 0x3a5   : > { %2305 = vmatmul.mubr.f32.gmra.mrb[2].mxu1 %v2250_v49 }
 0x3a6   : > { %2614 = vmatpush3.bf16.msra.mxu1 %v3473_v4  ;;  %v2253_v51 = vpop.f32.mrb[4].mxu0 }
 0x3a7   : > { %v1089_v13 = vpop.f32.mrb[5].mxu0  ;;  %2607 = vmatprep.subr.bf16.mxu1 %v3477_v45 }
 0x3a8   : > { %2307 = vmatprep.mubr.f32.mxu1 %v1089_v13 }
 0x3a9   : > { %2308 = vmatmul.mubr.f32.gmra.mrb[4].mxu1 %v2253_v51 }
 0x3aa   : > { %2615 = vmatpush3.bf16.msra.mxu1 %v3477_v45  ;;  %v2256_v14 = vpop.f32.mrb[6].mxu0 }
 0x3ab   : > { %v1099_v54 = vpop.f32.mrb[7].mxu0  ;;  %2608 = vmatprep.subr.bf16.mxu1 %v3481_v24 }
 0x3ac   : > { %2310 = vmatprep.mubr.f32.mxu1 %v1099_v54 }
 0x3ad   : > { %2311 = vmatmul.mubr.f32.gmra.mrb[6].mxu1 %v2256_v14 }
 0x3ae   : > { %2616 = vmatpush3.bf16.msra.mxu1 %v3481_v24  ;;  %v2259_v30 = vpop.f32.mrb[8].mxu0 }
 0x3af   : > { %v1109_v31 = vpop.f32.mrb[9].mxu0  ;;  %2609 = vmatprep.subr.bf16.mxu1 %v3485_v58 }
 0x3b0   : > { %2313 = vmatprep.mubr.f32.mxu1 %v1109_v31 }
 0x3b1   : > { %2314 = vmatmul.mubr.f32.gmra.mrb[8].mxu1 %v2259_v30 }
 0x3b2   : > { %2617 = vmatpush3.bf16.msra.mxu1 %v3485_v58  ;;  %v2262_v33 = vpop.f32.mrb[10].mxu0 }
 0x3b3   : > { %v1119_v34 = vpop.f32.mrb[11].mxu0  ;;  %2610 = vmatprep.subr.bf16.mxu1 %v3490_v63 }
 0x3b4   : > { %2316 = vmatprep.mubr.f32.mxu1 %v1119_v34 }
 0x3b5   : > { %2317 = vmatmul.mubr.f32.gmra.mrb[10].mxu1 %v2262_v33 }
 0x3b6   : > { %2618 = vmatpush3.bf16.msra.mxu1 %v3490_v63  ;;  %v2265_v35 = vpop.f32.mrb[12].mxu0 }
 0x3b7   : > { %v1129_v38 = vpop.f32.mrb[13].mxu0  ;;  %2611 = vmatprep.subr.bf16.mxu1 %v3494_v16 }
 0x3b8   : > { %2319 = vmatprep.mubr.f32.mxu1 %v1129_v38 }
 0x3b9   : > { %2320 = vmatmul.mubr.f32.gmra.mrb[12].mxu1 %v2265_v35 }
 0x3ba   : > { %2619 = vmatpush3.bf16.msra.mxu1 %v3494_v16  ;;  %v2268_v39 = vpop.f32.mrb[14].mxu0 }
 0x3bb   : > { %v1139_v40 = vpop.f32.mrb[15].mxu0  ;;  %2612 = vmatprep.subr.bf16.mxu1 %v2569_v27 }
 0x3bc   : > { %2322 = vmatprep.mubr.f32.mxu1 %v1139_v40 }
 0x3bd   : > { %2323 = vmatmul.mubr.f32.gmra.mrb[14].mxu1 %v2268_v39 }
 0x3be   : > { %2620 = vmatpush3.bf16.msra.mxu1 %v2569_v27  ;;  %2369 = vmatprep.mubr.f32.mxu1 %v3446_v37  ;;  %v2359_v41 = vpop.f32.mrb[16].mxu0 }
 0x3bf   : > { %v1408_v0 = vpop.f32.mrb[17].mxu0 }
 0x3c1   : > { %2370 = vmatmul.mubr.f32.vlgmr.msra.gmra.mrb[8].mxu1 %v3448_v55 }
 0x3c2   : > { %2372 = vmatprep.mubr.f32.mxu1 %v3452_v5  ;;  %v2362_v1 = vpop.f32.mrb[18].mxu0  ;;  %v1848_v5 = vld [vmem:[%s3670_s7] ss:$0 sm:$0xff] }
 0x3c3   : > { %v1418_v2 = vpop.f32.mrb[19].mxu0 }
 0x3c5   : > { %2373 = vmatmul.mubr.f32.gmra.mrb[10].mxu1 %v3454_v8 }
 0x3c6   : > { %2375 = vmatprep.mubr.f32.mxu1 %v3458_v17  ;;  %v2365_v4 = vpop.f32.mrb[20].mxu0 }
 0x3c7   : > { %v1428_v37 = vpop.f32.mrb[21].mxu0 }
 0x3c9   : > { %2376 = vmatmul.mubr.f32.gmra.mrb[12].mxu1 %v3460_v18 }
 0x3ca   : > { %2378 = vmatprep.mubr.f32.mxu1 %v3464_v23  ;;  %v2368_v6 = vpop.f32.mrb[22].mxu0 }
 0x3cb   : > { %v1438_v55 = vpop.f32.mrb[23].mxu0 }
 0x3cd   : > { %2379 = vmatmul.mubr.f32.gmra.mrb[14].mxu1 %v3466_v26 }
 0x474   : > { %v2303_v7 = vpop.f32.mrb[0].mxu1 }
 0x475   : > { %v1414_v8 = vadd.f32 %v2359_v41, %v2303_v7  ;;  %v1263_v17 = vpop.f32.mrb[1].mxu1 }
 0x476   : > { %v1409_v18 = vadd.f32 %v1408_v0, %v1263_v17 }
 0x477   : > { %v1495_v10 = vadd.f32 %v1848_v5, %v1414_v8 }
 0x478   : > { %v2306_v23 = vpop.f32.mrb[2].mxu1  ;;  %v1494_v44 = vadd.f32 %v1848_v5, %v1409_v18 }
 0x479   : > { %v1424_v11 = vadd.f32 %v2362_v1, %v2306_v23  ;;  %v1273_v26 = vpop.f32.mrb[3].mxu1  ;;  %1512 = vmax.xlane.f32.xlu0 %v1495_v10 }
 0x47a   : > { %v1419_v42 = vadd.f32 %v1418_v2, %v1273_v26 }
 0x47b   : > { %v1497_v43 = vadd.f32 %v1848_v5, %v1424_v11 }
 0x47c   : > { %v2309_v45 = vpop.f32.mrb[4].mxu1  ;;  %v1496_v52 = vadd.f32 %v1848_v5, %v1419_v42 }
 0x47d   : > { %v1434_v46 = vadd.f32 %v2365_v4, %v2309_v45  ;;  %v1283_v47 = vpop.f32.mrb[5].mxu1  ;;  %1516 = vmax.xlane.f32.xlu1 %v1497_v43  ;;  %1510 = vmax.xlane.f32.xlu0 %v1494_v44 }
 0x47e   : > { %v1429_v48 = vadd.f32 %v1428_v37, %v1283_v47 }
 0x47f   : > { %v1499_v57 = vadd.f32 %v1848_v5, %v1434_v46 }
 0x480   : > { %v2312_v53 = vpop.f32.mrb[6].mxu1  ;;  %v1498_v24 = vadd.f32 %v1848_v5, %v1429_v48 }
 0x481   : > { %v1444_v25 = vadd.f32 %v2368_v6, %v2312_v53  ;;  %v1293_v36 = vpop.f32.mrb[7].mxu1  ;;  %1514 = vmax.xlane.f32.xlu1 %v1496_v52 }
 0x482   : > { %v1439_v56 = vadd.f32 %v1438_v55, %v1293_v36  ;;  %1518 = vmax.xlane.f32.xlu0 %v1498_v24 }
 0x483   : > { %v1501_v59 = vadd.f32 %v1848_v5, %v1444_v25 }
 0x484   : > { %v1500_v58 = vadd.f32 %v1848_v5, %v1439_v56 }
 0x485   : > { %1520 = vmax.xlane.f32.xlu1 %v1499_v57 }
 0x486   : > { %1522 = vmax.xlane.f32.xlu0 %v1500_v58 }
 0x489   : > { %1524 = vmax.xlane.f32.xlu1 %v1501_v59 }
 0x494   : > { %v2371_v60 = vpop.f32.mrb[8].mxu1 }
 0x495   : > { %v3531_v61 = vadd.f32 %v2371_v60, %v1848_v5  ;;  %v1448_v62 = vpop.f32.mrb[9].mxu1 }
 0x496   : > { %v3533_v63 = vadd.f32 %v1848_v5, %v1448_v62 }
 0x497   : > { %1528 = vmax.xlane.f32.xlu1 %v3531_v61 }
 0x498   : > { %1526 = vmax.xlane.f32.xlu0 %v3533_v63  ;;  %v2374_v3 = vpop.f32.mrb[10].mxu1 }
 0x499   : > { %v3537_v9 = vadd.f32 %v2374_v3, %v1848_v5  ;;  %v1458_v12 = vpop.f32.mrb[11].mxu1 }
 0x49a   : > { %v3539_v15 = vadd.f32 %v1848_v5, %v1458_v12 }
 0x49b   : > { %1532 = vmax.xlane.f32.xlu1 %v3537_v9 }
 0x49c   : > { %1530 = vmax.xlane.f32.xlu0 %v3539_v15  ;;  %v2377_v16 = vpop.f32.mrb[12].mxu1 }
 0x49d   : > { %v3543_v19 = vadd.f32 %v2377_v16, %v1848_v5  ;;  %v1468_v20 = vpop.f32.mrb[13].mxu1 }
 0x49e   : > { %v3545_v21 = vadd.f32 %v1848_v5, %v1468_v20 }
 0x49f   : > { %1536 = vmax.xlane.f32.xlu1 %v3543_v19 }
 0x4a0   : > { %1534 = vmax.xlane.f32.xlu0 %v3545_v21  ;;  %v2380_v22 = vpop.f32.mrb[14].mxu1 }
 0x4a1   : > { %v3549_v27 = vadd.f32 %v2380_v22, %v1848_v5  ;;  %v1478_v28 = vpop.f32.mrb[15].mxu1 }
 0x4a2   : > { %v3551_v29 = vadd.f32 %v1848_v5, %v1478_v28 }
 0x4a3   : > { %1540 = vmax.xlane.f32.xlu1 %v3549_v27 }
 0x4a4   : > { %1538 = vmax.xlane.f32.xlu0 %v3551_v29 }
 0x506   : > { %v1513_v32 = vpop.xlane.xlu0 %1512 }
 0x507   : > { %v3555_v49 = vsub.f32 %v1495_v10, %v1513_v32 }
 0x509   : > { %v1560_v50 = vmul.f32 1.442695, %v3555_v49 }
 0x50a   : > { %v1517_v51 = vpop.xlane.xlu1 %1516  ;;  %v1511_v13 = vpop.xlane.xlu0 %1510 }
 0x50b   : > { %2738 = vpow2.f32 %v1560_v50  ;;  %v3558_v14 = vsub.f32 %v1497_v43, %v1517_v51  ;;  %v3560_v54 = vsub.f32 %v1494_v44, %v1511_v13 }
 0x50d   : > { %v1564_v30 = vmul.f32 1.442695, %v3558_v14  ;;  %v1558_v31 = vmul.f32 1.442695, %v3560_v54 }
 0x50e   : > { %v1515_v33 = vpop.xlane.xlu1 %1514 }
 0x50f   : > { %2740 = vpow2.f32 %v1564_v30  ;;  %v3564_v34 = vsub.f32 %v1496_v52, %v1515_v33  ;;  %v1519_v35 = vpop.xlane.xlu0 %1518 }
 0x510   : > { %2742 = vpow2.f32 %v1558_v31  ;;  %v3566_v38 = vsub.f32 %v1498_v24, %v1519_v35 }
 0x511   : > { %v1562_v39 = vmul.f32 1.442695, %v3564_v34 }
 0x512   : > { %v1521_v40 = vpop.xlane.xlu1 %1520  ;;  %v1566_v1 = vmul.f32 1.442695, %v3566_v38 }
 0x513   : > { %2744 = vpow2.f32 %v1562_v39  ;;  %v3569_v41 = vsub.f32 %v1499_v57, %v1521_v40  ;;  %v1523_v0 = vpop.xlane.xlu0 %1522 }
 0x514   : > { %v3572_v2 = vsub.f32 %v1500_v58, %v1523_v0 }
 0x515   : > { %v2739_v4 = vpop.eup %2738  ;;  %v1568_v37 = vmul.f32 1.442695, %v3569_v41 }
 0x516   : > { %v1525_v6 = vpop.xlane.xlu1 %1524  ;;  %1592 = vadd.xlane.f32.xlu1 %v2739_v4  ;;  %v1570_v7 = vmul.f32 1.442695, %v3572_v2 }
 0x517   : > { %2746 = vpow2.f32 %v1568_v37  ;;  %v3575_v55 = vsub.f32 %v1501_v59, %v1525_v6 }
 0x518   : > { %2748 = vpow2.f32 %v1566_v1 }
 0x519   : > { %v2741_v5 = vpop.eup %2740  ;;  %v1572_v8 = vmul.f32 1.442695, %v3575_v55 }
 0x51a   : > { %v2743_v17 = vpop.eup %2742  ;;  %1596 = vadd.xlane.f32.xlu1 %v2741_v5 }
 0x51b   : > { %2750 = vpow2.f32 %v1572_v8  ;;  %1590 = vadd.xlane.f32.xlu0 %v2743_v17 }
 0x51c   : > { %2752 = vpow2.f32 %v1570_v7 }
 0x51d   : > { %v2745_v18 = vpop.eup %2744 }
 0x51f   : > { %1594 = vadd.xlane.f32.xlu0 %v2745_v18 }
 0x521   : > { %v2747_v10 = vpop.eup %2746 }
 0x522   : > { %v2749_v23 = vpop.eup %2748  ;;  %1600 = vadd.xlane.f32.xlu1 %v2747_v10 }
 0x523   : > { %1598 = vadd.xlane.f32.xlu0 %v2749_v23 }
 0x524   : > { %v1529_v11 = vpop.xlane.xlu1 %1528 }
 0x525   : > { %v2751_v26 = vpop.eup %2750  ;;  %v3580_v42 = vsub.f32 %v3531_v61, %v1529_v11  ;;  %v1527_v43 = vpop.xlane.xlu0 %1526 }
 0x526   : > { %v2753_v44 = vpop.eup %2752  ;;  %v3583_v45 = vsub.f32 %v3533_v63, %v1527_v43  ;;  %1604 = vadd.xlane.f32.xlu1 %v2751_v26 }
 0x527   : > { %v1576_v46 = vmul.f32 1.442695, %v3580_v42  ;;  %1602 = vadd.xlane.f32.xlu0 %v2753_v44 }
 0x528   : > { %v1574_v47 = vmul.f32 1.442695, %v3583_v45  ;;  %v1533_v48 = vpop.xlane.xlu1 %1532 }
 0x529   : > { %2754 = vpow2.f32 %v1576_v46  ;;  %v3588_v52 = vsub.f32 %v3537_v9, %v1533_v48  ;;  %v1531_v53 = vpop.xlane.xlu0 %1530 }
 0x52a   : > { %2756 = vpow2.f32 %v1574_v47  ;;  %v3591_v24 = vsub.f32 %v3539_v15, %v1531_v53 }
 0x52b   : > { %v1580_v25 = vmul.f32 1.442695, %v3588_v52 }
 0x52c   : > { %v1578_v36 = vmul.f32 1.442695, %v3591_v24  ;;  %v1537_v56 = vpop.xlane.xlu1 %1536 }
 0x52d   : > { %2758 = vpow2.f32 %v1580_v25  ;;  %v3596_v57 = vsub.f32 %v3543_v19, %v1537_v56  ;;  %v1535_v58 = vpop.xlane.xlu0 %1534 }
 0x52e   : > { %2760 = vpow2.f32 %v1578_v36  ;;  %v3599_v59 = vsub.f32 %v3545_v21, %v1535_v58 }
 0x52f   : > { %v1584_v60 = vmul.f32 1.442695, %v3596_v57 }
 0x530   : > { %v1582_v61 = vmul.f32 1.442695, %v3599_v59  ;;  %v1541_v62 = vpop.xlane.xlu1 %1540 }
 0x531   : > { %2762 = vpow2.f32 %v1584_v60  ;;  %v3604_v63 = vsub.f32 %v3549_v27, %v1541_v62  ;;  %v1539_v3 = vpop.xlane.xlu0 %1538 }
 0x532   : > { %2764 = vpow2.f32 %v1582_v61  ;;  %v3607_v9 = vsub.f32 %v3551_v29, %v1539_v3 }
 0x533   : > { %v2755_v12 = vpop.eup %2754  ;;  %v1588_v15 = vmul.f32 1.442695, %v3604_v63 }
 0x534   : > { %v2757_v16 = vpop.eup %2756  ;;  %v1586_v19 = vmul.f32 1.442695, %v3607_v9  ;;  %1608 = vadd.xlane.f32.xlu1 %v2755_v12 }
 0x535   : > { %2766 = vpow2.f32 %v1588_v15  ;;  %1606 = vadd.xlane.f32.xlu0 %v2757_v16 }
 0x536   : > { %2768 = vpow2.f32 %v1586_v19 }
 0x537   : > { %v2759_v20 = vpop.eup %2758 }
 0x538   : > { %v2761_v21 = vpop.eup %2760  ;;  %1612 = vadd.xlane.f32.xlu1 %v2759_v20 }
 0x539   : > { %1610 = vadd.xlane.f32.xlu0 %v2761_v21 }
 0x53b   : > { %v2763_v22 = vpop.eup %2762 }
 0x53c   : > { %v2765_v27 = vpop.eup %2764  ;;  %1616 = vadd.xlane.f32.xlu1 %v2763_v22 }
 0x53d   : > { %1614 = vadd.xlane.f32.xlu0 %v2765_v27 }
 0x53f   : > { %v2767_v28 = vpop.eup %2766 }
 0x540   : > { %v2769_v29 = vpop.eup %2768  ;;  %1620 = vadd.xlane.f32.xlu1 %v2767_v28 }
 0x541   : > { %1618 = vadd.xlane.f32.xlu0 %v2769_v29 }
 0x5a3   : > { %v1593_v32 = vpop.xlane.xlu1 %1592 }
 0x5a4   : > { %2770 = vlog2.f32 %v1593_v32 }
 0x5a7   : > { %v1597_v50 = vpop.xlane.xlu1 %1596 }
 0x5a8   : > { %2772 = vlog2.f32 %v1597_v50  ;;  %v1591_v51 = vpop.xlane.xlu0 %1590 }
 0x5a9   : > { %2774 = vlog2.f32 %v1591_v51 }
 0x5ac   : > { %v1595_v13 = vpop.xlane.xlu0 %1594 }
 0x5ad   : > { %2776 = vlog2.f32 %v1595_v13 }
 0x5ae   : > { %v2771_v30 = vpop.eup %2770 }
 0x5af   : > { %v1625_v31 = vmul.f32 0.6931472, %v2771_v30  ;;  %v1601_v33 = vpop.xlane.xlu1 %1600 }
 0x5b0   : > { %2778 = vlog2.f32 %v1601_v33  ;;  %v1599_v35 = vpop.xlane.xlu0 %1598 }
 0x5b1   : > { %v1655_v39 = vsub.f32 %v3555_v49, %v1625_v31  ;;  %2780 = vlog2.f32 %v1599_v35 }
 0x5b2   : > { %v2773_v40 = vpop.eup %2772 }
 0x5b3   : > { %v2775_v0 = vpop.eup %2774  ;;  %1671 = vst [vmem:[#allocation14 + $0x8] sm:$0xff] %v1655_v39  ;;  %v1629_v1 = vmul.f32 0.6931472, %v2773_v40  ;;  %v1605_v4 = vpop.xlane.xlu1 %1604 }
 0x5b4   : > { %v1623_v37 = vmul.f32 0.6931472, %v2775_v0  ;;  %2782 = vlog2.f32 %v1605_v4  ;;  %v1603_v6 = vpop.xlane.xlu0 %1602 }
 0x5b5   : > { %v1657_v7 = vsub.f32 %v3558_v14, %v1629_v1  ;;  %2784 = vlog2.f32 %v1603_v6 }
 0x5b6   : > { %v1654_v5 = vsub.f32 %v3560_v54, %v1623_v37 }
 0x5b7   : > { %v2777_v8 = vpop.eup %2776  ;;  %1673 = vst [vmem:[#allocation14 + $0x18] sm:$0xff] %v1657_v7 }
 0x5b8   : > { %1670 = vst [vmem:[#allocation14] sm:$0xff] %v1654_v5  ;;  %v1627_v17 = vmul.f32 0.6931472, %v2777_v8 }
 0x5ba   : > { %v2779_v18 = vpop.eup %2778  ;;  %v1656_v49 = vsub.f32 %v3564_v34, %v1627_v17 }
 0x5bb   : > { %v2781_v10 = vpop.eup %2780  ;;  %v1633_v23 = vmul.f32 0.6931472, %v2779_v18 }
 0x5bc   : > { %1672 = vst [vmem:[#allocation14 + $0x10] sm:$0xff] %v1656_v49  ;;  %v1631_v11 = vmul.f32 0.6931472, %v2781_v10 }
 0x5bd   : > { %v1659_v26 = vsub.f32 %v3569_v41, %v1633_v23 }
 0x5be   : > { %v2783_v43 = vpop.eup %2782  ;;  %v1658_v44 = vsub.f32 %v3566_v38, %v1631_v11 }
 0x5bf   : > { %v2785_v14 = vpop.eup %2784  ;;  %1675 = vst [vmem:[#allocation14 + $0x28] sm:$0xff] %v1659_v26  ;;  %v1637_v46 = vmul.f32 0.6931472, %v2783_v43 }
 0x5c0   : > { %1674 = vst [vmem:[#allocation14 + $0x20] sm:$0xff] %v1658_v44  ;;  %v1635_v54 = vmul.f32 0.6931472, %v2785_v14 }
 0x5c1   : > { %v1661_v47 = vsub.f32 %v3575_v55, %v1637_v46  ;;  %v1609_v48 = vpop.xlane.xlu1 %1608 }
 0x5c2   : > { %v1660_v53 = vsub.f32 %v3572_v2, %v1635_v54  ;;  %2786 = vlog2.f32 %v1609_v48  ;;  %v1607_v34 = vpop.xlane.xlu0 %1606 }
 0x5c3   : > { %1677 = vst [vmem:[#allocation14 + $0x38] sm:$0xff] %v1661_v47  ;;  %2788 = vlog2.f32 %v1607_v34 }
 0x5c4   : > { %1676 = vst [vmem:[#allocation14 + $0x30] sm:$0xff] %v1660_v53 }
 0x5c5   : > { %v1613_v25 = vpop.xlane.xlu1 %1612 }
 0x5c6   : > { %2790 = vlog2.f32 %v1613_v25  ;;  %v1611_v41 = vpop.xlane.xlu0 %1610 }
 0x5c7   : > { %2792 = vlog2.f32 %v1611_v41 }
 0x5c9   : > { %v1617_v38 = vpop.xlane.xlu1 %1616 }
 0x5ca   : > { %2794 = vlog2.f32 %v1617_v38  ;;  %v1615_v36 = vpop.xlane.xlu0 %1614 }
 0x5cb   : > { %2796 = vlog2.f32 %v1615_v36 }
 0x5cc   : > { %v2787_v56 = vpop.eup %2786 }
 0x5cd   : > { %v2789_v58 = vpop.eup %2788  ;;  %v1641_v60 = vmul.f32 0.6931472, %v2787_v56  ;;  %v1621_v55 = vpop.xlane.xlu1 %1620 }
 0x5ce   : > { %v1639_v61 = vmul.f32 0.6931472, %v2789_v58  ;;  %2798 = vlog2.f32 %v1621_v55  ;;  %v1619_v2 = vpop.xlane.xlu0 %1618 }
 0x5cf   : > { %v1663_v62 = vsub.f32 %v3580_v42, %v1641_v60  ;;  %2800 = vlog2.f32 %v1619_v2 }
 0x5d0   : > { %v2791_v3 = vpop.eup %2790  ;;  %v1662_v12 = vsub.f32 %v3583_v45, %v1639_v61 }
 0x5d1   : > { %v2793_v15 = vpop.eup %2792  ;;  %1679 = vst [vmem:[#allocation14 + $0x48] sm:$0xff] %v1663_v62  ;;  %v1645_v16 = vmul.f32 0.6931472, %v2791_v3 }
 0x5d2   : > { %1678 = vst [vmem:[#allocation14 + $0x40] sm:$0xff] %v1662_v12  ;;  %v1643_v19 = vmul.f32 0.6931472, %v2793_v15 }
 0x5d3   : > { %v1665_v20 = vsub.f32 %v3588_v52, %v1645_v16 }
 0x5d4   : > { %v2795_v21 = vpop.eup %2794  ;;  %v1664_v22 = vsub.f32 %v3591_v24, %v1643_v19 }
 0x5d5   : > { %v2797_v27 = vpop.eup %2796  ;;  %1681 = vst [vmem:[#allocation14 + $0x58] sm:$0xff] %v1665_v20  ;;  %v1649_v28 = vmul.f32 0.6931472, %v2795_v21 }
 0x5d6   : > { %1680 = vst [vmem:[#allocation14 + $0x50] sm:$0xff] %v1664_v22  ;;  %v1647_v29 = vmul.f32 0.6931472, %v2797_v27 }
 0x5d7   : > { %v1667_v42 = vsub.f32 %v3596_v57, %v1649_v28 }
 0x5d8   : > { %v2799_v32 = vpop.eup %2798  ;;  %v1666_v45 = vsub.f32 %v3599_v59, %v1647_v29 }
 0x5d9   : > { %v2801_v50 = vpop.eup %2800  ;;  %1683 = vst [vmem:[#allocation14 + $0x68] sm:$0xff] %v1667_v42  ;;  %v1653_v51 = vmul.f32 0.6931472, %v2799_v32 }
 0x5da   : > { %1682 = vst [vmem:[#allocation14 + $0x60] sm:$0xff] %v1666_v45  ;;  %v1651_v13 = vmul.f32 0.6931472, %v2801_v50 }
 0x5db   : > { %v1669_v52 = vsub.f32 %v3604_v63, %v1653_v51 }
 0x5dc   : > { %v1668_v30 = vsub.f32 %v3607_v9, %v1651_v13 }
 0x5dd   : > { %1685 = vst [vmem:[#allocation14 + $0x78] sm:$0xff] %v1669_v52 }
 0x5de   : > { %1684 = vst [vmem:[#allocation14 + $0x70] sm:$0xff] %v1668_v30 }
 0x5df PF: > { %s3684_s22 = sadd.s32 4294967295, %s3038_s29   ;;  %s3048_s12 = smov [#allocation14]  }
 0x5e0   : > { %p3629_p8 = scmp.eq.s32.totalorder %s3684_s22, 1  ;;  %s1701_s20 = sshll.u32 %s3048_s12, 4  ;;  %s1702_s20 = int_to_ptr.vmem [resolvable:$true] %s1701_s20 }
 0x5e1   : > { %s2970_s1 = scalar_lea.vmem %s1702_s20, 2048  ;;  %s2976_s30 = scalar_lea.vmem %s1702_s20, 4096 }
 0x5e2   : > { %p2971_p9 = scmp.ne.s32.totalorder %s1702_s20, %s2970_s1  ;;  %p2977_p12 = scmp.lt.s32.totalorder %s1702_s20, %s1702_s20 }
 0x5e3   : > { %p2978_p13 = scmp.lt.s32.totalorder %s2976_s30, %s2970_s1 }
 0x5e4   : > { %p2972_p10 = pnand %p2971_p9, %p3629_p8 }
 0x5e5   : > { %p2979_p0 = por %p2978_p13, %p2977_p12 }
 0x5e6   : > { %p2973_p11 = pneg %p2972_p10 }
 0x5e8   : > { %p2980_p1 = pnand %p2979_p0, %p2973_p11 }
 0x5ea   : > { %2983 = shalt.err (!%p2980_p1)
}
 0x5eb   : > { %s2984_s23 = scalar_lea.hbm %s3671_s8, 2048 }
 0x5ec   : > { %p2985_p4 = scmp.ne.s32.totalorder %s3671_s8, %s2984_s23  ;;  %p2990_p7 = scmp.lt.u32.totalorder %s2984_s23, %s3671_s8 }
 0x5ee   : > { %p2986_p2 = pnand %p2985_p4, %p3629_p8 }
 0x5f0   : > { %p2987_p3 = pneg %p2986_p2 }
 0x5f2   : > { %p2992_p5 = pnand %p2990_p7, %p2987_p3 }
 0x5f4   : > { %2995 = shalt.err (!%p2992_p5)
}
 0x5f5   : > { %s3049_s13 = smov 128   ;;  %s3050_s19 = smov 8  }
 0x5f6   : > { %2662 = dma.vmem_to_hbm [thread:$0]  (%p3629_p8), %s1702_s20, 2048, %s3671_s8, [#allocation5], %s3049_s13, %s3049_s13, %s3050_s19  }
 0x5f7 PF: > { %p2701_p6 = scmp.ge.s32.totalorder %s3038_s29, 2  ;;  %s3686_s11 = sadd.s32 4294967294, %s3038_s29  }
 0x5f8   : > { %p2702_p9 = scmp.eq.s32.totalorder %s3686_s11, 1 }
 0x5fa   : > { %p2685_p10 = pnand %p2702_p9, %p2701_p6 }
 0x5fc   : > { %3025 = dma.done.wait (!%p2685_p10), [#allocation5], 2048  }
 0x5fd   : > { %3027 = vsyncadd (!%p2685_p10), [#allocation5], 4294965248  ;;  %s25_s29 = sadd.s32 1, %s3038_s29   ;;  %s3687_s27 = smov %s3034_s28 }
 0x5fe   : > { %p22_p11 = scmp.ge.s32.totalorder %s25_s29, 4   ;;  %s3688_s28 = smov %s3690_s18 }
 0x600   :  { %24 = sbr.rel (!%p22_p11) target bundleno = 9 (0x9), region = 122 }
 0x607   :  { %1722 = vsyncpa [#allocation4], 1 }
 0x608   :  { %1724 = vsyncpa [#allocation4 + $0x1], 1 }
 0x609   :  { %1725 = vsyncpa [#allocation7], 1 }
 0x60a   :  { %1726 = vsyncpa [#allocation10], 1 }
 0x60b   :  { %1727 = vsyncpa [#allocation13], 1 }
 0x60c   :  { %1728 = vsyncpa [#allocation5], 1 }
 0x60d   :  { %1730 = vsyncpa [#allocation5 + $0x1], 1 }

</bundles_post_ra>
